<compile_context>
chip_gen: v7x
topology: tpu7x:2x2x1
jax: 0.10.0
libtpu: 0.0.40
codegen_flags: <defaults>
</compile_context>

<pallas_src>
import numpy as np
import jax
import jax.numpy as jnp
from jax.experimental import pallas as pl
from jax.experimental.pallas import tpu as pltpu

NEG_SLOPE = 0.2
BN_EPS = 1e-5


# ------------------------------ parameters ---------------------------------

def _init_bn(key, c):
    k1, k2, k3, k4 = jax.random.split(key, 4)
    return dict(
        gamma=1.0 + 0.1 * jax.random.normal(k1, (c,), jnp.float32),
        beta=0.1 * jax.random.normal(k2, (c,), jnp.float32),
        mean=0.1 * jax.random.normal(k3, (c,), jnp.float32),
        var=jax.random.uniform(k4, (c,), jnp.float32, 0.5, 1.5),
    )


def init_decoder_params(key, output_channels, base_channels, latent_channels,
                        num_upsample_layers, num_res_blocks):
    keys = iter(jax.random.split(key, 64))

    def conv_w(cin, cout, k):
        return 0.1 * jax.random.normal(next(keys), (k, k, cin, cout),
                                       jnp.float32)

    ch_before = base_channels * 2 ** num_upsample_layers
    params = {}
    params["head"] = dict(w=conv_w(latent_channels, ch_before, 3),
                          bn=_init_bn(next(keys), ch_before))
    cur = ch_before
    params["res_blocks"] = []
    for _ in range(num_res_blocks):
        params["res_blocks"].append(dict(
            c1=dict(w=conv_w(cur, cur, 3), bn=_init_bn(next(keys), cur)),
            c2=dict(w=conv_w(cur, cur, 3), bn=_init_bn(next(keys), cur)),
        ))
    params["ups"] = []
    for _ in range(num_upsample_layers):
        out_ch = cur // 2
        # ConvTranspose weight stored (k, k, Cin, Cout); its conv-equivalent
        # is the spatial flip (used both by the kernel and the reference).
        params["ups"].append(dict(w=conv_w(cur, out_ch, 3),
                                  bn=_init_bn(next(keys), out_ch)))
        cur = out_ch
    params["final"] = dict(
        w=conv_w(cur, output_channels, 5),
        b=0.1 * jax.random.normal(next(keys), (output_channels,), jnp.float32),
    )
    return params


# --------------------- host-side constant preparation ----------------------

def _bn_fold_np(bn):
    g = np.asarray(bn["gamma"], np.float32)
    b = np.asarray(bn["beta"], np.float32)
    m = np.asarray(bn["mean"], np.float32)
    v = np.asarray(bn["var"], np.float32)
    scale = g / np.sqrt(v + BN_EPS)
    return scale, b - m * scale


def _toeplitz_conv(w_np, W):
    """(k,k,Cin,Cout) conv weight -> (k, (W+k-1)*Cin, W*Cout) block-Toeplitz.

    out[y] (lanes = (x, c)) = sum_dy pad_row[y+dy] @ T[dy], where pad_row is
    the zero-padded input row flattened as (x_padded, c)."""
    k, _, Cin, Cout = w_np.shape
    Wp = W + k - 1
    T = np.zeros((k, Wp, Cin, W, Cout), np.float32)
    for dy in range(k):
        for dx in range(k):
            for x in range(W):
                T[dy, x + dx, :, x, :] += w_np[dy, dx]
    return T.reshape(k, Wp * Cin, W * Cout)


def _toeplitz_up(wt_np, W):
    """ConvTranspose(k=3,s=2,p=1,op=1) weight -> 2 sub-pixel Toeplitz mats.

    EO[u] = in_pad[u] @ T[0] + in_pad[u+1] @ T[1], where in_pad is the input
    row right-padded by one zero pixel block; EO[u][:2W*Cout]  = output row 2u
    and EO[u][2W*Cout:] = output row 2u+1 (both in (x, c) lane order)."""
    wf = np.asarray(wt_np, np.float32)[::-1, ::-1]   # conv-equivalent (flipped)
    _, _, Cin, Cout = wt_np.shape
    top = np.zeros((W + 1, Cin, 4 * W, Cout), np.float32)
    bot = np.zeros((W + 1, Cin, 4 * W, Cout), np.float32)
    off = 2 * W                                      # start of odd-row half
    for v in range(W):
        # even output rows y' = 2u
        top[v, :, 2 * v, :] += wf[1, 1]
        top[v, :, 2 * v + 1, :] += wf[1, 0]
        top[v + 1, :, 2 * v + 1, :] += wf[1, 2]
        # odd output rows y' = 2u + 1
        top[v, :, off + 2 * v, :] += wf[0, 1]
        top[v, :, off + 2 * v + 1, :] += wf[0, 0]
        top[v + 1, :, off + 2 * v + 1, :] += wf[0, 2]
        bot[v, :, off + 2 * v, :] += wf[2, 1]
        bot[v, :, off + 2 * v + 1, :] += wf[2, 0]
        bot[v + 1, :, off + 2 * v + 1, :] += wf[2, 2]
    top = top.reshape((W + 1) * Cin, 4 * W * Cout)
    bot = bot.reshape((W + 1) * Cin, 4 * W * Cout)
    return np.stack([top, bot], axis=0)


# ---------------------------- in-kernel blocks ------------------------------

def _leaky(y):
    # LeakyReLU(0.2): slope < 1 so max(y, 0.2*y) is exact and cheaper than
    # cmp+select.
    return jnp.maximum(y, NEG_SLOPE * y)


def _conv_block(h, pref, t_ref, s_ref, b_ref, *, H, W, Cin, Cout, k,
                relu, residual):
    """'same' KxK conv + folded-BN affine (+ residual) (+ LeakyReLU)."""
    p = (k - 1) // 2
    pref[...] = jnp.zeros(pref.shape, pref.dtype)          # zero halo
    pref[p:p + H, p * Cin:(p + W) * Cin] = h                # stage interior
    # k matmuls, contraction depth (W+k-1)*Cin; tap 0 initializes acc.
    acc = jnp.dot(pref[0:H, :].astype(jnp.bfloat16), t_ref[0],
                  preferred_element_type=jnp.float32)
    for dy in range(1, k):
        lhs = pref[dy:dy + H, :].astype(jnp.bfloat16)
        acc = acc + jnp.dot(lhs, t_ref[dy],
                            preferred_element_type=jnp.float32)
    y = acc * s_ref[...] + b_ref[...]
    if residual is not None:
        y = y + residual
    if relu:
        y = _leaky(y)
    return y


def _up_block(h, pref, eo_ref, st_ref, t_ref, s_ref, b_ref,
              *, H, W, Cin, Cout):
    """ConvTranspose(k=3,s=2,p=1,op=1) + folded-BN + LeakyReLU (sub-pixel)."""
    pref[...] = jnp.zeros(pref.shape, pref.dtype)           # right/bottom pad
    pref[0:H, 0:W * Cin] = h
    top = pref[0:H, :].astype(jnp.bfloat16)
    bot = pref[1:H + 1, :].astype(jnp.bfloat16)
    eo = (jnp.dot(top, t_ref[0], preferred_element_type=jnp.float32) +
          jnp.dot(bot, t_ref[1], preferred_element_type=jnp.float32))
    eo = eo * s_ref[...] + b_ref[...]
    eo_ref[...] = _leaky(eo)
    half = 2 * W * Cout
    for u in range(H):         # interleave even/odd output rows (sublane copies)
        st_ref[2 * u:2 * u + 1, :] = eo_ref[u:u + 1, 0:half]
        st_ref[2 * u + 1:2 * u + 2, :] = eo_ref[u:u + 1, half:2 * half]
    return st_ref[...]


def _make_decoder_kernel(ops, n_operands):
    def kernel(*refs):
        x_ref = refs[0]
        opnd = refs[1:1 + n_operands]
        out_ref = refs[1 + n_operands]
        scratch = refs[2 + n_operands:]

        h = x_ref[0]                       # (H0, W0*Clat) f32
        oi = 0
        si = 0
        res = None
        for kind, m in ops:
            t_ref, s_ref, b_ref = opnd[oi], opnd[oi + 1], opnd[oi + 2]
            oi += 3
            if kind == "conv":
                pref = scratch[si]
                si += 1
                if m["save_res"]:
                    res = h
                h = _conv_block(h, pref, t_ref, s_ref, b_ref,
                                H=m["H"], W=m["W"], Cin=m["Cin"],
                                Cout=m["Cout"], k=m["k"], relu=m["relu"],
                                residual=res if m["add_res"] else None)
            else:  # "up"
                pref, eo_ref, st_ref = (scratch[si], scratch[si + 1],
                                        scratch[si + 2])
                si += 3
                h = _up_block(h, pref, eo_ref, st_ref, t_ref, s_ref, b_ref,
                              H=m["H"], W=m["W"], Cin=m["Cin"], Cout=m["Cout"])
        out_ref[0] = h
    return kernel


# ------------------------------ program build -------------------------------

def _build_program(params, H0, W0):
    ops, operands, scratch = [], [], []

    def add_conv(w, scale, bias, H, W, relu, save_res=False, add_res=False):
        w_np = np.asarray(w, np.float32)
        k, _, Cin, Cout = w_np.shape
        operands.append(jnp.asarray(_toeplitz_conv(w_np, W), jnp.bfloat16))
        operands.append(jnp.asarray(np.tile(scale, W)[None, :], jnp.float32))
        operands.append(jnp.asarray(np.tile(bias, W)[None, :], jnp.float32))
        scratch.append(pltpu.VMEM((H + k - 1, (W + k - 1) * Cin), jnp.float32))
        ops.append(("conv", dict(H=H, W=W, Cin=Cin, Cout=Cout, k=k, relu=relu,
                                 save_res=save_res, add_res=add_res)))
        return H, W, Cout

    def add_up(w, scale, bias, H, W):
        w_np = np.asarray(w, np.float32)
        _, _, Cin, Cout = w_np.shape
        operands.append(jnp.asarray(_toeplitz_up(w_np, W), jnp.bfloat16))
        operands.append(jnp.asarray(np.tile(scale, 4 * W)[None, :], jnp.float32))
        operands.append(jnp.asarray(np.tile(bias, 4 * W)[None, :], jnp.float32))
        scratch.append(pltpu.VMEM((H + 1, (W + 1) * Cin), jnp.float32))
        scratch.append(pltpu.VMEM((H, 4 * W * Cout), jnp.float32))
        scratch.append(pltpu.VMEM((2 * H, 2 * W * Cout), jnp.float32))
        ops.append(("up", dict(H=H, W=W, Cin=Cin, Cout=Cout)))
        return 2 * H, 2 * W, Cout

    H, W = H0, W0
    s, b = _bn_fold_np(params["head"]["bn"])
    H, W, C = add_conv(params["head"]["w"], s, b, H, W, relu=True)
    for rb in params["res_blocks"]:
        s1, b1 = _bn_fold_np(rb["c1"]["bn"])
        add_conv(rb["c1"]["w"], s1, b1, H, W, relu=True, save_res=True)
        s2, b2 = _bn_fold_np(rb["c2"]["bn"])
        add_conv(rb["c2"]["w"], s2, b2, H, W, relu=True, add_res=True)
    for up in params["ups"]:
        su, bu = _bn_fold_np(up["bn"])
        H, W, C = add_up(up["w"], su, bu, H, W)
    pf = params["final"]
    cf = int(pf["w"].shape[3])
    H, W, C = add_conv(pf["w"], np.ones((cf,), np.float32),
                       np.asarray(pf["b"], np.float32), H, W, relu=False)
    return ops, operands, scratch, (H, W, C)


def build_decoder_forward(params, N, H0, W0):
    ops, operands, scratch, (Ho, Wo, Co) = _build_program(params, H0, W0)
    c_lat = int(params["head"]["w"].shape[2])
    kernel = _make_decoder_kernel(ops, len(operands))

    def _const_spec(a):
        # Constant operands: same block every grid step -> fetched once.
        if a.ndim == 2:
            return pl.BlockSpec(a.shape, lambda n: (0, 0))
        return pl.BlockSpec(a.shape, lambda n: (0, 0, 0))

    call = pl.pallas_call(
        kernel,
        out_shape=jax.ShapeDtypeStruct((N, Ho, Wo * Co), jnp.float32),
        grid=(N,),
        in_specs=[pl.BlockSpec((1, H0, W0 * c_lat), lambda n: (n, 0, 0))]
                 + [_const_spec(a) for a in operands],
        out_specs=pl.BlockSpec((1, Ho, Wo * Co), lambda n: (n, 0, 0)),
        scratch_shapes=scratch,
        compiler_params=pltpu.CompilerParams(
            dimension_semantics=("parallel",)),
    )

    @jax.jit
    def forward(x_nhwc):
        xr = x_nhwc.astype(jnp.float32).reshape(N, H0, W0 * c_lat)
        y = call(xr, *operands)
        return y.reshape(N, Ho, Wo, Co)

    return forward


# --------------------------- pure-JAX reference -----------------------------

def ref_forward(params, x):
    """Same math (bf16 matmul inputs, f32 accumulation/epilogues)."""
    def conv(h, w, scale, bias, padding, act, residual=None,
             lhs_dilation=(1, 1)):
        y = jax.lax.conv_general_dilated(
            h.astype(jnp.bfloat16),
            jnp.asarray(w, jnp.float32).astype(jnp.bfloat16),
            (1, 1), padding, lhs_dilation=lhs_dilation,
            dimension_numbers=("NHWC", "HWIO", "NHWC"),
            preferred_element_type=jnp.float32)
        y = y * scale + bias
        if residual is not None:
            y = y + residual
        if act:
            y = jnp.where(y > 0, y, NEG_SLOPE * y)
        return y

    s, b = _bn_fold_np(params["head"]["bn"])
    h = conv(x, params["head"]["w"], s, b, ((1, 1), (1, 1)), True)
    for rb in params["res_blocks"]:
        res = h
        s1, b1 = _bn_fold_np(rb["c1"]["bn"])
        h1 = conv(h, rb["c1"]["w"], s1, b1, ((1, 1), (1, 1)), True)
        s2, b2 = _bn_fold_np(rb["c2"]["bn"])
        h = conv(h1, rb["c2"]["w"], s2, b2, ((1, 1), (1, 1)), True,
                 residual=res)
    for up in params["ups"]:
        su, bu = _bn_fold_np(up["bn"])
        h = conv(h, up["w"][::-1, ::-1, :, :], su, bu, ((1, 2), (1, 2)), True,
                 lhs_dilation=(2, 2))
    pf = params["final"]
    h = conv(h, pf["w"], np.ones((int(pf["w"].shape[3]),), np.float32),
             np.asarray(pf["b"], np.float32), ((2, 2), (2, 2)), False)
    return h


# --------------------------------- main --------------------------------------

if __name__ == "__main__":
    key = jax.random.PRNGKey(0)
    kp, kx = jax.random.split(key)

    # Small config consistent with the module's constructor.
    output_channels = 3
    base_channels = 8
    latent_channels = 16
    num_upsample_layers = 2
    num_res_blocks = 1

    params = init_decoder_params(kp, output_channels, base_channels,
                                 latent_channels, num_upsample_layers,
                                 num_res_blocks)

    # NHWC input (PyTorch NCHW equivalent: (2, 16, 4, 4)).
    N, H0, W0 = 2, 4, 4
    x = jax.random.normal(kx, (N, H0, W0, latent_channels), jnp.float32)

    forward = build_decoder_forward(params, N, H0, W0)
    out = jax.block_until_ready(forward(x))

    side = H0 * 2 ** num_upsample_layers
    assert out.shape == (N, side, side, output_channels), out.shape

    ref = jax.block_until_ready(ref_forward(params, x))
    np.testing.assert_allclose(np.asarray(out), np.asarray(ref),
                               rtol=1e-3, atol=1e-3)

    print("KERNEL_OK")
</pallas_src>

<mosaic_0001>
module attributes {stable_mosaic.version = 11 : i64} {
  func.func @kernel(%arg0: i32, %arg1: memref<1x4x64xf32, #tpu.memory_space<vmem>>, %arg2: memref<3x96x128xbf16, #tpu.memory_space<vmem>>, %arg3: memref<1x128xf32, #tpu.memory_space<vmem>>, %arg4: memref<1x128xf32, #tpu.memory_space<vmem>>, %arg5: memref<3x192x128xbf16, #tpu.memory_space<vmem>>, %arg6: memref<1x128xf32, #tpu.memory_space<vmem>>, %arg7: memref<1x128xf32, #tpu.memory_space<vmem>>, %arg8: memref<3x192x128xbf16, #tpu.memory_space<vmem>>, %arg9: memref<1x128xf32, #tpu.memory_space<vmem>>, %arg10: memref<1x128xf32, #tpu.memory_space<vmem>>, %arg11: memref<2x160x256xbf16, #tpu.memory_space<vmem>>, %arg12: memref<1x256xf32, #tpu.memory_space<vmem>>, %arg13: memref<1x256xf32, #tpu.memory_space<vmem>>, %arg14: memref<2x144x256xbf16, #tpu.memory_space<vmem>>, %arg15: memref<1x256xf32, #tpu.memory_space<vmem>>, %arg16: memref<1x256xf32, #tpu.memory_space<vmem>>, %arg17: memref<5x160x48xbf16, #tpu.memory_space<vmem>>, %arg18: memref<1x48xf32, #tpu.memory_space<vmem>>, %arg19: memref<1x48xf32, #tpu.memory_space<vmem>>, %arg20: memref<1x16x48xf32, #tpu.memory_space<vmem>>, %arg21: memref<6x96xf32, #tpu.memory_space<vmem>>, %arg22: memref<6x192xf32, #tpu.memory_space<vmem>>, %arg23: memref<6x192xf32, #tpu.memory_space<vmem>>, %arg24: memref<5x160xf32, #tpu.memory_space<vmem>>, %arg25: memref<4x256xf32, #tpu.memory_space<vmem>>, %arg26: memref<8x128xf32, #tpu.memory_space<vmem>>, %arg27: memref<9x144xf32, #tpu.memory_space<vmem>>, %arg28: memref<8x256xf32, #tpu.memory_space<vmem>>, %arg29: memref<16x128xf32, #tpu.memory_space<vmem>>, %arg30: memref<20x160xf32, #tpu.memory_space<vmem>>) attributes {dimension_semantics = [#tpu.dimension_semantics<parallel>], iteration_bounds = array<i64: 2>, scalar_prefetch = 0 : i64, scratch_operands = 10 : i64, tpu.core_type = #tpu.core_type<tc>, window_params = [{transform_indices = @transform_0, window_bounds = array<i64: 1, 4, 64>}, {pipeline_mode = #tpu.pipeline_mode<synchronous>, transform_indices = @transform_1, window_bounds = array<i64: 3, 96, 128>}, {pipeline_mode = #tpu.pipeline_mode<synchronous>, transform_indices = @transform_2, window_bounds = array<i64: 1, 128>}, {pipeline_mode = #tpu.pipeline_mode<synchronous>, transform_indices = @transform_3, window_bounds = array<i64: 1, 128>}, {pipeline_mode = #tpu.pipeline_mode<synchronous>, transform_indices = @transform_4, window_bounds = array<i64: 3, 192, 128>}, {pipeline_mode = #tpu.pipeline_mode<synchronous>, transform_indices = @transform_5, window_bounds = array<i64: 1, 128>}, {pipeline_mode = #tpu.pipeline_mode<synchronous>, transform_indices = @transform_6, window_bounds = array<i64: 1, 128>}, {pipeline_mode = #tpu.pipeline_mode<synchronous>, transform_indices = @transform_7, window_bounds = array<i64: 3, 192, 128>}, {pipeline_mode = #tpu.pipeline_mode<synchronous>, transform_indices = @transform_8, window_bounds = array<i64: 1, 128>}, {pipeline_mode = #tpu.pipeline_mode<synchronous>, transform_indices = @transform_9, window_bounds = array<i64: 1, 128>}, {pipeline_mode = #tpu.pipeline_mode<synchronous>, transform_indices = @transform_10, window_bounds = array<i64: 2, 160, 256>}, {pipeline_mode = #tpu.pipeline_mode<synchronous>, transform_indices = @transform_11, window_bounds = array<i64: 1, 256>}, {pipeline_mode = #tpu.pipeline_mode<synchronous>, transform_indices = @transform_12, window_bounds = array<i64: 1, 256>}, {pipeline_mode = #tpu.pipeline_mode<synchronous>, transform_indices = @transform_13, window_bounds = array<i64: 2, 144, 256>}, {pipeline_mode = #tpu.pipeline_mode<synchronous>, transform_indices = @transform_14, window_bounds = array<i64: 1, 256>}, {pipeline_mode = #tpu.pipeline_mode<synchronous>, transform_indices = @transform_15, window_bounds = array<i64: 1, 256>}, {pipeline_mode = #tpu.pipeline_mode<synchronous>, transform_indices = @transform_16, window_bounds = array<i64: 5, 160, 48>}, {pipeline_mode = #tpu.pipeline_mode<synchronous>, transform_indices = @transform_17, window_bounds = array<i64: 1, 48>}, {pipeline_mode = #tpu.pipeline_mode<synchronous>, transform_indices = @transform_18, window_bounds = array<i64: 1, 48>}, {transform_indices = @transform_19, window_bounds = array<i64: 1, 16, 48>}]} {
    %c0 = arith.constant 0 : index
    %c0_0 = arith.constant 0 : index
    %c0_1 = arith.constant 0 : index
    %0 = vector.load %arg1[%c0, %c0_0, %c0_1] : memref<1x4x64xf32, #tpu.memory_space<vmem>>, vector<1x4x64xf32>
    %1 = vector.shape_cast %0 : vector<1x4x64xf32> to vector<4x64xf32>
    %cst = arith.constant 0.000000e+00 : f32
    %2 = vector.broadcast %cst : f32 to vector<6x96xf32>
    %c0_2 = arith.constant 0 : index
    %c0_3 = arith.constant 0 : index
    %3 = vector.load %arg21[%c0_2, %c0_3] : memref<6x96xf32, #tpu.memory_space<vmem>>, vector<6x96xf32>
    tpu.vector_store %arg21[%c0_2, %c0_3], %2 {strides = array<i32>} : memref<6x96xf32, #tpu.memory_space<vmem>>, vector<6x96xf32>,
    %c1 = arith.constant 1 : index
    %c16 = arith.constant 16 : index
    %4 = vector.load %arg21[%c1, %c16] : memref<6x96xf32, #tpu.memory_space<vmem>>, vector<4x64xf32>
    tpu.vector_store %arg21[%c1, %c16], %1 {strides = array<i32>} : memref<6x96xf32, #tpu.memory_space<vmem>>, vector<4x64xf32>,
    %c0_4 = arith.constant 0 : index
    %c0_5 = arith.constant 0 : index
    %5 = vector.load %arg21[%c0_4, %c0_5] : memref<6x96xf32, #tpu.memory_space<vmem>>, vector<4x96xf32>
    %6 = arith.truncf %5 : vector<4x96xf32> to vector<4x96xbf16>
    %c0_6 = arith.constant 0 : index
    %c0_7 = arith.constant 0 : index
    %c0_8 = arith.constant 0 : index
    %7 = vector.load %arg2[%c0_6, %c0_7, %c0_8] : memref<3x96x128xbf16, #tpu.memory_space<vmem>>, vector<1x96x128xbf16>
    %8 = vector.shape_cast %7 : vector<1x96x128xbf16> to vector<96x128xbf16>
    %cst_9 = arith.constant dense<0.000000e+00> : vector<4x128xf32>
    %9 = tpu.matmul %6, %8, %cst_9 {dimension_numbers = #tpu.dot_dimension_numbers<[1], [0], [0], [1], [0, 0, 1, 1], [], []>} : vector<4x96xbf16>, vector<96x128xbf16>, vector<4x128xf32> -> vector<4x128xf32>
    %c1_10 = arith.constant 1 : index
    %c0_11 = arith.constant 0 : index
    %10 = vector.load %arg21[%c1_10, %c0_11] : memref<6x96xf32, #tpu.memory_space<vmem>>, vector<4x96xf32>
    %11 = arith.truncf %10 : vector<4x96xf32> to vector<4x96xbf16>
    %c1_12 = arith.constant 1 : index
    %c0_13 = arith.constant 0 : index
    %c0_14 = arith.constant 0 : index
    %12 = vector.load %arg2[%c1_12, %c0_13, %c0_14] : memref<3x96x128xbf16, #tpu.memory_space<vmem>>, vector<1x96x128xbf16>
    %13 = vector.shape_cast %12 : vector<1x96x128xbf16> to vector<96x128xbf16>
    %cst_15 = arith.constant dense<0.000000e+00> : vector<4x128xf32>
    %14 = tpu.matmul %11, %13, %cst_15 {dimension_numbers = #tpu.dot_dimension_numbers<[1], [0], [0], [1], [0, 0, 1, 1], [], []>} : vector<4x96xbf16>, vector<96x128xbf16>, vector<4x128xf32> -> vector<4x128xf32>
    %15 = arith.addf %9, %14 : vector<4x128xf32>
    %c2 = arith.constant 2 : index
    %c0_16 = arith.constant 0 : index
    %16 = vector.load %arg21[%c2, %c0_16] : memref<6x96xf32, #tpu.memory_space<vmem>>, vector<4x96xf32>
    %17 = arith.truncf %16 : vector<4x96xf32> to vector<4x96xbf16>
    %c2_17 = arith.constant 2 : index
    %c0_18 = arith.constant 0 : index
    %c0_19 = arith.constant 0 : index
    %18 = vector.load %arg2[%c2_17, %c0_18, %c0_19] : memref<3x96x128xbf16, #tpu.memory_space<vmem>>, vector<1x96x128xbf16>
    %19 = vector.shape_cast %18 : vector<1x96x128xbf16> to vector<96x128xbf16>
    %cst_20 = arith.constant dense<0.000000e+00> : vector<4x128xf32>
    %20 = tpu.matmul %17, %19, %cst_20 {dimension_numbers = #tpu.dot_dimension_numbers<[1], [0], [0], [1], [0, 0, 1, 1], [], []>} : vector<4x96xbf16>, vector<96x128xbf16>, vector<4x128xf32> -> vector<4x128xf32>
    %21 = arith.addf %15, %20 : vector<4x128xf32>
    %c0_21 = arith.constant 0 : index
    %c0_22 = arith.constant 0 : index
    %22 = vector.load %arg3[%c0_21, %c0_22] : memref<1x128xf32, #tpu.memory_space<vmem>>, vector<1x128xf32>
    %23 = vector.broadcast %22 : vector<1x128xf32> to vector<4x128xf32>
    %24 = arith.mulf %21, %23 : vector<4x128xf32>
    %c0_23 = arith.constant 0 : index
    %c0_24 = arith.constant 0 : index
    %25 = vector.load %arg4[%c0_23, %c0_24] : memref<1x128xf32, #tpu.memory_space<vmem>>, vector<1x128xf32>
    %26 = vector.broadcast %25 : vector<1x128xf32> to vector<4x128xf32>
    %27 = arith.addf %24, %26 : vector<4x128xf32>
    %cst_25 = arith.constant 2.000000e-01 : f32
    %28 = vector.broadcast %cst_25 : f32 to vector<4x128xf32>
    %29 = arith.mulf %28, %27 : vector<4x128xf32>
    %30 = arith.maximumf %27, %29 : vector<4x128xf32>
    %cst_26 = arith.constant 0.000000e+00 : f32
    %31 = vector.broadcast %cst_26 : f32 to vector<6x192xf32>
    %c0_27 = arith.constant 0 : index
    %c0_28 = arith.constant 0 : index
    %32 = vector.load %arg22[%c0_27, %c0_28] : memref<6x192xf32, #tpu.memory_space<vmem>>, vector<6x192xf32>
    tpu.vector_store %arg22[%c0_27, %c0_28], %31 {strides = array<i32>} : memref<6x192xf32, #tpu.memory_space<vmem>>, vector<6x192xf32>,
    %c1_29 = arith.constant 1 : index
    %c32 = arith.constant 32 : index
    %33 = vector.load %arg22[%c1_29, %c32] : memref<6x192xf32, #tpu.memory_space<vmem>>, vector<4x128xf32>
    tpu.vector_store %arg22[%c1_29, %c32], %30 {strides = array<i32>} : memref<6x192xf32, #tpu.memory_space<vmem>>, vector<4x128xf32>,
    %c0_30 = arith.constant 0 : index
    %c0_31 = arith.constant 0 : index
    %34 = vector.load %arg22[%c0_30, %c0_31] : memref<6x192xf32, #tpu.memory_space<vmem>>, vector<4x192xf32>
    %35 = arith.truncf %34 : vector<4x192xf32> to vector<4x192xbf16>
    %c0_32 = arith.constant 0 : index
    %c0_33 = arith.constant 0 : index
    %c0_34 = arith.constant 0 : index
    %36 = vector.load %arg5[%c0_32, %c0_33, %c0_34] : memref<3x192x128xbf16, #tpu.memory_space<vmem>>, vector<1x192x128xbf16>
    %37 = vector.shape_cast %36 : vector<1x192x128xbf16> to vector<192x128xbf16>
    %cst_35 = arith.constant dense<0.000000e+00> : vector<4x128xf32>
    %38 = tpu.matmul %35, %37, %cst_35 {dimension_numbers = #tpu.dot_dimension_numbers<[1], [0], [0], [1], [0, 0, 1, 1], [], []>} : vector<4x192xbf16>, vector<192x128xbf16>, vector<4x128xf32> -> vector<4x128xf32>
    %c1_36 = arith.constant 1 : index
    %c0_37 = arith.constant 0 : index
    %39 = vector.load %arg22[%c1_36, %c0_37] : memref<6x192xf32, #tpu.memory_space<vmem>>, vector<4x192xf32>
    %40 = arith.truncf %39 : vector<4x192xf32> to vector<4x192xbf16>
    %c1_38 = arith.constant 1 : index
    %c0_39 = arith.constant 0 : index
    %c0_40 = arith.constant 0 : index
    %41 = vector.load %arg5[%c1_38, %c0_39, %c0_40] : memref<3x192x128xbf16, #tpu.memory_space<vmem>>, vector<1x192x128xbf16>
    %42 = vector.shape_cast %41 : vector<1x192x128xbf16> to vector<192x128xbf16>
    %cst_41 = arith.constant dense<0.000000e+00> : vector<4x128xf32>
    %43 = tpu.matmul %40, %42, %cst_41 {dimension_numbers = #tpu.dot_dimension_numbers<[1], [0], [0], [1], [0, 0, 1, 1], [], []>} : vector<4x192xbf16>, vector<192x128xbf16>, vector<4x128xf32> -> vector<4x128xf32>
    %44 = arith.addf %38, %43 : vector<4x128xf32>
    %c2_42 = arith.constant 2 : index
    %c0_43 = arith.constant 0 : index
    %45 = vector.load %arg22[%c2_42, %c0_43] : memref<6x192xf32, #tpu.memory_space<vmem>>, vector<4x192xf32>
    %46 = arith.truncf %45 : vector<4x192xf32> to vector<4x192xbf16>
    %c2_44 = arith.constant 2 : index
    %c0_45 = arith.constant 0 : index
    %c0_46 = arith.constant 0 : index
    %47 = vector.load %arg5[%c2_44, %c0_45, %c0_46] : memref<3x192x128xbf16, #tpu.memory_space<vmem>>, vector<1x192x128xbf16>
    %48 = vector.shape_cast %47 : vector<1x192x128xbf16> to vector<192x128xbf16>
    %cst_47 = arith.constant dense<0.000000e+00> : vector<4x128xf32>
    %49 = tpu.matmul %46, %48, %cst_47 {dimension_numbers = #tpu.dot_dimension_numbers<[1], [0], [0], [1], [0, 0, 1, 1], [], []>} : vector<4x192xbf16>, vector<192x128xbf16>, vector<4x128xf32> -> vector<4x128xf32>
    %50 = arith.addf %44, %49 : vector<4x128xf32>
    %c0_48 = arith.constant 0 : index
    %c0_49 = arith.constant 0 : index
    %51 = vector.load %arg6[%c0_48, %c0_49] : memref<1x128xf32, #tpu.memory_space<vmem>>, vector<1x128xf32>
    %52 = vector.broadcast %51 : vector<1x128xf32> to vector<4x128xf32>
    %53 = arith.mulf %50, %52 : vector<4x128xf32>
    %c0_50 = arith.constant 0 : index
    %c0_51 = arith.constant 0 : index
    %54 = vector.load %arg7[%c0_50, %c0_51] : memref<1x128xf32, #tpu.memory_space<vmem>>, vector<1x128xf32>
    %55 = vector.broadcast %54 : vector<1x128xf32> to vector<4x128xf32>
    %56 = arith.addf %53, %55 : vector<4x128xf32>
    %cst_52 = arith.constant 2.000000e-01 : f32
    %57 = vector.broadcast %cst_52 : f32 to vector<4x128xf32>
    %58 = arith.mulf %57, %56 : vector<4x128xf32>
    %59 = arith.maximumf %56, %58 : vector<4x128xf32>
    %cst_53 = arith.constant 0.000000e+00 : f32
    %60 = vector.broadcast %cst_53 : f32 to vector<6x192xf32>
    %c0_54 = arith.constant 0 : index
    %c0_55 = arith.constant 0 : index
    %61 = vector.load %arg23[%c0_54, %c0_55] : memref<6x192xf32, #tpu.memory_space<vmem>>, vector<6x192xf32>
    tpu.vector_store %arg23[%c0_54, %c0_55], %60 {strides = array<i32>} : memref<6x192xf32, #tpu.memory_space<vmem>>, vector<6x192xf32>,
    %c1_56 = arith.constant 1 : index
    %c32_57 = arith.constant 32 : index
    %62 = vector.load %arg23[%c1_56, %c32_57] : memref<6x192xf32, #tpu.memory_space<vmem>>, vector<4x128xf32>
    tpu.vector_store %arg23[%c1_56, %c32_57], %59 {strides = array<i32>} : memref<6x192xf32, #tpu.memory_space<vmem>>, vector<4x128xf32>,
    %c0_58 = arith.constant 0 : index
    %c0_59 = arith.constant 0 : index
    %63 = vector.load %arg23[%c0_58, %c0_59] : memref<6x192xf32, #tpu.memory_space<vmem>>, vector<4x192xf32>
    %64 = arith.truncf %63 : vector<4x192xf32> to vector<4x192xbf16>
    %c0_60 = arith.constant 0 : index
    %c0_61 = arith.constant 0 : index
    %c0_62 = arith.constant 0 : index
    %65 = vector.load %arg8[%c0_60, %c0_61, %c0_62] : memref<3x192x128xbf16, #tpu.memory_space<vmem>>, vector<1x192x128xbf16>
    %66 = vector.shape_cast %65 : vector<1x192x128xbf16> to vector<192x128xbf16>
    %cst_63 = arith.constant dense<0.000000e+00> : vector<4x128xf32>
    %67 = tpu.matmul %64, %66, %cst_63 {dimension_numbers = #tpu.dot_dimension_numbers<[1], [0], [0], [1], [0, 0, 1, 1], [], []>} : vector<4x192xbf16>, vector<192x128xbf16>, vector<4x128xf32> -> vector<4x128xf32>
    %c1_64 = arith.constant 1 : index
    %c0_65 = arith.constant 0 : index
    %68 = vector.load %arg23[%c1_64, %c0_65] : memref<6x192xf32, #tpu.memory_space<vmem>>, vector<4x192xf32>
    %69 = arith.truncf %68 : vector<4x192xf32> to vector<4x192xbf16>
    %c1_66 = arith.constant 1 : index
    %c0_67 = arith.constant 0 : index
    %c0_68 = arith.constant 0 : index
    %70 = vector.load %arg8[%c1_66, %c0_67, %c0_68] : memref<3x192x128xbf16, #tpu.memory_space<vmem>>, vector<1x192x128xbf16>
    %71 = vector.shape_cast %70 : vector<1x192x128xbf16> to vector<192x128xbf16>
    %cst_69 = arith.constant dense<0.000000e+00> : vector<4x128xf32>
    %72 = tpu.matmul %69, %71, %cst_69 {dimension_numbers = #tpu.dot_dimension_numbers<[1], [0], [0], [1], [0, 0, 1, 1], [], []>} : vector<4x192xbf16>, vector<192x128xbf16>, vector<4x128xf32> -> vector<4x128xf32>
    %73 = arith.addf %67, %72 : vector<4x128xf32>
    %c2_70 = arith.constant 2 : index
    %c0_71 = arith.constant 0 : index
    %74 = vector.load %arg23[%c2_70, %c0_71] : memref<6x192xf32, #tpu.memory_space<vmem>>, vector<4x192xf32>
    %75 = arith.truncf %74 : vector<4x192xf32> to vector<4x192xbf16>
    %c2_72 = arith.constant 2 : index
    %c0_73 = arith.constant 0 : index
    %c0_74 = arith.constant 0 : index
    %76 = vector.load %arg8[%c2_72, %c0_73, %c0_74] : memref<3x192x128xbf16, #tpu.memory_space<vmem>>, vector<1x192x128xbf16>
    %77 = vector.shape_cast %76 : vector<1x192x128xbf16> to vector<192x128xbf16>
    %cst_75 = arith.constant dense<0.000000e+00> : vector<4x128xf32>
    %78 = tpu.matmul %75, %77, %cst_75 {dimension_numbers = #tpu.dot_dimension_numbers<[1], [0], [0], [1], [0, 0, 1, 1], [], []>} : vector<4x192xbf16>, vector<192x128xbf16>, vector<4x128xf32> -> vector<4x128xf32>
    %79 = arith.addf %73, %78 : vector<4x128xf32>
    %c0_76 = arith.constant 0 : index
    %c0_77 = arith.constant 0 : index
    %80 = vector.load %arg9[%c0_76, %c0_77] : memref<1x128xf32, #tpu.memory_space<vmem>>, vector<1x128xf32>
    %81 = vector.broadcast %80 : vector<1x128xf32> to vector<4x128xf32>
    %82 = arith.mulf %79, %81 : vector<4x128xf32>
    %c0_78 = arith.constant 0 : index
    %c0_79 = arith.constant 0 : index
    %83 = vector.load %arg10[%c0_78, %c0_79] : memref<1x128xf32, #tpu.memory_space<vmem>>, vector<1x128xf32>
    %84 = vector.broadcast %83 : vector<1x128xf32> to vector<4x128xf32>
    %85 = arith.addf %82, %84 : vector<4x128xf32>
    %86 = arith.addf %85, %30 : vector<4x128xf32>
    %cst_80 = arith.constant 2.000000e-01 : f32
    %87 = vector.broadcast %cst_80 : f32 to vector<4x128xf32>
    %88 = arith.mulf %87, %86 : vector<4x128xf32>
    %89 = arith.maximumf %86, %88 : vector<4x128xf32>
    %cst_81 = arith.constant 0.000000e+00 : f32
    %90 = vector.broadcast %cst_81 : f32 to vector<5x160xf32>
    %c0_82 = arith.constant 0 : index
    %c0_83 = arith.constant 0 : index
    %91 = vector.load %arg24[%c0_82, %c0_83] : memref<5x160xf32, #tpu.memory_space<vmem>>, vector<5x160xf32>
    tpu.vector_store %arg24[%c0_82, %c0_83], %90 {strides = array<i32>} : memref<5x160xf32, #tpu.memory_space<vmem>>, vector<5x160xf32>,
    %c0_84 = arith.constant 0 : index
    %c0_85 = arith.constant 0 : index
    %92 = vector.load %arg24[%c0_84, %c0_85] : memref<5x160xf32, #tpu.memory_space<vmem>>, vector<4x128xf32>
    tpu.vector_store %arg24[%c0_84, %c0_85], %89 {strides = array<i32>} : memref<5x160xf32, #tpu.memory_space<vmem>>, vector<4x128xf32>,
    %c0_86 = arith.constant 0 : index
    %c0_87 = arith.constant 0 : index
    %93 = vector.load %arg24[%c0_86, %c0_87] : memref<5x160xf32, #tpu.memory_space<vmem>>, vector<4x160xf32>
    %94 = arith.truncf %93 : vector<4x160xf32> to vector<4x160xbf16>
    %c1_88 = arith.constant 1 : index
    %c0_89 = arith.constant 0 : index
    %95 = vector.load %arg24[%c1_88, %c0_89] : memref<5x160xf32, #tpu.memory_space<vmem>>, vector<4x160xf32>
    %96 = arith.truncf %95 : vector<4x160xf32> to vector<4x160xbf16>
    %c0_90 = arith.constant 0 : index
    %c0_91 = arith.constant 0 : index
    %c0_92 = arith.constant 0 : index
    %97 = vector.load %arg11[%c0_90, %c0_91, %c0_92] : memref<2x160x256xbf16, #tpu.memory_space<vmem>>, vector<1x160x256xbf16>
    %98 = vector.shape_cast %97 : vector<1x160x256xbf16> to vector<160x256xbf16>
    %cst_93 = arith.constant dense<0.000000e+00> : vector<4x256xf32>
    %99 = tpu.matmul %94, %98, %cst_93 {dimension_numbers = #tpu.dot_dimension_numbers<[1], [0], [0], [1], [0, 0, 1, 1], [], []>} : vector<4x160xbf16>, vector<160x256xbf16>, vector<4x256xf32> -> vector<4x256xf32>
    %c1_94 = arith.constant 1 : index
    %c0_95 = arith.constant 0 : index
    %c0_96 = arith.constant 0 : index
    %100 = vector.load %arg11[%c1_94, %c0_95, %c0_96] : memref<2x160x256xbf16, #tpu.memory_space<vmem>>, vector<1x160x256xbf16>
    %101 = vector.shape_cast %100 : vector<1x160x256xbf16> to vector<160x256xbf16>
    %cst_97 = arith.constant dense<0.000000e+00> : vector<4x256xf32>
    %102 = tpu.matmul %96, %101, %cst_97 {dimension_numbers = #tpu.dot_dimension_numbers<[1], [0], [0], [1], [0, 0, 1, 1], [], []>} : vector<4x160xbf16>, vector<160x256xbf16>, vector<4x256xf32> -> vector<4x256xf32>
    %103 = arith.addf %99, %102 : vector<4x256xf32>
    %c0_98 = arith.constant 0 : index
    %c0_99 = arith.constant 0 : index
    %104 = vector.load %arg12[%c0_98, %c0_99] : memref<1x256xf32, #tpu.memory_space<vmem>>, vector<1x256xf32>
    %105 = vector.broadcast %104 : vector<1x256xf32> to vector<4x256xf32>
    %106 = arith.mulf %103, %105 : vector<4x256xf32>
    %c0_100 = arith.constant 0 : index
    %c0_101 = arith.constant 0 : index
    %107 = vector.load %arg13[%c0_100, %c0_101] : memref<1x256xf32, #tpu.memory_space<vmem>>, vector<1x256xf32>
    %108 = vector.broadcast %107 : vector<1x256xf32> to vector<4x256xf32>
    %109 = arith.addf %106, %108 : vector<4x256xf32>
    %cst_102 = arith.constant 2.000000e-01 : f32
    %110 = vector.broadcast %cst_102 : f32 to vector<4x256xf32>
    %111 = arith.mulf %110, %109 : vector<4x256xf32>
    %112 = arith.maximumf %109, %111 : vector<4x256xf32>
    %c0_103 = arith.constant 0 : index
    %c0_104 = arith.constant 0 : index
    %113 = vector.load %arg25[%c0_103, %c0_104] : memref<4x256xf32, #tpu.memory_space<vmem>>, vector<4x256xf32>
    tpu.vector_store %arg25[%c0_103, %c0_104], %112 {strides = array<i32>} : memref<4x256xf32, #tpu.memory_space<vmem>>, vector<4x256xf32>,
    %c0_105 = arith.constant 0 : index
    %c0_106 = arith.constant 0 : index
    %114 = vector.load %arg25[%c0_105, %c0_106] : memref<4x256xf32, #tpu.memory_space<vmem>>, vector<1x128xf32>
    %c0_107 = arith.constant 0 : index
    %c0_108 = arith.constant 0 : index
    %115 = vector.load %arg26[%c0_107, %c0_108] : memref<8x128xf32, #tpu.memory_space<vmem>>, vector<1x128xf32>
    tpu.vector_store %arg26[%c0_107, %c0_108], %114 {strides = array<i32>} : memref<8x128xf32, #tpu.memory_space<vmem>>, vector<1x128xf32>,
    %c0_109 = arith.constant 0 : index
    %c128 = arith.constant 128 : index
    %116 = vector.load %arg25[%c0_109, %c128] : memref<4x256xf32, #tpu.memory_space<vmem>>, vector<1x128xf32>
    %c1_110 = arith.constant 1 : index
    %c0_111 = arith.constant 0 : index
    %117 = vector.load %arg26[%c1_110, %c0_111] : memref<8x128xf32, #tpu.memory_space<vmem>>, vector<1x128xf32>
    tpu.vector_store %arg26[%c1_110, %c0_111], %116 {strides = array<i32>} : memref<8x128xf32, #tpu.memory_space<vmem>>, vector<1x128xf32>,
    %c1_112 = arith.constant 1 : index
    %c0_113 = arith.constant 0 : index
    %118 = vector.load %arg25[%c1_112, %c0_113] : memref<4x256xf32, #tpu.memory_space<vmem>>, vector<1x128xf32>
    %c2_114 = arith.constant 2 : index
    %c0_115 = arith.constant 0 : index
    %119 = vector.load %arg26[%c2_114, %c0_115] : memref<8x128xf32, #tpu.memory_space<vmem>>, vector<1x128xf32>
    tpu.vector_store %arg26[%c2_114, %c0_115], %118 {strides = array<i32>} : memref<8x128xf32, #tpu.memory_space<vmem>>, vector<1x128xf32>,
    %c1_116 = arith.constant 1 : index
    %c128_117 = arith.constant 128 : index
    %120 = vector.load %arg25[%c1_116, %c128_117] : memref<4x256xf32, #tpu.memory_space<vmem>>, vector<1x128xf32>
    %c3 = arith.constant 3 : index
    %c0_118 = arith.constant 0 : index
    %121 = vector.load %arg26[%c3, %c0_118] : memref<8x128xf32, #tpu.memory_space<vmem>>, vector<1x128xf32>
    tpu.vector_store %arg26[%c3, %c0_118], %120 {strides = array<i32>} : memref<8x128xf32, #tpu.memory_space<vmem>>, vector<1x128xf32>,
    %c2_119 = arith.constant 2 : index
    %c0_120 = arith.constant 0 : index
    %122 = vector.load %arg25[%c2_119, %c0_120] : memref<4x256xf32, #tpu.memory_space<vmem>>, vector<1x128xf32>
    %c4 = arith.constant 4 : index
    %c0_121 = arith.constant 0 : index
    %123 = vector.load %arg26[%c4, %c0_121] : memref<8x128xf32, #tpu.memory_space<vmem>>, vector<1x128xf32>
    tpu.vector_store %arg26[%c4, %c0_121], %122 {strides = array<i32>} : memref<8x128xf32, #tpu.memory_space<vmem>>, vector<1x128xf32>,
    %c2_122 = arith.constant 2 : index
    %c128_123 = arith.constant 128 : index
    %124 = vector.load %arg25[%c2_122, %c128_123] : memref<4x256xf32, #tpu.memory_space<vmem>>, vector<1x128xf32>
    %c5 = arith.constant 5 : index
    %c0_124 = arith.constant 0 : index
    %125 = vector.load %arg26[%c5, %c0_124] : memref<8x128xf32, #tpu.memory_space<vmem>>, vector<1x128xf32>
    tpu.vector_store %arg26[%c5, %c0_124], %124 {strides = array<i32>} : memref<8x128xf32, #tpu.memory_space<vmem>>, vector<1x128xf32>,
    %c3_125 = arith.constant 3 : index
    %c0_126 = arith.constant 0 : index
    %126 = vector.load %arg25[%c3_125, %c0_126] : memref<4x256xf32, #tpu.memory_space<vmem>>, vector<1x128xf32>
    %c6 = arith.constant 6 : index
    %c0_127 = arith.constant 0 : index
    %127 = vector.load %arg26[%c6, %c0_127] : memref<8x128xf32, #tpu.memory_space<vmem>>, vector<1x128xf32>
    tpu.vector_store %arg26[%c6, %c0_127], %126 {strides = array<i32>} : memref<8x128xf32, #tpu.memory_space<vmem>>, vector<1x128xf32>,
    %c3_128 = arith.constant 3 : index
    %c128_129 = arith.constant 128 : index
    %128 = vector.load %arg25[%c3_128, %c128_129] : memref<4x256xf32, #tpu.memory_space<vmem>>, vector<1x128xf32>
    %c7 = arith.constant 7 : index
    %c0_130 = arith.constant 0 : index
    %129 = vector.load %arg26[%c7, %c0_130] : memref<8x128xf32, #tpu.memory_space<vmem>>, vector<1x128xf32>
    tpu.vector_store %arg26[%c7, %c0_130], %128 {strides = array<i32>} : memref<8x128xf32, #tpu.memory_space<vmem>>, vector<1x128xf32>,
    %c0_131 = arith.constant 0 : index
    %c0_132 = arith.constant 0 : index
    %130 = vector.load %arg26[%c0_131, %c0_132] : memref<8x128xf32, #tpu.memory_space<vmem>>, vector<8x128xf32>
    %cst_133 = arith.constant 0.000000e+00 : f32
    %131 = vector.broadcast %cst_133 : f32 to vector<9x144xf32>
    %c0_134 = arith.constant 0 : index
    %c0_135 = arith.constant 0 : index
    %132 = vector.load %arg27[%c0_134, %c0_135] : memref<9x144xf32, #tpu.memory_space<vmem>>, vector<9x144xf32>
    tpu.vector_store %arg27[%c0_134, %c0_135], %131 {strides = array<i32>} : memref<9x144xf32, #tpu.memory_space<vmem>>, vector<9x144xf32>,
    %c0_136 = arith.constant 0 : index
    %c0_137 = arith.constant 0 : index
    %133 = vector.load %arg27[%c0_136, %c0_137] : memref<9x144xf32, #tpu.memory_space<vmem>>, vector<8x128xf32>
    tpu.vector_store %arg27[%c0_136, %c0_137], %130 {strides = array<i32>} : memref<9x144xf32, #tpu.memory_space<vmem>>, vector<8x128xf32>,
    %c0_138 = arith.constant 0 : index
    %c0_139 = arith.constant 0 : index
    %134 = vector.load %arg27[%c0_138, %c0_139] : memref<9x144xf32, #tpu.memory_space<vmem>>, vector<8x144xf32>
    %135 = arith.truncf %134 : vector<8x144xf32> to vector<8x144xbf16>
    %c1_140 = arith.constant 1 : index
    %c0_141 = arith.constant 0 : index
    %136 = vector.load %arg27[%c1_140, %c0_141] : memref<9x144xf32, #tpu.memory_space<vmem>>, vector<8x144xf32>
    %137 = arith.truncf %136 : vector<8x144xf32> to vector<8x144xbf16>
    %c0_142 = arith.constant 0 : index
    %c0_143 = arith.constant 0 : index
    %c0_144 = arith.constant 0 : index
    %138 = vector.load %arg14[%c0_142, %c0_143, %c0_144] : memref<2x144x256xbf16, #tpu.memory_space<vmem>>, vector<1x144x256xbf16>
    %139 = vector.shape_cast %138 : vector<1x144x256xbf16> to vector<144x256xbf16>
    %cst_145 = arith.constant dense<0.000000e+00> : vector<8x256xf32>
    %140 = tpu.matmul %135, %139, %cst_145 {dimension_numbers = #tpu.dot_dimension_numbers<[1], [0], [0], [1], [0, 0, 1, 1], [], []>} : vector<8x144xbf16>, vector<144x256xbf16>, vector<8x256xf32> -> vector<8x256xf32>
    %c1_146 = arith.constant 1 : index
    %c0_147 = arith.constant 0 : index
    %c0_148 = arith.constant 0 : index
    %141 = vector.load %arg14[%c1_146, %c0_147, %c0_148] : memref<2x144x256xbf16, #tpu.memory_space<vmem>>, vector<1x144x256xbf16>
    %142 = vector.shape_cast %141 : vector<1x144x256xbf16> to vector<144x256xbf16>
    %cst_149 = arith.constant dense<0.000000e+00> : vector<8x256xf32>
    %143 = tpu.matmul %137, %142, %cst_149 {dimension_numbers = #tpu.dot_dimension_numbers<[1], [0], [0], [1], [0, 0, 1, 1], [], []>} : vector<8x144xbf16>, vector<144x256xbf16>, vector<8x256xf32> -> vector<8x256xf32>
    %144 = arith.addf %140, %143 : vector<8x256xf32>
    %c0_150 = arith.constant 0 : index
    %c0_151 = arith.constant 0 : index
    %145 = vector.load %arg15[%c0_150, %c0_151] : memref<1x256xf32, #tpu.memory_space<vmem>>, vector<1x256xf32>
    %146 = vector.broadcast %145 : vector<1x256xf32> to vector<8x256xf32>
    %147 = arith.mulf %144, %146 : vector<8x256xf32>
    %c0_152 = arith.constant 0 : index
    %c0_153 = arith.constant 0 : index
    %148 = vector.load %arg16[%c0_152, %c0_153] : memref<1x256xf32, #tpu.memory_space<vmem>>, vector<1x256xf32>
    %149 = vector.broadcast %148 : vector<1x256xf32> to vector<8x256xf32>
    %150 = arith.addf %147, %149 : vector<8x256xf32>
    %cst_154 = arith.constant 2.000000e-01 : f32
    %151 = vector.broadcast %cst_154 : f32 to vector<8x256xf32>
    %152 = arith.mulf %151, %150 : vector<8x256xf32>
    %153 = arith.maximumf %150, %152 : vector<8x256xf32>
    %c0_155 = arith.constant 0 : index
    %c0_156 = arith.constant 0 : index
    %154 = vector.load %arg28[%c0_155, %c0_156] : memref<8x256xf32, #tpu.memory_space<vmem>>, vector<8x256xf32>
    tpu.vector_store %arg28[%c0_155, %c0_156], %153 {strides = array<i32>} : memref<8x256xf32, #tpu.memory_space<vmem>>, vector<8x256xf32>,
    %c0_157 = arith.constant 0 : index
    %c0_158 = arith.constant 0 : index
    %155 = vector.load %arg28[%c0_157, %c0_158] : memref<8x256xf32, #tpu.memory_space<vmem>>, vector<1x128xf32>
    %c0_159 = arith.constant 0 : index
    %c0_160 = arith.constant 0 : index
    %156 = vector.load %arg29[%c0_159, %c0_160] : memref<16x128xf32, #tpu.memory_space<vmem>>, vector<1x128xf32>
    tpu.vector_store %arg29[%c0_159, %c0_160], %155 {strides = array<i32>} : memref<16x128xf32, #tpu.memory_space<vmem>>, vector<1x128xf32>,
    %c0_161 = arith.constant 0 : index
    %c128_162 = arith.constant 128 : index
    %157 = vector.load %arg28[%c0_161, %c128_162] : memref<8x256xf32, #tpu.memory_space<vmem>>, vector<1x128xf32>
    %c1_163 = arith.constant 1 : index
    %c0_164 = arith.constant 0 : index
    %158 = vector.load %arg29[%c1_163, %c0_164] : memref<16x128xf32, #tpu.memory_space<vmem>>, vector<1x128xf32>
    tpu.vector_store %arg29[%c1_163, %c0_164], %157 {strides = array<i32>} : memref<16x128xf32, #tpu.memory_space<vmem>>, vector<1x128xf32>,
    %c1_165 = arith.constant 1 : index
    %c0_166 = arith.constant 0 : index
    %159 = vector.load %arg28[%c1_165, %c0_166] : memref<8x256xf32, #tpu.memory_space<vmem>>, vector<1x128xf32>
    %c2_167 = arith.constant 2 : index
    %c0_168 = arith.constant 0 : index
    %160 = vector.load %arg29[%c2_167, %c0_168] : memref<16x128xf32, #tpu.memory_space<vmem>>, vector<1x128xf32>
    tpu.vector_store %arg29[%c2_167, %c0_168], %159 {strides = array<i32>} : memref<16x128xf32, #tpu.memory_space<vmem>>, vector<1x128xf32>,
    %c1_169 = arith.constant 1 : index
    %c128_170 = arith.constant 128 : index
    %161 = vector.load %arg28[%c1_169, %c128_170] : memref<8x256xf32, #tpu.memory_space<vmem>>, vector<1x128xf32>
    %c3_171 = arith.constant 3 : index
    %c0_172 = arith.constant 0 : index
    %162 = vector.load %arg29[%c3_171, %c0_172] : memref<16x128xf32, #tpu.memory_space<vmem>>, vector<1x128xf32>
    tpu.vector_store %arg29[%c3_171, %c0_172], %161 {strides = array<i32>} : memref<16x128xf32, #tpu.memory_space<vmem>>, vector<1x128xf32>,
    %c2_173 = arith.constant 2 : index
    %c0_174 = arith.constant 0 : index
    %163 = vector.load %arg28[%c2_173, %c0_174] : memref<8x256xf32, #tpu.memory_space<vmem>>, vector<1x128xf32>
    %c4_175 = arith.constant 4 : index
    %c0_176 = arith.constant 0 : index
    %164 = vector.load %arg29[%c4_175, %c0_176] : memref<16x128xf32, #tpu.memory_space<vmem>>, vector<1x128xf32>
    tpu.vector_store %arg29[%c4_175, %c0_176], %163 {strides = array<i32>} : memref<16x128xf32, #tpu.memory_space<vmem>>, vector<1x128xf32>,
    %c2_177 = arith.constant 2 : index
    %c128_178 = arith.constant 128 : index
    %165 = vector.load %arg28[%c2_177, %c128_178] : memref<8x256xf32, #tpu.memory_space<vmem>>, vector<1x128xf32>
    %c5_179 = arith.constant 5 : index
    %c0_180 = arith.constant 0 : index
    %166 = vector.load %arg29[%c5_179, %c0_180] : memref<16x128xf32, #tpu.memory_space<vmem>>, vector<1x128xf32>
    tpu.vector_store %arg29[%c5_179, %c0_180], %165 {strides = array<i32>} : memref<16x128xf32, #tpu.memory_space<vmem>>, vector<1x128xf32>,
    %c3_181 = arith.constant 3 : index
    %c0_182 = arith.constant 0 : index
    %167 = vector.load %arg28[%c3_181, %c0_182] : memref<8x256xf32, #tpu.memory_space<vmem>>, vector<1x128xf32>
    %c6_183 = arith.constant 6 : index
    %c0_184 = arith.constant 0 : index
    %168 = vector.load %arg29[%c6_183, %c0_184] : memref<16x128xf32, #tpu.memory_space<vmem>>, vector<1x128xf32>
    tpu.vector_store %arg29[%c6_183, %c0_184], %167 {strides = array<i32>} : memref<16x128xf32, #tpu.memory_space<vmem>>, vector<1x128xf32>,
    %c3_185 = arith.constant 3 : index
    %c128_186 = arith.constant 128 : index
    %169 = vector.load %arg28[%c3_185, %c128_186] : memref<8x256xf32, #tpu.memory_space<vmem>>, vector<1x128xf32>
    %c7_187 = arith.constant 7 : index
    %c0_188 = arith.constant 0 : index
    %170 = vector.load %arg29[%c7_187, %c0_188] : memref<16x128xf32, #tpu.memory_space<vmem>>, vector<1x128xf32>
    tpu.vector_store %arg29[%c7_187, %c0_188], %169 {strides = array<i32>} : memref<16x128xf32, #tpu.memory_space<vmem>>, vector<1x128xf32>,
    %c4_189 = arith.constant 4 : index
    %c0_190 = arith.constant 0 : index
    %171 = vector.load %arg28[%c4_189, %c0_190] : memref<8x256xf32, #tpu.memory_space<vmem>>, vector<1x128xf32>
    %c8 = arith.constant 8 : index
    %c0_191 = arith.constant 0 : index
    %172 = vector.load %arg29[%c8, %c0_191] : memref<16x128xf32, #tpu.memory_space<vmem>>, vector<1x128xf32>
    tpu.vector_store %arg29[%c8, %c0_191], %171 {strides = array<i32>} : memref<16x128xf32, #tpu.memory_space<vmem>>, vector<1x128xf32>,
    %c4_192 = arith.constant 4 : index
    %c128_193 = arith.constant 128 : index
    %173 = vector.load %arg28[%c4_192, %c128_193] : memref<8x256xf32, #tpu.memory_space<vmem>>, vector<1x128xf32>
    %c9 = arith.constant 9 : index
    %c0_194 = arith.constant 0 : index
    %174 = vector.load %arg29[%c9, %c0_194] : memref<16x128xf32, #tpu.memory_space<vmem>>, vector<1x128xf32>
    tpu.vector_store %arg29[%c9, %c0_194], %173 {strides = array<i32>} : memref<16x128xf32, #tpu.memory_space<vmem>>, vector<1x128xf32>,
    %c5_195 = arith.constant 5 : index
    %c0_196 = arith.constant 0 : index
    %175 = vector.load %arg28[%c5_195, %c0_196] : memref<8x256xf32, #tpu.memory_space<vmem>>, vector<1x128xf32>
    %c10 = arith.constant 10 : index
    %c0_197 = arith.constant 0 : index
    %176 = vector.load %arg29[%c10, %c0_197] : memref<16x128xf32, #tpu.memory_space<vmem>>, vector<1x128xf32>
    tpu.vector_store %arg29[%c10, %c0_197], %175 {strides = array<i32>} : memref<16x128xf32, #tpu.memory_space<vmem>>, vector<1x128xf32>,
    %c5_198 = arith.constant 5 : index
    %c128_199 = arith.constant 128 : index
    %177 = vector.load %arg28[%c5_198, %c128_199] : memref<8x256xf32, #tpu.memory_space<vmem>>, vector<1x128xf32>
    %c11 = arith.constant 11 : index
    %c0_200 = arith.constant 0 : index
    %178 = vector.load %arg29[%c11, %c0_200] : memref<16x128xf32, #tpu.memory_space<vmem>>, vector<1x128xf32>
    tpu.vector_store %arg29[%c11, %c0_200], %177 {strides = array<i32>} : memref<16x128xf32, #tpu.memory_space<vmem>>, vector<1x128xf32>,
    %c6_201 = arith.constant 6 : index
    %c0_202 = arith.constant 0 : index
    %179 = vector.load %arg28[%c6_201, %c0_202] : memref<8x256xf32, #tpu.memory_space<vmem>>, vector<1x128xf32>
    %c12 = arith.constant 12 : index
    %c0_203 = arith.constant 0 : index
    %180 = vector.load %arg29[%c12, %c0_203] : memref<16x128xf32, #tpu.memory_space<vmem>>, vector<1x128xf32>
    tpu.vector_store %arg29[%c12, %c0_203], %179 {strides = array<i32>} : memref<16x128xf32, #tpu.memory_space<vmem>>, vector<1x128xf32>,
    %c6_204 = arith.constant 6 : index
    %c128_205 = arith.constant 128 : index
    %181 = vector.load %arg28[%c6_204, %c128_205] : memref<8x256xf32, #tpu.memory_space<vmem>>, vector<1x128xf32>
    %c13 = arith.constant 13 : index
    %c0_206 = arith.constant 0 : index
    %182 = vector.load %arg29[%c13, %c0_206] : memref<16x128xf32, #tpu.memory_space<vmem>>, vector<1x128xf32>
    tpu.vector_store %arg29[%c13, %c0_206], %181 {strides = array<i32>} : memref<16x128xf32, #tpu.memory_space<vmem>>, vector<1x128xf32>,
    %c7_207 = arith.constant 7 : index
    %c0_208 = arith.constant 0 : index
    %183 = vector.load %arg28[%c7_207, %c0_208] : memref<8x256xf32, #tpu.memory_space<vmem>>, vector<1x128xf32>
    %c14 = arith.constant 14 : index
    %c0_209 = arith.constant 0 : index
    %184 = vector.load %arg29[%c14, %c0_209] : memref<16x128xf32, #tpu.memory_space<vmem>>, vector<1x128xf32>
    tpu.vector_store %arg29[%c14, %c0_209], %183 {strides = array<i32>} : memref<16x128xf32, #tpu.memory_space<vmem>>, vector<1x128xf32>,
    %c7_210 = arith.constant 7 : index
    %c128_211 = arith.constant 128 : index
    %185 = vector.load %arg28[%c7_210, %c128_211] : memref<8x256xf32, #tpu.memory_space<vmem>>, vector<1x128xf32>
    %c15 = arith.constant 15 : index
    %c0_212 = arith.constant 0 : index
    %186 = vector.load %arg29[%c15, %c0_212] : memref<16x128xf32, #tpu.memory_space<vmem>>, vector<1x128xf32>
    tpu.vector_store %arg29[%c15, %c0_212], %185 {strides = array<i32>} : memref<16x128xf32, #tpu.memory_space<vmem>>, vector<1x128xf32>,
    %c0_213 = arith.constant 0 : index
    %c0_214 = arith.constant 0 : index
    %187 = vector.load %arg29[%c0_213, %c0_214] : memref<16x128xf32, #tpu.memory_space<vmem>>, vector<16x128xf32>
    %cst_215 = arith.constant 0.000000e+00 : f32
    %188 = vector.broadcast %cst_215 : f32 to vector<20x160xf32>
    %c0_216 = arith.constant 0 : index
    %c0_217 = arith.constant 0 : index
    %189 = vector.load %arg30[%c0_216, %c0_217] : memref<20x160xf32, #tpu.memory_space<vmem>>, vector<20x160xf32>
    tpu.vector_store %arg30[%c0_216, %c0_217], %188 {strides = array<i32>} : memref<20x160xf32, #tpu.memory_space<vmem>>, vector<20x160xf32>,
    %c2_218 = arith.constant 2 : index
    %c16_219 = arith.constant 16 : index
    %190 = vector.load %arg30[%c2_218, %c16_219] : memref<20x160xf32, #tpu.memory_space<vmem>>, vector<16x128xf32>
    tpu.vector_store %arg30[%c2_218, %c16_219], %187 {strides = array<i32>} : memref<20x160xf32, #tpu.memory_space<vmem>>, vector<16x128xf32>,
    %c0_220 = arith.constant 0 : index
    %c0_221 = arith.constant 0 : index
    %191 = vector.load %arg30[%c0_220, %c0_221] : memref<20x160xf32, #tpu.memory_space<vmem>>, vector<16x160xf32>
    %192 = arith.truncf %191 : vector<16x160xf32> to vector<16x160xbf16>
    %c0_222 = arith.constant 0 : index
    %c0_223 = arith.constant 0 : index
    %c0_224 = arith.constant 0 : index
    %193 = vector.load %arg17[%c0_222, %c0_223, %c0_224] : memref<5x160x48xbf16, #tpu.memory_space<vmem>>, vector<1x160x48xbf16>
    %194 = vector.shape_cast %193 : vector<1x160x48xbf16> to vector<160x48xbf16>
    %cst_225 = arith.constant dense<0.000000e+00> : vector<16x48xf32>
    %195 = tpu.matmul %192, %194, %cst_225 {dimension_numbers = #tpu.dot_dimension_numbers<[1], [0], [0], [1], [0, 0, 1, 1], [], []>} : vector<16x160xbf16>, vector<160x48xbf16>, vector<16x48xf32> -> vector<16x48xf32>
    %c1_226 = arith.constant 1 : index
    %c0_227 = arith.constant 0 : index
    %196 = vector.load %arg30[%c1_226, %c0_227] : memref<20x160xf32, #tpu.memory_space<vmem>>, vector<16x160xf32>
    %197 = arith.truncf %196 : vector<16x160xf32> to vector<16x160xbf16>
    %c1_228 = arith.constant 1 : index
    %c0_229 = arith.constant 0 : index
    %c0_230 = arith.constant 0 : index
    %198 = vector.load %arg17[%c1_228, %c0_229, %c0_230] : memref<5x160x48xbf16, #tpu.memory_space<vmem>>, vector<1x160x48xbf16>
    %199 = vector.shape_cast %198 : vector<1x160x48xbf16> to vector<160x48xbf16>
    %cst_231 = arith.constant dense<0.000000e+00> : vector<16x48xf32>
    %200 = tpu.matmul %197, %199, %cst_231 {dimension_numbers = #tpu.dot_dimension_numbers<[1], [0], [0], [1], [0, 0, 1, 1], [], []>} : vector<16x160xbf16>, vector<160x48xbf16>, vector<16x48xf32> -> vector<16x48xf32>
    %201 = arith.addf %195, %200 : vector<16x48xf32>
    %c2_232 = arith.constant 2 : index
    %c0_233 = arith.constant 0 : index
    %202 = vector.load %arg30[%c2_232, %c0_233] : memref<20x160xf32, #tpu.memory_space<vmem>>, vector<16x160xf32>
    %203 = arith.truncf %202 : vector<16x160xf32> to vector<16x160xbf16>
    %c2_234 = arith.constant 2 : index
    %c0_235 = arith.constant 0 : index
    %c0_236 = arith.constant 0 : index
    %204 = vector.load %arg17[%c2_234, %c0_235, %c0_236] : memref<5x160x48xbf16, #tpu.memory_space<vmem>>, vector<1x160x48xbf16>
    %205 = vector.shape_cast %204 : vector<1x160x48xbf16> to vector<160x48xbf16>
    %cst_237 = arith.constant dense<0.000000e+00> : vector<16x48xf32>
    %206 = tpu.matmul %203, %205, %cst_237 {dimension_numbers = #tpu.dot_dimension_numbers<[1], [0], [0], [1], [0, 0, 1, 1], [], []>} : vector<16x160xbf16>, vector<160x48xbf16>, vector<16x48xf32> -> vector<16x48xf32>
    %207 = arith.addf %201, %206 : vector<16x48xf32>
    %c3_238 = arith.constant 3 : index
    %c0_239 = arith.constant 0 : index
    %208 = vector.load %arg30[%c3_238, %c0_239] : memref<20x160xf32, #tpu.memory_space<vmem>>, vector<16x160xf32>
    %209 = arith.truncf %208 : vector<16x160xf32> to vector<16x160xbf16>
    %c3_240 = arith.constant 3 : index
    %c0_241 = arith.constant 0 : index
    %c0_242 = arith.constant 0 : index
    %210 = vector.load %arg17[%c3_240, %c0_241, %c0_242] : memref<5x160x48xbf16, #tpu.memory_space<vmem>>, vector<1x160x48xbf16>
    %211 = vector.shape_cast %210 : vector<1x160x48xbf16> to vector<160x48xbf16>
    %cst_243 = arith.constant dense<0.000000e+00> : vector<16x48xf32>
    %212 = tpu.matmul %209, %211, %cst_243 {dimension_numbers = #tpu.dot_dimension_numbers<[1], [0], [0], [1], [0, 0, 1, 1], [], []>} : vector<16x160xbf16>, vector<160x48xbf16>, vector<16x48xf32> -> vector<16x48xf32>
    %213 = arith.addf %207, %212 : vector<16x48xf32>
    %c4_244 = arith.constant 4 : index
    %c0_245 = arith.constant 0 : index
    %214 = vector.load %arg30[%c4_244, %c0_245] : memref<20x160xf32, #tpu.memory_space<vmem>>, vector<16x160xf32>
    %215 = arith.truncf %214 : vector<16x160xf32> to vector<16x160xbf16>
    %c4_246 = arith.constant 4 : index
    %c0_247 = arith.constant 0 : index
    %c0_248 = arith.constant 0 : index
    %216 = vector.load %arg17[%c4_246, %c0_247, %c0_248] : memref<5x160x48xbf16, #tpu.memory_space<vmem>>, vector<1x160x48xbf16>
    %217 = vector.shape_cast %216 : vector<1x160x48xbf16> to vector<160x48xbf16>
    %cst_249 = arith.constant dense<0.000000e+00> : vector<16x48xf32>
    %218 = tpu.matmul %215, %217, %cst_249 {dimension_numbers = #tpu.dot_dimension_numbers<[1], [0], [0], [1], [0, 0, 1, 1], [], []>} : vector<16x160xbf16>, vector<160x48xbf16>, vector<16x48xf32> -> vector<16x48xf32>
    %219 = arith.addf %213, %218 : vector<16x48xf32>
    %c0_250 = arith.constant 0 : index
    %c0_251 = arith.constant 0 : index
    %220 = vector.load %arg18[%c0_250, %c0_251] : memref<1x48xf32, #tpu.memory_space<vmem>>, vector<1x48xf32>
    %221 = vector.broadcast %220 : vector<1x48xf32> to vector<16x48xf32>
    %222 = arith.mulf %219, %221 : vector<16x48xf32>
    %c0_252 = arith.constant 0 : index
    %c0_253 = arith.constant 0 : index
    %223 = vector.load %arg19[%c0_252, %c0_253] : memref<1x48xf32, #tpu.memory_space<vmem>>, vector<1x48xf32>
    %224 = vector.broadcast %223 : vector<1x48xf32> to vector<16x48xf32>
    %225 = arith.addf %222, %224 : vector<16x48xf32>
    %c0_254 = arith.constant 0 : index
    %c0_255 = arith.constant 0 : index
    %c0_256 = arith.constant 0 : index
    %226 = vector.load %arg20[%c0_254, %c0_255, %c0_256] : memref<1x16x48xf32, #tpu.memory_space<vmem>>, vector<1x16x48xf32>
    %227 = vector.shape_cast %226 : vector<1x16x48xf32> to vector<16x48xf32>
    %228 = vector.shape_cast %225 : vector<16x48xf32> to vector<1x16x48xf32>
    tpu.vector_store %arg20[%c0_254, %c0_255, %c0_256], %228 {strides = array<i32>} : memref<1x16x48xf32, #tpu.memory_space<vmem>>, vector<1x16x48xf32>,
    return
  }
  func.func @transform_0(%arg0: i32) -> (i32, i32, i32) {
    %c0_i32 = arith.constant 0 : i32
    %c0_i32_0 = arith.constant 0 : i32
    %c0_i32_1 = arith.constant 0 : i32
    return %arg0, %c0_i32, %c0_i32_0 : i32, i32, i32
  }
  func.func @transform_1(%arg0: i32) -> (i32, i32, i32) {
    %c0_i32 = arith.constant 0 : i32
    %c0_i32_0 = arith.constant 0 : i32
    %c0_i32_1 = arith.constant 0 : i32
    %c0_i32_2 = arith.constant 0 : i32
    return %c0_i32, %c0_i32_0, %c0_i32_1 : i32, i32, i32
  }
  func.func @transform_2(%arg0: i32) -> (i32, i32) {
    %c0_i32 = arith.constant 0 : i32
    %c0_i32_0 = arith.constant 0 : i32
    %c0_i32_1 = arith.constant 0 : i32
    return %c0_i32, %c0_i32_0 : i32, i32
  }
  func.func @transform_3(%arg0: i32) -> (i32, i32) {
    %c0_i32 = arith.constant 0 : i32
    %c0_i32_0 = arith.constant 0 : i32
    %c0_i32_1 = arith.constant 0 : i32
    return %c0_i32, %c0_i32_0 : i32, i32
  }
  func.func @transform_4(%arg0: i32) -> (i32, i32, i32) {
    %c0_i32 = arith.constant 0 : i32
    %c0_i32_0 = arith.constant 0 : i32
    %c0_i32_1 = arith.constant 0 : i32
    %c0_i32_2 = arith.constant 0 : i32
    return %c0_i32, %c0_i32_0, %c0_i32_1 : i32, i32, i32
  }
  func.func @transform_5(%arg0: i32) -> (i32, i32) {
    %c0_i32 = arith.constant 0 : i32
    %c0_i32_0 = arith.constant 0 : i32
    %c0_i32_1 = arith.constant 0 : i32
    return %c0_i32, %c0_i32_0 : i32, i32
  }
  func.func @transform_6(%arg0: i32) -> (i32, i32) {
    %c0_i32 = arith.constant 0 : i32
    %c0_i32_0 = arith.constant 0 : i32
    %c0_i32_1 = arith.constant 0 : i32
    return %c0_i32, %c0_i32_0 : i32, i32
  }
  func.func @transform_7(%arg0: i32) -> (i32, i32, i32) {
    %c0_i32 = arith.constant 0 : i32
    %c0_i32_0 = arith.constant 0 : i32
    %c0_i32_1 = arith.constant 0 : i32
    %c0_i32_2 = arith.constant 0 : i32
    return %c0_i32, %c0_i32_0, %c0_i32_1 : i32, i32, i32
  }
  func.func @transform_8(%arg0: i32) -> (i32, i32) {
    %c0_i32 = arith.constant 0 : i32
    %c0_i32_0 = arith.constant 0 : i32
    %c0_i32_1 = arith.constant 0 : i32
    return %c0_i32, %c0_i32_0 : i32, i32
  }
  func.func @transform_9(%arg0: i32) -> (i32, i32) {
    %c0_i32 = arith.constant 0 : i32
    %c0_i32_0 = arith.constant 0 : i32
    %c0_i32_1 = arith.constant 0 : i32
    return %c0_i32, %c0_i32_0 : i32, i32
  }
  func.func @transform_10(%arg0: i32) -> (i32, i32, i32) {
    %c0_i32 = arith.constant 0 : i32
    %c0_i32_0 = arith.constant 0 : i32
    %c0_i32_1 = arith.constant 0 : i32
    %c0_i32_2 = arith.constant 0 : i32
    return %c0_i32, %c0_i32_0, %c0_i32_1 : i32, i32, i32
  }
  func.func @transform_11(%arg0: i32) -> (i32, i32) {
    %c0_i32 = arith.constant 0 : i32
    %c0_i32_0 = arith.constant 0 : i32
    %c0_i32_1 = arith.constant 0 : i32
    return %c0_i32, %c0_i32_0 : i32, i32
  }
  func.func @transform_12(%arg0: i32) -> (i32, i32) {
    %c0_i32 = arith.constant 0 : i32
    %c0_i32_0 = arith.constant 0 : i32
    %c0_i32_1 = arith.constant 0 : i32
    return %c0_i32, %c0_i32_0 : i32, i32
  }
  func.func @transform_13(%arg0: i32) -> (i32, i32, i32) {
    %c0_i32 = arith.constant 0 : i32
    %c0_i32_0 = arith.constant 0 : i32
    %c0_i32_1 = arith.constant 0 : i32
    %c0_i32_2 = arith.constant 0 : i32
    return %c0_i32, %c0_i32_0, %c0_i32_1 : i32, i32, i32
  }
  func.func @transform_14(%arg0: i32) -> (i32, i32) {
    %c0_i32 = arith.constant 0 : i32
    %c0_i32_0 = arith.constant 0 : i32
    %c0_i32_1 = arith.constant 0 : i32
    return %c0_i32, %c0_i32_0 : i32, i32
  }
  func.func @transform_15(%arg0: i32) -> (i32, i32) {
    %c0_i32 = arith.constant 0 : i32
    %c0_i32_0 = arith.constant 0 : i32
    %c0_i32_1 = arith.constant 0 : i32
    return %c0_i32, %c0_i32_0 : i32, i32
  }
  func.func @transform_16(%arg0: i32) -> (i32, i32, i32) {
    %c0_i32 = arith.constant 0 : i32
    %c0_i32_0 = arith.constant 0 : i32
    %c0_i32_1 = arith.constant 0 : i32
    %c0_i32_2 = arith.constant 0 : i32
    return %c0_i32, %c0_i32_0, %c0_i32_1 : i32, i32, i32
  }
  func.func @transform_17(%arg0: i32) -> (i32, i32) {
    %c0_i32 = arith.constant 0 : i32
    %c0_i32_0 = arith.constant 0 : i32
    %c0_i32_1 = arith.constant 0 : i32
    return %c0_i32, %c0_i32_0 : i32, i32
  }
  func.func @transform_18(%arg0: i32) -> (i32, i32) {
    %c0_i32 = arith.constant 0 : i32
    %c0_i32_0 = arith.constant 0 : i32
    %c0_i32_1 = arith.constant 0 : i32
    return %c0_i32, %c0_i32_0 : i32, i32
  }
  func.func @transform_19(%arg0: i32) -> (i32, i32, i32) {
    %c0_i32 = arith.constant 0 : i32
    %c0_i32_0 = arith.constant 0 : i32
    %c0_i32_1 = arith.constant 0 : i32
    return %arg0, %c0_i32, %c0_i32_0 : i32, i32, i32
  }
}

</mosaic_0001>

<bundles_post_ra>
// kernel: forward.1
= control target key start
LH: loop header
LB: loop body
LE: loop exit
PB: predicated region body
PF: predicated region fallthrough
CT: control target
= control target key end

     0   :  { %s6045_s0 = inlined_call_operand.vmem [shape: f32[2,4,64], index: 0, kind: input, shape index: {}]   ;;  %s6046_s1 = inlined_call_operand.hbm [shape: bf16[3,96,128], index: 1, kind: input, shape index: {}]   ;;  %s6047_s2 = inlined_call_operand.hbm [shape: f32[1,128], index: 2, kind: input, shape index: {}]   ;;  %s6048_s3 = inlined_call_operand.hbm [shape: f32[1,128], index: 3, kind: input, shape index: {}]   ;;  %s6049_s4 = inlined_call_operand.vmem [shape: bf16[3,192,128], index: 4, kind: input, shape index: {}]   ;;  %s6050_s5 = inlined_call_operand.hbm [shape: f32[1,128], index: 5, kind: input, shape index: {}]   ;;  %s6051_s6 = inlined_call_operand.hbm [shape: f32[1,128], index: 6, kind: input, shape index: {}]   ;;  %s6052_s7 = inlined_call_operand.vmem [shape: bf16[3,192,128], index: 7, kind: input, shape index: {}]   ;;  %s6053_s8 = inlined_call_operand.hbm [shape: f32[1,128], index: 8, kind: input, shape index: {}]   ;;  %s6054_s9 = inlined_call_operand.hbm [shape: f32[1,128], index: 9, kind: input, shape index: {}]   ;;  %s6055_s10 = inlined_call_operand.vmem [shape: bf16[2,160,256], index: 10, kind: input, shape index: {}]   ;;  %s6056_s11 = inlined_call_operand.vmem [shape: f32[1,256], index: 11, kind: input, shape index: {}]   ;;  %s6057_s12 = inlined_call_operand.vmem [shape: f32[1,256], index: 12, kind: input, shape index: {}]   ;;  %s6058_s13 = inlined_call_operand.vmem [shape: bf16[2,144,256], index: 13, kind: input, shape index: {}]   ;;  %s6059_s14 = inlined_call_operand.vmem [shape: f32[1,256], index: 14, kind: input, shape index: {}]   ;;  %s6060_s15 = inlined_call_operand.vmem [shape: f32[1,256], index: 15, kind: input, shape index: {}]   ;;  %s6061_s16 = inlined_call_operand.vmem [shape: bf16[5,160,48], index: 16, kind: input, shape index: {}]   ;;  %s6062_s17 = inlined_call_operand.vmem [shape: f32[1,48], index: 17, kind: input, shape index: {}]   ;;  %s6063_s18 = inlined_call_operand.vmem [shape: f32[1,48], index: 18, kind: input, shape index: {}]   ;;  %s6064_s19 = inlined_call_operand.vmem [shape: f32[2,16,48], index: 19, kind: output, shape index: {}]  }
   0x1   :  { %6072 = sst [smem:[#allocation28_spill]] %s6045_s0 }
   0x2   :  { %6073 = sst [smem:[#allocation29_spill]] %s6046_s1 }
   0x3   :  { %6074 = sst [smem:[#allocation30_spill]] %s6047_s2 }
   0x4   :  { %6075 = sst [smem:[#allocation31_spill]] %s6048_s3 }
   0x5   :  { %6076 = sst [smem:[#allocation32_spill]] %s6050_s5 }
   0x6   :  { %6077 = sst [smem:[#allocation33_spill]] %s6053_s8 }
   0x7   :  { %6078 = sst [smem:[#allocation34_spill]] %s6059_s14 }
   0x8   :  { %6079 = sst [smem:[#allocation35_spill]] %s6060_s15 }
   0x9   :  { %6080 = sst [smem:[#allocation36_spill]] %s6062_s17 }
   0xa   :  { %6081 = sst [smem:[#allocation37_spill]] %s6063_s18 }
   0xb   :  { %6082 = sst [smem:[#allocation38_spill]] %s6064_s19 }
   0xc   :  { %24 = vsyncpa [#allocation13], 0 }
   0xd   :  { %25 = vsyncpa [#allocation15], 0 }
   0xe   :  { %26 = vsyncpa [#allocation18], 0 }
   0xf   :  { %27 = vsyncpa [#allocation21], 0  ;;  %s4982_s0 = smov 0  }
  0x10 LB: > { %6083 = sst [smem:[#allocation27_spill]] %s4866_s0  ;;  %s4868_s30 = smov [#allocation14]   ;;  %s4866_s0 = sphi %s4982_s0, %s33_s0  }
  0x11   : > { %s494_s20 = sshll.u32 %s4868_s30, 4  ;;  %s4988_s21 = sadd.s32 4294967295, %s4866_s0   ;;  %s4993_s20 = int_to_ptr.vmem [resolvable:$true] %s494_s20 }
  0x12   : > { %p3714_p0 = scmp.ge.s32.totalorder %s4866_s0, 1  ;;  %p468_p1 = scmp.lt.s32.totalorder %s4866_s0, 3 }
  0x13   : > { %p6070_p2 = scmp.eq.s32.totalorder %s4988_s21, 0  ;;  %s4869_s22 = smov [#allocation17]  }
  0x14   : > { %p4995_p3 = pnand %p3714_p0, %p468_p1  ;;  %s519_s2 = sshll.u32 %s4869_s22, 4  ;;  %s5001_s2 = int_to_ptr.vmem [resolvable:$true] %s519_s2 }
  0x15   : > { %s4870_s23 = smov [#allocation20]   ;;  %s4871_s3 = smov [#allocation12]  }
  0x16   : > { %s6084_s1 = scalar_select %p4995_p3, 1, 0 }
  0x17   : > { %p4335_p4 = pneg %p4995_p3  ;;  %s544_s24 = sshll.u32 %s4870_s23, 4  ;;  %s5009_s24 = int_to_ptr.vmem [resolvable:$true] %s544_s24 }
  0x18   : > { %s480_s26 = sshll.u32 %s4871_s3, 4  ;;  %s6086_s29 = sld [smem:[#allocation30_spill]]  ;;  %s5011_s26 = int_to_ptr.vmem [resolvable:$true] %s480_s26 }
  0x19   : > { %p5005_p5 = pnand %p6070_p2, %p4335_p4 }
  0x1b   : > { %p5021_p7 = pneg %p5005_p5 }
  0x1e   : > { %s4648_s30 = scalar_lea.hbm %s6086_s29, 16 }
  0x1f   : > { %p4649_p6 = scmp.ne.s32.totalorder %s6086_s29, %s4648_s30  ;;  %p4655_p10 = scmp.lt.u32.totalorder %s4648_s30, %s6086_s29 }
  0x21   : > { %p4651_p8 = pnand %p5021_p7, %p4649_p6 }
  0x23   : > { %p4652_p9 = pneg %p4651_p8 }
  0x25   : > { %p4657_p11 = pnand %p4655_p10, %p4652_p9 }
  0x27   : > { %4660 = shalt.err (!%p4657_p11)
}
  0x28   : > { %s4661_s0 = scalar_lea.vmem %s4993_s20, 16  ;;  %s4668_s27 = scalar_lea.vmem %s4993_s20, 32 }
  0x29   : > { %p4662_p12 = scmp.ne.s32.totalorder %s4993_s20, %s4661_s0  ;;  %p4669_p1 = scmp.lt.s32.totalorder %s4993_s20, %s4993_s20 }
  0x2a   : > { %p4670_p4 = scmp.lt.s32.totalorder %s4668_s27, %s4661_s0 }
  0x2b   : > { %p4664_p13 = pnand %p4662_p12, %p5021_p7 }
  0x2c   : > { %p4671_p6 = por %p4670_p4, %p4669_p1 }
  0x2d   : > { %p4665_p0 = pneg %p4664_p13 }
  0x2f   : > { %p4672_p8 = pnand %p4671_p6, %p4665_p0 }
  0x31   : > { %4675 = shalt.err (!%p4672_p8)
}
  0x32   : > { %4341 = dma.hbm_to_vmem [thread:$0]  (!%p5005_p5), %s6086_s29, 16, %s4993_s20, [#allocation15]  }
  0x33   : > { %s6088_s5 = sld [smem:[#allocation32_spill]] }
  0x39   : > { %s4676_s3 = scalar_lea.hbm %s6088_s5, 16 }
  0x3a   : > { %p4677_p9 = scmp.ne.s32.totalorder %s6088_s5, %s4676_s3  ;;  %p4683_p12 = scmp.lt.u32.totalorder %s4676_s3, %s6088_s5 }
  0x3c   : > { %p4679_p10 = pnand %p4677_p9, %p5021_p7 }
  0x3e   : > { %p4680_p11 = pneg %p4679_p10 }
  0x40   : > { %p4685_p13 = pnand %p4683_p12, %p4680_p11 }
  0x42   : > { %4688 = shalt.err (!%p4685_p13)
}
  0x43   : > { %s4689_s20 = scalar_lea.vmem %s5001_s2, 16  ;;  %s4696_s17 = scalar_lea.vmem %s5001_s2, 32 }
  0x44   : > { %p4690_p0 = scmp.ne.s32.totalorder %s5001_s2, %s4689_s20  ;;  %p4697_p6 = scmp.lt.s32.totalorder %s5001_s2, %s5001_s2 }
  0x45   : > { %p4698_p8 = scmp.lt.s32.totalorder %s4696_s17, %s4689_s20 }
  0x46   : > { %p4692_p1 = pnand %p4690_p0, %p5021_p7 }
  0x47   : > { %p4699_p9 = por %p4698_p8, %p4697_p6 }
  0x48   : > { %p4693_p4 = pneg %p4692_p1 }
  0x4a   : > { %p4700_p10 = pnand %p4699_p9, %p4693_p4 }
  0x4c   : > { %4703 = shalt.err (!%p4700_p10)
}
  0x4d   : > { %4347 = dma.hbm_to_vmem [thread:$0]  (!%p5005_p5), %s6088_s5, 16, %s5001_s2, [#allocation18]  }
  0x4e   : > { %s6089_s8 = sld [smem:[#allocation33_spill]] }
  0x54   : > { %s4704_s22 = scalar_lea.hbm %s6089_s8, 16 }
  0x55   : > { %p4705_p11 = scmp.ne.s32.totalorder %s6089_s8, %s4704_s22  ;;  %p4711_p0 = scmp.lt.u32.totalorder %s4704_s22, %s6089_s8 }
  0x57   : > { %p4707_p12 = pnand %p4705_p11, %p5021_p7 }
  0x59   : > { %p4708_p13 = pneg %p4707_p12 }
  0x5b   : > { %p4713_p1 = pnand %p4711_p0, %p4708_p13 }
  0x5d   : > { %4716 = shalt.err (!%p4713_p1)
}
  0x5e   : > { %s4717_s2 = scalar_lea.vmem %s5009_s24, 16  ;;  %s4724_s17 = scalar_lea.vmem %s5009_s24, 32 }
  0x5f   : > { %p4718_p4 = scmp.ne.s32.totalorder %s5009_s24, %s4717_s2  ;;  %p4725_p9 = scmp.lt.s32.totalorder %s5009_s24, %s5009_s24 }
  0x60   : > { %p4726_p10 = scmp.lt.s32.totalorder %s4724_s17, %s4717_s2 }
  0x61   : > { %p4720_p6 = pnand %p4718_p4, %p5021_p7 }
  0x62   : > { %p4727_p11 = por %p4726_p10, %p4725_p9 }
  0x63   : > { %p4721_p8 = pneg %p4720_p6 }
  0x65   : > { %p4728_p12 = pnand %p4727_p11, %p4721_p8 }
  0x67   : > { %4731 = shalt.err (!%p4728_p12)
}
  0x68   : > { %4353 = dma.hbm_to_vmem [thread:$0]  (!%p5005_p5), %s6089_s8, 16, %s5009_s24, [#allocation21]  }
  0x69   : > { %s6090_s22 = sld [smem:[#allocation29_spill]] }
  0x6f   : > { %s4732_s3 = scalar_lea.hbm %s6090_s22, 2304 }
  0x70   : > { %p4733_p13 = scmp.ne.s32.totalorder %s6090_s22, %s4732_s3  ;;  %p4739_p4 = scmp.lt.u32.totalorder %s4732_s3, %s6090_s22 }
  0x72   : > { %p4735_p0 = pnand %p4733_p13, %p5021_p7 }
  0x74   : > { %p4736_p1 = pneg %p4735_p0 }
  0x76   : > { %p4741_p6 = pnand %p4739_p4, %p4736_p1 }
  0x78   : > { %4744 = shalt.err (!%p4741_p6)
}
  0x79   : > { %s4745_s24 = scalar_lea.vmem %s5011_s26, 2304  ;;  %p4753_p11 = scmp.lt.s32.totalorder %s5011_s26, %s5011_s26 }
  0x7a   : > { %p4746_p8 = scmp.ne.s32.totalorder %s5011_s26, %s4745_s24  ;;  %p4754_p12 = scmp.lt.s32.totalorder %s4745_s24, %s4745_s24 }
  0x7c   : > { %p4748_p9 = pnand %p4746_p8, %p5021_p7  ;;  %p4755_p13 = por %p4754_p12, %p4753_p11 }
  0x7e   : > { %p4749_p10 = pneg %p4748_p9 }
  0x80   : > { %p4756_p0 = pnand %p4755_p13, %p4749_p10 }
  0x82   : > { %4759 = shalt.err (!%p4756_p0)
}
  0x83   : > { %s4872_s17 = smov 64   ;;  %s4873_s18 = smov 4  }
  0x84   : > { %4338 = dma.hbm_to_vmem [thread:$0]  (!%p5005_p5), %s6090_s22, 2304, %s5011_s26, [#allocation13], %s4872_s17, %s4872_s17, %s4873_s18  }
  0x85   : > { %s4874_s30 = smov [#allocation16]   ;;  %s4875_s0 = smov [#allocation19]  }
  0x86   : > { %s505_s3 = sshll.u32 %s4874_s30, 4  ;;  %s530_s27 = sshll.u32 %s4875_s0, 4  ;;  %s506_s3 = int_to_ptr.vmem [resolvable:$true] %s505_s3  ;;  %s531_s27 = int_to_ptr.vmem [resolvable:$true] %s530_s27 }
  0x87   : > { %s6091_s24 = sld [smem:[#allocation31_spill]] }
  0x8d   : > { %s4760_s5 = scalar_lea.hbm %s6091_s24, 16 }
  0x8e   : > { %p4761_p1 = scmp.ne.s32.totalorder %s6091_s24, %s4760_s5  ;;  %p4767_p8 = scmp.lt.u32.totalorder %s4760_s5, %s6091_s24 }
  0x90   : > { %p4763_p4 = pnand %p4761_p1, %p5021_p7 }
  0x92   : > { %p4764_p6 = pneg %p4763_p4 }
  0x94   : > { %p4769_p9 = pnand %p4767_p8, %p4764_p6 }
  0x96   : > { %4772 = shalt.err (!%p4769_p9)
}
  0x97   : > { %s4773_s26 = scalar_lea.vmem %s506_s3, 16  ;;  %s4780_s17 = scalar_lea.vmem %s506_s3, 32 }
  0x98   : > { %p4774_p10 = scmp.ne.s32.totalorder %s506_s3, %s4773_s26  ;;  %p4781_p13 = scmp.lt.s32.totalorder %s506_s3, %s506_s3 }
  0x99   : > { %p4782_p0 = scmp.lt.s32.totalorder %s4780_s17, %s4773_s26 }
  0x9a   : > { %p4776_p11 = pnand %p4774_p10, %p5021_p7 }
  0x9b   : > { %p4783_p2 = por %p4782_p0, %p4781_p13 }
  0x9c   : > { %p4777_p12 = pneg %p4776_p11 }
  0x9e   : > { %p4784_p3 = pnand %p4783_p2, %p4777_p12 }
  0xa0   : > { %4787 = shalt.err (!%p4784_p3)
}
  0xa1   : > { %4344 = dma.hbm_to_vmem [thread:$0]  (!%p5005_p5), %s6091_s24, 16, %s506_s3, [#allocation15]  }
  0xa2   : > { %s4788_s15 = scalar_lea.hbm %s6051_s6, 16 }
  0xa3   : > { %p4789_p1 = scmp.ne.s32.totalorder %s6051_s6, %s4788_s15  ;;  %p4795_p3 = scmp.lt.u32.totalorder %s4788_s15, %s6051_s6 }
  0xa5   : > { %p4791_p4 = pnand %p4789_p1, %p5021_p7 }
  0xa7   : > { %p4792_p2 = pneg %p4791_p4 }
  0xa9   : > { %p4797_p6 = pnand %p4795_p3, %p4792_p2 }
  0xab   : > { %4800 = shalt.err (!%p4797_p6)
}
  0xac   : > { %s4801_s0 = scalar_lea.vmem %s531_s27, 16  ;;  %s4808_s3 = scalar_lea.vmem %s531_s27, 32 }
  0xad   : > { %p4802_p8 = scmp.ne.s32.totalorder %s531_s27, %s4801_s0  ;;  %p4809_p11 = scmp.lt.s32.totalorder %s531_s27, %s531_s27 }
  0xae   : > { %p4810_p12 = scmp.lt.s32.totalorder %s4808_s3, %s4801_s0 }
  0xaf   : > { %p4804_p9 = pnand %p4802_p8, %p5021_p7 }
  0xb0   : > { %p4811_p13 = por %p4810_p12, %p4809_p11 }
  0xb1   : > { %p4805_p10 = pneg %p4804_p9 }
  0xb3   : > { %p4812_p0 = pnand %p4811_p13, %p4805_p10 }
  0xb5   : > { %4815 = shalt.err (!%p4812_p0)
}
  0xb6   : > { %4350 = dma.hbm_to_vmem [thread:$0]  (!%p5005_p5), %s6051_s6, 16, %s531_s27, [#allocation18]  }
  0xb7   : > { %s4876_s26 = smov [#allocation22]   ;;  %s4816_s5 = scalar_lea.hbm %s6054_s9, 16 }
  0xb8   : > { %s555_s17 = sshll.u32 %s4876_s26, 4  ;;  %p4817_p1 = scmp.ne.s32.totalorder %s6054_s9, %s4816_s5  ;;  %s556_s17 = int_to_ptr.vmem [resolvable:$true] %s555_s17 }
  0xb9   : > { %p4823_p3 = scmp.lt.u32.totalorder %s4816_s5, %s6054_s9 }
  0xba   : > { %p4819_p4 = pnand %p4817_p1, %p5021_p7 }
  0xbc   : > { %p4820_p2 = pneg %p4819_p4 }
  0xbe   : > { %p4825_p6 = pnand %p4823_p3, %p4820_p2 }
  0xc0   : > { %4828 = shalt.err (!%p4825_p6)
}
  0xc1   : > { %s4829_s27 = scalar_lea.vmem %s556_s17, 16  ;;  %s4836_s28 = scalar_lea.vmem %s556_s17, 32 }
  0xc2   : > { %p4830_p8 = scmp.ne.s32.totalorder %s556_s17, %s4829_s27  ;;  %p4837_p11 = scmp.lt.s32.totalorder %s556_s17, %s556_s17 }
  0xc3   : > { %p4838_p12 = scmp.lt.s32.totalorder %s4836_s28, %s4829_s27 }
  0xc4   : > { %p4832_p9 = pnand %p4830_p8, %p5021_p7 }
  0xc5   : > { %p4839_p13 = por %p4838_p12, %p4837_p11 }
  0xc6   : > { %p4833_p10 = pneg %p4832_p9 }
  0xc8   : > { %p4840_p0 = pnand %p4839_p13, %p4833_p10 }
  0xca   : > { %4843 = shalt.err (!%p4840_p0)
}
  0xcb   : > { %4356 = dma.hbm_to_vmem [thread:$0]  (!%p5005_p5), %s6054_s9, 16, %s556_s17, [#allocation21]  }
  0xcc   : > { %p6092_p1 = scmp.ne.s32.totalorder %s6084_s1, 0 }
  0xcd   : > { %p6093_p4 = scmp.eq.s32.totalorder (!%p6092_p1), %s4988_s21, 0 }
  0xce   : > { %602 = sbr.rel (%p6092_p1) target bundleno = 2589 (0xa1d), region = 96 }
  0xd5   : > { %4849 = dma.done.wait (%p6093_p4), [#allocation13], 2304   ;;  %p6094_p7 = pmov %p6093_p4 }
  0xd6   : > { %p6095_p2 = pmov %p6093_p4 }
  0xd7   : > { %4851 = vsyncadd (%p6094_p7), [#allocation13], 4294964992 }
  0xd8   : > { %4853 = dma.done.wait (%p6095_p2), [#allocation15], 32   ;;  %p6096_p3 = pmov %p6095_p2 }
  0xd9   : > { %p6097_p6 = pmov %p6095_p2 }
  0xda   : > { %4855 = vsyncadd (%p6096_p3), [#allocation15], 4294967264 }
  0xdb   : > { %4857 = dma.done.wait (%p6097_p6), [#allocation18], 32   ;;  %p6098_p5 = pmov %p6095_p2 }
  0xdc   : > { %p6099_p8 = pmov %p6095_p2 }
  0xdd   : > { %4859 = vsyncadd (%p6098_p5), [#allocation18], 4294967264 }
  0xde   : > { %4861 = dma.done.wait (%p6099_p8), [#allocation21], 32   ;;  %p6100_p9 = pmov %p6095_p2 }
  0xdf   : > { %p681_p10 = scmp.lt.s32.totalorder %s4988_s21, 1  ;;  %vm692_vm0 = vcmask 783360   ;;  %v4877_v0 = vmov 0.0   ;;  %vm4878_vm1 = vmmov 0   ;;  %s6101_s3 = sld [smem:[#allocation28_spill]]  ;;  %v4393_v2 = vld [vmem:[#allocation12 + $0x30] sm:$0xff]  }
  0xe0   : > { %4863 = vsyncadd (%p6100_p9), [#allocation21], 4294967264  ;;  %4214 = vmatprep.subr.bf16.mxu0 %v4877_v0  ;;  %1001 = vst [vmem:[#allocation3] sm:$0x3f] %v4877_v0  ;;  %4226 = vmatprep.mubr.msk.bf16.mxu0 %vm4878_vm1, %v4877_v0  ;;  %s4879_s2 = smov 16   ;;  %v4394_v3 = vld [vmem:[#allocation12 + $0x38] sm:$0xff]  }
  0xe1   : > { %1484 = vst [vmem:[#allocation4] sm:$0x3f] %v4877_v0  ;;  %1964 = vst [vmem:[#allocation5] sm:$0x1f] %v4877_v0  ;;  %s6109_s21 = smov (!%p681_p10, %s4988_s21), 1  ;;  %4215 = vmatpush3.bf16.msra.mxu0 %v4393_v2  ;;  %v4395_v4 = vld [vmem:[#allocation12 + $0x40] sm:$0xff]  }
  0xe2   : > { %2378 = vst [vmem:[#allocation8 + $0x10] sm:$0x1] %v4877_v0  ;;  %2780 = vst [vmem:[#allocation11] sm:$0xff] %v4877_v0  ;;  %s3731_s1 = sshll.u32 %s6109_s21, 2  ;;  %4216 = vmatprep.subr.bf16.mxu0 %v4877_v0  ;;  %v4396_v5 = vld [vmem:[#allocation12 + $0x48] sm:$0xff]   ;;  %v4397_v6 = vld [vmem:[#allocation12 + $0x50] sm:$0xff]  }
  0xe3   : > { %2782 = vst [vmem:[#allocation11 + $0x10] sm:$0xff] %v4877_v0  ;;  %2784 = vst [vmem:[#allocation11 + $0x20] sm:$0xf] %v4877_v0  ;;  %v4398_v7 = vld [vmem:[#allocation12 + $0x58] sm:$0xff]   ;;  %vm698_vm2 = vcmask 650368   ;;  %vm765_vm3 = vcmask 785408  }
  0xe4   : > { %693 = vst.msk [vmem:[#allocation2] sm:$0x3f] %vm692_vm0, %v4877_v0  ;;  %v4399_v10 = vld [vmem:[#allocation12] sm:$0xff]   ;;  %v4400_v12 = vld [vmem:[#allocation12 + $0x8] sm:$0xff]   ;;  %v4401_v13 = vld [vmem:[#allocation12 + $0x10] sm:$0xff]   ;;  %vm1002_vm4 = vcmask 521216  }
  0xe5   : > { %s684_s20 = scalar_lea.vmem %s6101_s3, %s3731_s1  ;;  %4217 = vmatpush3.bf16.msra.mxu0 %v4394_v3  ;;  %v4402_v14 = vld [vmem:[#allocation12 + $0x18] sm:$0xff]   ;;  %v4403_v15 = vld [vmem:[#allocation12 + $0x20] sm:$0xff]   ;;  %v4404_v16 = vld [vmem:[#allocation12 + $0x28] sm:$0xff]   ;;  %v4880_v29 = vmov 0   ;;  %1003 = vst.msk [vmem:[#allocation3 + $0x8] sm:$0x3f] %vm1002_vm4, %v4877_v0 }
  0xe6   : > { %v691_v1 = vld [vmem:[%s684_s20] sm:$0xf]  ;;  %4218 = vmatprep.subr.bf16.mxu0 %v4877_v0  ;;  %v4405_v18 = vld [vmem:[#allocation12 + $0x60] sm:$0xff]   ;;  %v4407_v21 = vld [vmem:[#allocation12 + $0x70] sm:$0xff]   ;;  %1276 = vmatprep.subr.bf16.mxu1 %v4880_v29  ;;  %1485 = vst.msk [vmem:[#allocation4 + $0x8] sm:$0x3f] %vm1002_vm4, %v4877_v0 }
  0xe7   : > { %695 = vrot.lane.b32.xlu0 %v691_v1, %s4879_s2  ;;  %v4406_v20 = vld [vmem:[#allocation12 + $0x68] sm:$0xff]   ;;  %v4408_v22 = vld [vmem:[#allocation12 + $0x78] sm:$0xff]   ;;  %v4409_v23 = vld [vmem:[#allocation12 + $0x80] sm:$0xff]   ;;  %s4881_s0 = smov 32   ;;  %vm1009_vm5 = vcmask 1044737   ;;  %vm1011_vm6 = vcmask 258049  }
  0xe8   : > { %v4410_v24 = vld [vmem:[#allocation12 + $0x88] sm:$0xff]   ;;  %v4412_v30 = vld [vmem:[%s6049_s4 + $0x8] sm:$0xff]   ;;  %v4414_v32 = vld [vmem:[%s6049_s4 + $0x10] sm:$0xff]   ;;  %vm1157_vm7 = vcmask 523264   ;;  %vm1965_vm8 = vcmask 258048   ;;  %vm2132_vm9 = vcmask 261120  }
  0xe9   : > { %4219 = vmatpush3.bf16.msra.mxu0 %v4395_v4  ;;  %v4411_v27 = vld [vmem:[%s6049_s4] sm:$0xff]   ;;  %v4415_v31 = vld [vmem:[%s6049_s4 + $0x68] sm:$0xff]   ;;  %v4417_v33 = vld [vmem:[%s6049_s4 + $0x70] sm:$0xff]   ;;  %vm2376_vm10 = vcmask 130048   ;;  %vm2379_vm11 = vcmask 122880   ;;  %s6102_s27 = sld [smem:[#allocation34_spill]] }
  0xea   : > { %4220 = vmatprep.subr.bf16.mxu0 %v4877_v0  ;;  %v4413_v28 = vld [vmem:[%s6049_s4 + $0x60] sm:$0xff]   ;;  %1277 = vmatpush1.bf16.msra.mxu1 %v4411_v27  ;;  %v4416_v34 = vld [vmem:[%s6049_s4 + $0x18] sm:$0xff]   ;;  %v4420_v38 = vld [vmem:[%s6049_s4 + $0x28] sm:$0xff]   ;;  %s6103_s1 = sld [smem:[#allocation35_spill]]  ;;  %vm2785_vm12 = vcmask 257024   ;;  %vm2789_vm13 = vcmask 1041408  }
  0xeb   : > { %1278 = vmatprep.subr.bf16.mxu1 %v4880_v29  ;;  %v4419_v35 = vld [vmem:[%s6049_s4 + $0x78] sm:$0xff]   ;;  %v4418_v36 = vld [vmem:[%s6049_s4 + $0x20] sm:$0xff]   ;;  %v4423_v39 = vld [vmem:[%s6049_s4 + $0x88] sm:$0xff]   ;;  %vm2802_vm14 = vcmask 1047682   ;;  %vm2804_vm15 = vcmask 130050   ;;  %vm2806_vm0 = vcmask 1047680  }
  0xec   : > { %v4421_v37 = vld [vmem:[%s6049_s4 + $0x80] sm:$0xff]   ;;  %v4422_v40 = vld [vmem:[%s6049_s4 + $0x30] sm:$0xff]   ;;  %v4424_v42 = vld [vmem:[%s6049_s4 + $0x38] sm:$0xff]   ;;  %vm3135_vm4 = vcmask 1046528   ;;  %s6104_s28 = sld [smem:[#allocation36_spill]]  ;;  %s4192_s30 = sshll.u32 %s6109_s21, 4 }
  0xed   : > { %4221 = vmatpush3.bf16.msra.mxu0 %v4396_v5  ;;  %v4425_v41 = vld [vmem:[%s6049_s4 + $0x90] sm:$0xff]   ;;  %v4427_v43 = vld [vmem:[%s6049_s4 + $0x98] sm:$0xff]   ;;  %v4426_v44 = vld [vmem:[%s6049_s4 + $0x40] sm:$0xff]   ;;  %s6105_s23 = sld [smem:[#allocation37_spill]] }
  0xee   : > { %4222 = vmatprep.subr.bf16.mxu0 %v4877_v0  ;;  %1279 = vmatpush1.bf16.msra.mxu1 %v4412_v30  ;;  %v4428_v45 = vld [vmem:[%s6049_s4 + $0x48] sm:$0xff]   ;;  %v4429_v47 = vld [vmem:[%s6049_s4 + $0xa0] sm:$0xff]   ;;  %v4430_v48 = vld [vmem:[%s6049_s4 + $0x50] sm:$0xff]  }
  0xef   : > { %1280 = vmatprep.subr.bf16.mxu1 %v4880_v29  ;;  %v3755_v46 = vld [vmem:[#allocation14] ss:$0 sm:$0xff]  ;;  %v3756_v50 = vld [vmem:[#allocation16] ss:$0 sm:$0xff]  ;;  %v4432_v52 = vld [vmem:[%s6049_s4 + $0x58] sm:$0xff]  }
  0xf0   : > { %v4431_v51 = vld [vmem:[%s6049_s4 + $0xa8] sm:$0xff]   ;;  %v4433_v58 = vld [vmem:[%s6049_s4 + $0xb0] sm:$0xff]   ;;  %v4435_v62 = vld [vmem:[%s6049_s4 + $0xb8] sm:$0xff]  }
  0xf1   : > { %4223 = vmatpush3.bf16.msra.mxu0 %v4397_v6  ;;  %v4434_v5 = vld [vmem:[%s6049_s4 + $0xc0] sm:$0xff]   ;;  %v4445_v30 = vld [vmem:[%s6049_s4 + $0x110] sm:$0xff]  }
  0xf2   : > { %4224 = vmatprep.subr.bf16.mxu0 %v4877_v0  ;;  %1281 = vmatpush1.bf16.msra.mxu1 %v4414_v32  ;;  %v4443_v27 = vld [vmem:[%s6049_s4 + $0x100] sm:$0xff]   ;;  %v4446_v32 = vld [vmem:[%s6049_s4 + $0x118] sm:$0xff]  }
  0xf3   : > { %1282 = vmatprep.subr.bf16.mxu1 %v4880_v29 }
  0xf5   : > { %4225 = vmatpush3.bf16.msra.mxu0 %v4398_v7 }
  0xf6   : > { %4230 = vmatprep.subr.bf16.mxu0 %v4877_v0  ;;  %1283 = vmatpush1.bf16.msra.mxu1 %v4416_v34 }
  0xf7   : > { %1284 = vmatprep.subr.bf16.mxu1 %v4880_v29 }
  0xfa   : > { %1285 = vmatpush1.bf16.msra.mxu1 %v4418_v36  ;;  %v4448_v36 = vld [vmem:[%s6052_s7 + $0x68] sm:$0xff]  }
  0xfb   : > { %1286 = vmatprep.subr.bf16.mxu1 %v4880_v29 }
  0xfe   : > { %1287 = vmatpush1.bf16.msra.mxu1 %v4420_v38  ;;  %v4450_v38 = vld [vmem:[%s6052_s7 + $0x78] sm:$0xff]  }
  0xff   : > { %1288 = vmatprep.subr.bf16.mxu1 %v4880_v29 }
 0x102   : > { %1289 = vmatpush1.bf16.msra.mxu1 %v4422_v40  ;;  %v4452_v40 = vld [vmem:[%s6052_s7 + $0x88] sm:$0xff]  }
 0x103   : > { %1290 = vmatprep.subr.bf16.mxu1 %v4880_v29 }
 0x106   : > { %1291 = vmatpush1.bf16.msra.mxu1 %v4424_v42  ;;  %v4454_v42 = vld [vmem:[%s6052_s7 + $0x98] sm:$0xff]  }
 0x107   : > { %1292 = vmatprep.subr.bf16.mxu1 %v4880_v29 }
 0x10a   : > { %1293 = vmatpush1.bf16.msra.mxu1 %v4426_v44 }
 0x10b   : > { %1294 = vmatprep.subr.bf16.mxu1 %v4880_v29 }
 0x10e   : > { %1295 = vmatpush1.bf16.msra.mxu1 %v4428_v45 }
 0x10f   : > { %1296 = vmatprep.subr.bf16.mxu1 %v4880_v29 }
 0x112   : > { %1297 = vmatpush1.bf16.msra.mxu1 %v4430_v48  ;;  %v3844_v48 = vld [vmem:[#allocation17] ss:$0 sm:$0xff] }
 0x113   : > { %1298 = vmatprep.subr.bf16.mxu1 %v4880_v29 }
 0x116   : > { %1299 = vmatpush1.bf16.msra.mxu1 %v4432_v52 }
 0x117   : > { %1425 = vmatprep.subr.bf16.mxu1 %v4880_v29 }
 0x159   : > { %v696_v8 = vpop.permute.xlu0 %695 }
 0x15a   : > { %699 = vst.msk [vmem:[#allocation2 + $0x1] sm:$0xf] %vm698_vm2, %v696_v8  ;;  %vm2811_vm2 = vcmask 123904  }
 0x161   : > { %v714_v9 = vld [vmem:[#allocation2 + $0x1] sm:$0xf] }
 0x162   : > { %v715_v11 = vpack.c.bf16 %v714_v9, %v714_v9  ;;  %v700_v17 = vld [vmem:[#allocation2] sm:$0xf] }
 0x163   : > { %v701_v19 = vpack.c.bf16 %v700_v17, %v700_v17  ;;  %v888_v25 = vld [vmem:[#allocation2 + $0x2] sm:$0xf] }
 0x164   : > { %4227 = vmatmul.mubr.msk.bf16.vlgmr.msra.gmra.mrb[0].mxu0 %vm765_vm3, %v715_v11  ;;  %v889_v26 = vpack.c.bf16 %v888_v25, %v888_v25  ;;  %v4441_v25 = vld [vmem:[%s6049_s4 + $0xf0] sm:$0xff]  }
 0x165   : > { %4231 = vmatpush3.bf16.msra.mxu0 %v4399_v10  ;;  %4242 = vmatprep.mubr.msk.bf16.mxu0 %vm4878_vm1, %v4877_v0 }
 0x166   : > { %4232 = vmatprep.subr.bf16.mxu0 %v4877_v0 }
 0x169   : > { %4233 = vmatpush3.bf16.msra.mxu0 %v4400_v12 }
 0x16a   : > { %4234 = vmatprep.subr.bf16.mxu0 %v4877_v0 }
 0x16d   : > { %4235 = vmatpush3.bf16.msra.mxu0 %v4401_v13 }
 0x16e   : > { %4236 = vmatprep.subr.bf16.mxu0 %v4877_v0 }
 0x171   : > { %4237 = vmatpush3.bf16.msra.mxu0 %v4402_v14  ;;  %v4436_v14 = vld [vmem:[%s6049_s4 + $0xc8] sm:$0xff]  }
 0x172   : > { %4238 = vmatprep.subr.bf16.mxu0 %v4877_v0 }
 0x175   : > { %4239 = vmatpush3.bf16.msra.mxu0 %v4403_v15 }
 0x176   : > { %4240 = vmatprep.subr.bf16.mxu0 %v4877_v0 }
 0x179   : > { %4241 = vmatpush3.bf16.msra.mxu0 %v4404_v16 }
 0x17a   : > { %4246 = vmatprep.subr.bf16.mxu0 %v4877_v0 }
 0x17c   : > { %4243 = vmatmul.mubr.msk.bf16.vlgmr.msra.gmra.mrb[0].mxu0 %vm765_vm3, %v701_v19 }
 0x17d   : > { %4247 = vmatpush3.bf16.msra.mxu0 %v4405_v18  ;;  %4258 = vmatprep.mubr.msk.bf16.mxu0 %vm4878_vm1, %v4877_v0  ;;  %vm2809_vm1 = vcmask 1041536  }
 0x17e   : > { %4248 = vmatprep.subr.bf16.mxu0 %v4877_v0 }
 0x181   : > { %4249 = vmatpush3.bf16.msra.mxu0 %v4406_v20 }
 0x182   : > { %4250 = vmatprep.subr.bf16.mxu0 %v4877_v0 }
 0x185   : > { %4251 = vmatpush3.bf16.msra.mxu0 %v4407_v21  ;;  %v4437_v21 = vld [vmem:[%s6049_s4 + $0xd0] sm:$0xff]  }
 0x186   : > { %4252 = vmatprep.subr.bf16.mxu0 %v4877_v0 }
 0x189   : > { %4253 = vmatpush3.bf16.msra.mxu0 %v4408_v22  ;;  %v4438_v22 = vld [vmem:[%s6049_s4 + $0xd8] sm:$0xff]  }
 0x18a   : > { %4254 = vmatprep.subr.bf16.mxu0 %v4877_v0 }
 0x18d   : > { %4255 = vmatpush3.bf16.msra.mxu0 %v4409_v23  ;;  %v4439_v23 = vld [vmem:[%s6049_s4 + $0xe0] sm:$0xff]  }
 0x18e   : > { %4256 = vmatprep.subr.bf16.mxu0 %v4877_v0 }
 0x191   : > { %4257 = vmatpush3.bf16.msra.mxu0 %v4410_v24  ;;  %v4440_v24 = vld [vmem:[%s6049_s4 + $0xe8] sm:$0xff]  }
 0x192   : > { %1161 = vmatprep.subr.bf16.mxu0 %v4880_v29 }
 0x194   : > { %4259 = vmatmul.mubr.msk.bf16.vlgmr.msra.gmra.mrb[0].mxu0 %vm765_vm3, %v889_v26  ;;  %v4442_v26 = vld [vmem:[%s6049_s4 + $0xf8] sm:$0xff]   ;;  %vm2868_vm3 = vsmask.f32 7424 }
 0x195   : > { %1162 = vmatpush1.bf16.msra.mxu0 %v4413_v28  ;;  %v4444_v28 = vld [vmem:[%s6049_s4 + $0x108] sm:$0xff]  }
 0x196   : > { %1163 = vmatprep.subr.bf16.mxu0 %v4880_v29 }
 0x199   : > { %1164 = vmatpush1.bf16.msra.mxu0 %v4415_v31 }
 0x19a   : > { %1165 = vmatprep.subr.bf16.mxu0 %v4880_v29 }
 0x19d   : > { %1166 = vmatpush1.bf16.msra.mxu0 %v4417_v33 }
 0x19e   : > { %1167 = vmatprep.subr.bf16.mxu0 %v4880_v29 }
 0x1a1   : > { %1168 = vmatpush1.bf16.msra.mxu0 %v4419_v35  ;;  %v4447_v35 = vld [vmem:[%s6052_s7 + $0x60] sm:$0xff]  }
 0x1a2   : > { %1169 = vmatprep.subr.bf16.mxu0 %v4880_v29 }
 0x1a5   : > { %1170 = vmatpush1.bf16.msra.mxu0 %v4421_v37  ;;  %v4449_v37 = vld [vmem:[%s6052_s7 + $0x70] sm:$0xff]  }
 0x1a6   : > { %1171 = vmatprep.subr.bf16.mxu0 %v4880_v29 }
 0x1a9   : > { %1172 = vmatpush1.bf16.msra.mxu0 %v4423_v39  ;;  %v4451_v39 = vld [vmem:[%s6052_s7 + $0x80] sm:$0xff]  }
 0x1aa   : > { %1173 = vmatprep.subr.bf16.mxu0 %v4880_v29 }
 0x1ad   : > { %1174 = vmatpush1.bf16.msra.mxu0 %v4425_v41  ;;  %v4453_v41 = vld [vmem:[%s6052_s7 + $0x90] sm:$0xff]  }
 0x1ae   : > { %1175 = vmatprep.subr.bf16.mxu0 %v4880_v29 }
 0x1b1   : > { %1176 = vmatpush1.bf16.msra.mxu0 %v4427_v43 }
 0x1b2   : > { %1177 = vmatprep.subr.bf16.mxu0 %v4880_v29 }
 0x1b5   : > { %1178 = vmatpush1.bf16.msra.mxu0 %v4429_v47 }
 0x1b6   : > { %1179 = vmatprep.subr.bf16.mxu0 %v4880_v29 }
 0x1b9   : > { %1180 = vmatpush1.bf16.msra.mxu0 %v4431_v51 }
 0x1ba   : > { %1181 = vmatprep.subr.bf16.mxu0 %v4880_v29 }
 0x1bd   : > { %1182 = vmatpush1.bf16.msra.mxu0 %v4433_v58  ;;  %v4457_v58 = vld [vmem:[%s6052_s7 + $0xb0] sm:$0xff]  }
 0x1be   : > { %1183 = vmatprep.subr.bf16.mxu0 %v4880_v29 }
 0x1c1   : > { %1184 = vmatpush1.bf16.msra.mxu0 %v4435_v62  ;;  %v4458_v62 = vld [vmem:[%s6052_s7 + $0xb8] sm:$0xff]  }
 0x1c2   : > { %1640 = vmatprep.subr.bf16.mxu0 %v4880_v29 }
 0x267   : > { %v976_v49 = vpop.f32.mrb[0].mxu0 }
 0x268   : > { %v990_v53 = vmul.f32 %v3755_v46, %v976_v49  ;;  %v4260_v54 = vpop.f32.mrb[1].mxu0  ;;  %v4455_v49 = vld [vmem:[%s6052_s7 + $0xa0] sm:$0xff]  }
 0x269   : > { %v979_v55 = vpop.f32.mrb[2].mxu0  ;;  %v4456_v54 = vld [vmem:[%s6052_s7 + $0xa8] sm:$0xff]  }
 0x26a   : > { %v998_v56 = vadd.f32 %v3756_v50, %v990_v53  ;;  %v4261_v57 = vpop.f32.mrb[3].mxu0  ;;  %v3845_v53 = vld [vmem:[#allocation19] ss:$0 sm:$0xff] }
 0x26c   : > { %v999_v59 = vmul.f32 0.2, %v998_v56 }
 0x26e   : > { %v5325_v60 = vmax.f32 %v998_v56, %v999_v59 }
 0x270   : > { %v1005_v61 = vrot.slane %v5325_v60, 7 }
 0x272   : > { %1006 = vrot.lane.b32.xlu0 %v1005_v61, %s4881_s0 }
 0x2e4   : > { %v1007_v63 = vpop.permute.xlu0 %1006 }
 0x2e5   : > { %1010 = vst.msk [vmem:[#allocation3] sm:$0x1e] %vm1009_vm5, %v1007_v63 }
 0x2e6   : > { %1012 = vst.msk [vmem:[#allocation3 + $0x8] sm:$0x1e] %vm1011_vm6, %v1007_v63 }
 0x2ec   : > { %v1013_v1 = vld [vmem:[#allocation3] sm:$0xf] }
 0x2ed   : > { %v1014_v0 = vld [vmem:[#allocation3 + $0x8] sm:$0xf]  ;;  %v1015_v4 = vpack.c.bf16 %v1013_v1, %v1013_v1  ;;  %v1041_v8 = vld [vmem:[#allocation3] sm:$0x1e] }
 0x2ee   : > { %v1317_v2 = vld [vmem:[#allocation3 + $0x8] sm:$0x3c]  ;;  %v1016_v3 = vpack.c.bf16 %v1014_v0, %v1014_v0  ;;  %v1043_v10 = vpack.c.bf16 %v1041_v8, %v1041_v8  ;;  %v1316_v31 = vld [vmem:[#allocation3] sm:$0x3c] }
 0x2ef   : > { %v1319_v6 = vpack.c.bf16 %v1317_v2, %v1317_v2  ;;  %v1042_v7 = vld [vmem:[#allocation3 + $0x8] sm:$0x1e]  ;;  %v1318_v33 = vpack.c.bf16 %v1316_v31, %v1316_v31  ;;  %v4483_v0 = vld [vmem:[%s6055_s10 + $0xa0] ss:$8 sps:$4 sm:$0xff]   ;;  %v4485_v1 = vld [vmem:[%s6055_s10 + $0xa4] ss:$8 sps:$4 sm:$0xff]  }
 0x2f0   : > { %v1044_v9 = vpack.c.bf16 %v1042_v7, %v1042_v7  ;;  %3806 = vmatprep.mubr.msk.bf16.mxu1 %vm1157_vm7, %v1016_v3  ;;  %v1073_v13 = vshll.u32 %v1043_v10, 16  ;;  %v1071_v17 = vshrl.u32 %v1043_v10, 16  ;;  %v4488_v2 = vld [vmem:[%s6055_s10 + $0xb4] ss:$8 sps:$4 sm:$0xff]   ;;  %v4486_v3 = vld [vmem:[%s6055_s10 + $0xb0] ss:$8 sps:$4 sm:$0xff]  }
 0x2f1   : > { %v1348_v11 = vrot.slane %v1319_v6, 1  ;;  %1309 = vmatmul.mubr.bf16.vlgmr.msra.gmra.mrb[0].mxu1 %v1015_v4  ;;  %v1347_v34 = vrot.slane %v1318_v33, 1  ;;  %v4491_v4 = vld [vmem:[%s6055_s10 + $0xc4] ss:$8 sps:$4 sm:$0xff]   ;;  %v4494_v6 = vld [vmem:[%s6055_s10 + $0xd4] ss:$8 sps:$4 sm:$0xff]  }
 0x2f2   : > { %v1080_v12 = vshll.u32 %v1044_v9, 16  ;;  %1426 = vmatpush1.bf16.msra.mxu1 %v4434_v5  ;;  %v1078_v15 = vshrl.u32 %v1044_v9, 16  ;;  %v1075_v18 = vrot.slane %v1073_v13, 1  ;;  %v4489_v5 = vld [vmem:[%s6055_s10 + $0xc0] ss:$8 sps:$4 sm:$0xff]   ;;  %v4466_v31 = vld [vmem:[%s6052_s7 + $0x38] sm:$0xff]  }
 0x2f3   : > { %3843 = vmatprep.mubr.msk.bf16.mxu1 %vm1157_vm7, %v1348_v11  ;;  %1427 = vmatprep.subr.bf16.mxu1 %v4880_v29  ;;  %v4492_v7 = vld [vmem:[%s6055_s10 + $0xd0] ss:$8 sps:$4 sm:$0xff]   ;;  %v4468_v33 = vld [vmem:[%s6052_s7 + $0x48] sm:$0xff]  }
 0x2f4   : > { %v1082_v16 = vrot.slane %v1080_v12, 1  ;;  %v1076_v20 = vor.u32 %v1075_v18, %v1071_v17 }
 0x2f6   : > { %v1083_v19 = vor.u32 %v1082_v16, %v1078_v15  ;;  %1428 = vmatpush1.bf16.msra.mxu1 %v4436_v14 }
 0x2f7   : > { %1429 = vmatprep.subr.bf16.mxu1 %v4880_v29 }
 0x2f8   : > { %3793 = vmatprep.mubr.msk.bf16.mxu0 %vm1157_vm7, %v1083_v19 }
 0x2f9   : > { %1194 = vmatmul.mubr.bf16.vlgmr.msra.gmra.mrb[4].mxu0 %v1076_v20 }
 0x2fa   : > { %1430 = vmatpush1.bf16.msra.mxu1 %v4437_v21  ;;  %1641 = vmatpush1.bf16.msra.mxu0 %v4447_v35 }
 0x2fb   : > { %1431 = vmatprep.subr.bf16.mxu1 %v4880_v29  ;;  %1642 = vmatprep.subr.bf16.mxu0 %v4880_v29 }
 0x2fe   : > { %1432 = vmatpush1.bf16.msra.mxu1 %v4438_v22  ;;  %1643 = vmatpush1.bf16.msra.mxu0 %v4448_v36  ;;  %v4459_v22 = vld [vmem:[%s6052_s7] sm:$0xff]   ;;  %v4470_v36 = vld [vmem:[%s6052_s7 + $0x58] sm:$0xff]  }
 0x2ff   : > { %1433 = vmatprep.subr.bf16.mxu1 %v4880_v29  ;;  %1644 = vmatprep.subr.bf16.mxu0 %v4880_v29 }
 0x302   : > { %1434 = vmatpush1.bf16.msra.mxu1 %v4439_v23  ;;  %1645 = vmatpush1.bf16.msra.mxu0 %v4449_v37 }
 0x303   : > { %1435 = vmatprep.subr.bf16.mxu1 %v4880_v29  ;;  %1646 = vmatprep.subr.bf16.mxu0 %v4880_v29 }
 0x306   : > { %1436 = vmatpush1.bf16.msra.mxu1 %v4440_v24  ;;  %1647 = vmatpush1.bf16.msra.mxu0 %v4450_v38  ;;  %v4460_v24 = vld [vmem:[%s6052_s7 + $0x8] sm:$0xff]  }
 0x307   : > { %1437 = vmatprep.subr.bf16.mxu1 %v4880_v29  ;;  %1648 = vmatprep.subr.bf16.mxu0 %v4880_v29 }
 0x30a   : > { %1438 = vmatpush1.bf16.msra.mxu1 %v4441_v25  ;;  %1649 = vmatpush1.bf16.msra.mxu0 %v4451_v39  ;;  %v4461_v25 = vld [vmem:[%s6052_s7 + $0x10] sm:$0xff]   ;;  %v4471_v39 = vld [vmem:[%s6052_s7 + $0xc0] sm:$0xff]  }
 0x30b   : > { %1439 = vmatprep.subr.bf16.mxu1 %v4880_v29  ;;  %1650 = vmatprep.subr.bf16.mxu0 %v4880_v29 }
 0x30e   : > { %1440 = vmatpush1.bf16.msra.mxu1 %v4442_v26  ;;  %1651 = vmatpush1.bf16.msra.mxu0 %v4452_v40  ;;  %v4462_v26 = vld [vmem:[%s6052_s7 + $0x18] sm:$0xff]  }
 0x30f   : > { %1441 = vmatprep.subr.bf16.mxu1 %v4880_v29  ;;  %1652 = vmatprep.subr.bf16.mxu0 %v4880_v29 }
 0x312   : > { %1442 = vmatpush1.bf16.msra.mxu1 %v4443_v27  ;;  %1653 = vmatpush1.bf16.msra.mxu0 %v4453_v41  ;;  %v4463_v27 = vld [vmem:[%s6052_s7 + $0x20] sm:$0xff]  }
 0x313   : > { %1443 = vmatprep.subr.bf16.mxu1 %v4880_v29  ;;  %1654 = vmatprep.subr.bf16.mxu0 %v4880_v29 }
 0x316   : > { %1444 = vmatpush1.bf16.msra.mxu1 %v4444_v28  ;;  %1655 = vmatpush1.bf16.msra.mxu0 %v4454_v42  ;;  %v4464_v28 = vld [vmem:[%s6052_s7 + $0x28] sm:$0xff]  }
 0x317   : > { %1445 = vmatprep.subr.bf16.mxu1 %v4880_v29  ;;  %1656 = vmatprep.subr.bf16.mxu0 %v4880_v29  ;;  %v4472_v42 = vld [vmem:[%s6052_s7 + $0xc8] sm:$0xff]  }
 0x31a   : > { %1446 = vmatpush1.bf16.msra.mxu1 %v4445_v30  ;;  %1657 = vmatpush1.bf16.msra.mxu0 %v4455_v49  ;;  %v4465_v30 = vld [vmem:[%s6052_s7 + $0x30] sm:$0xff]   ;;  %v4479_v49 = vld [vmem:[%s6052_s7 + $0x100] sm:$0xff]  }
 0x31b   : > { %1447 = vmatprep.subr.bf16.mxu1 %v4880_v29  ;;  %1658 = vmatprep.subr.bf16.mxu0 %v4880_v29 }
 0x31e   : > { %1448 = vmatpush1.bf16.msra.mxu1 %v4446_v32  ;;  %1659 = vmatpush1.bf16.msra.mxu0 %v4456_v54  ;;  %v4467_v32 = vld [vmem:[%s6052_s7 + $0x40] sm:$0xff]  }
 0x31f   : > { %1660 = vmatprep.subr.bf16.mxu0 %v4880_v29  ;;  %2136 = vmatprep.subr.bf16.mxu1 %v4485_v1  ;;  %v4506_v1 = vld [vmem:[%s6055_s10 + $0x114] ss:$8 sps:$4 sm:$0xff]  }
 0x321   : > { %1458 = vmatmul.mubr.bf16.vlgmr.msra.gmra.mrb[0].mxu1 %v1347_v34  ;;  %v4469_v34 = vld [vmem:[%s6052_s7 + $0x50] sm:$0xff]  }
 0x322   : > { %1661 = vmatpush1.bf16.msra.mxu0 %v4457_v58  ;;  %2137 = vmatpush1.bf16.msra.mxu1 %v4483_v0  ;;  %v4500_v58 = vld [vmem:[%s6055_s10 + $0xf4] ss:$8 sps:$4 sm:$0xff]   ;;  %v4504_v0 = vld [vmem:[%s6055_s10 + $0x110] ss:$8 sps:$4 sm:$0xff]  }
 0x323   : > { %1662 = vmatprep.subr.bf16.mxu0 %v4880_v29  ;;  %2138 = vmatprep.subr.bf16.mxu1 %v4488_v2  ;;  %v4509_v2 = vld [vmem:[%s6055_s10 + $0x124] ss:$8 sps:$4 sm:$0xff]  }
 0x326   : > { %1663 = vmatpush1.bf16.msra.mxu0 %v4458_v62  ;;  %2139 = vmatpush1.bf16.msra.mxu1 %v4486_v3  ;;  %v4501_v62 = vld [vmem:[%s6055_s10 + $0x100] ss:$8 sps:$4 sm:$0xff]  }
 0x327   : > { %1755 = vmatprep.subr.bf16.mxu0 %v4880_v29  ;;  %2140 = vmatprep.subr.bf16.mxu1 %v4491_v4  ;;  %v4507_v3 = vld [vmem:[%s6055_s10 + $0x120] ss:$8 sps:$4 sm:$0xff]   ;;  %v4512_v4 = vld [vmem:[%s6055_s10 + $0x134] ss:$8 sps:$4 sm:$0xff]  }
 0x32a   : > { %2141 = vmatpush1.bf16.msra.mxu1 %v4489_v5 }
 0x32b   : > { %2142 = vmatprep.subr.bf16.mxu1 %v4494_v6 }
 0x32e   : > { %2143 = vmatpush1.bf16.msra.mxu1 %v4492_v7  ;;  %v4510_v7 = vld [vmem:[%s6055_s10 + $0x130] ss:$8 sps:$4 sm:$0xff]  }
 0x3cc   : > { %v1195_v43 = vpop.f32.mrb[4].mxu0 }
 0x3cd   : > { %v1197_v44 = vpop.f32.mrb[5].mxu0 }
 0x3ce   : > { %v1198_v45 = vpop.f32.mrb[6].mxu0  ;;  %v4474_v44 = vld [vmem:[%s6052_s7 + $0xd8] sm:$0xff]  }
 0x3cf   : > { %v1199_v46 = vpop.f32.mrb[7].mxu0  ;;  %v4475_v45 = vld [vmem:[%s6052_s7 + $0xe0] sm:$0xff]  }
 0x3d0   : > { %v4476_v46 = vld [vmem:[%s6052_s7 + $0xe8] sm:$0xff]  }
 0x3f4   : > { %v1459_v47 = vpop.f32.mrb[0].mxu1 }
 0x3f5   : > { %v4262_v50 = vadd.f32 %v1459_v47, %v1195_v43  ;;  %v1461_v51 = vpop.f32.mrb[1].mxu1  ;;  %v4473_v43 = vld [vmem:[%s6052_s7 + $0xd0] sm:$0xff]  }
 0x3f6   : > { %v1462_v52 = vpop.f32.mrb[2].mxu1  ;;  %v4477_v47 = vld [vmem:[%s6052_s7 + $0xf0] sm:$0xff]  }
 0x3f7   : > { %v1473_v55 = vmul.f32 %v4262_v50, %v3844_v48  ;;  %v1463_v56 = vpop.f32.mrb[3].mxu1  ;;  %v4478_v48 = vld [vmem:[%s6052_s7 + $0xf8] sm:$0xff]   ;;  %v4480_v50 = vld [vmem:[%s6052_s7 + $0x108] sm:$0xff]   ;;  %v4481_v51 = vld [vmem:[%s6052_s7 + $0x110] sm:$0xff]  }
 0x3f8   : > { %v4497_v56 = vld [vmem:[%s6055_s10 + $0xe4] ss:$8 sps:$4 sm:$0xff]  }
 0x3f9   : > { %v1481_v57 = vadd.f32 %v3845_v53, %v1473_v55  ;;  %v4482_v53 = vld [vmem:[%s6052_s7 + $0x118] sm:$0xff]   ;;  %2144 = vmatprep.subr.bf16.mxu1 %v4497_v56  ;;  %v4546_v56 = vld [vmem:[%s6058_s13 + $0xa0] ss:$8 sps:$4 sm:$0xff]  }
 0x3fb   : > { %v1482_v59 = vmul.f32 0.2, %v1481_v57 }
 0x3fd   : > { %v1483_v61 = vmax.f32 %v1481_v57, %v1482_v59  ;;  %v4495_v57 = vld [vmem:[%s6055_s10 + $0xe0] ss:$8 sps:$4 sm:$0xff]   ;;  %v4498_v59 = vld [vmem:[%s6055_s10 + $0xf0] ss:$8 sps:$4 sm:$0xff]  }
 0x3fe   : > { %2145 = vmatpush1.bf16.msra.mxu1 %v4495_v57  ;;  %v4551_v57 = vld [vmem:[%s6058_s13 + $0xb4] ss:$8 sps:$4 sm:$0xff]  }
 0x3ff   : > { %v1487_v63 = vrot.slane %v1483_v61, 7  ;;  %2146 = vmatprep.subr.bf16.mxu1 %v4500_v58  ;;  %v4503_v61 = vld [vmem:[%s6055_s10 + $0x104] ss:$8 sps:$4 sm:$0xff]   ;;  %v4549_v58 = vld [vmem:[%s6058_s13 + $0xb0] ss:$8 sps:$4 sm:$0xff]  }
 0x401   : > { %1488 = vrot.lane.b32.xlu1 %v1487_v63, %s4881_s0  ;;  %v5577_v63 = vld [vmem:[#allocation11] sm:$0xff]  ;;  %s6106_s0 = sld [smem:[#allocation38_spill]] }
 0x402   : > { %2147 = vmatpush1.bf16.msra.mxu1 %v4498_v59  ;;  %1966 = vst.msk [vmem:[#allocation5 + $0x8] sm:$0x1f] %vm1965_vm8, %v5577_v63  ;;  %v4554_v59 = vld [vmem:[%s6058_s13 + $0xc4] ss:$8 sps:$4 sm:$0xff]  }
 0x403   : > { %2148 = vmatprep.subr.bf16.mxu1 %v4503_v61  ;;  %2781 = vst.msk [vmem:[#allocation11 + $0x8] sm:$0xff] %vm2132_vm9, %v5577_v63  ;;  %2783 = vst.msk [vmem:[#allocation11 + $0x18] sm:$0xff] %vm2132_vm9, %v5577_v63  ;;  %v4552_v61 = vld [vmem:[%s6058_s13 + $0xc0] ss:$8 sps:$4 sm:$0xff]  }
 0x404   : > { %2377 = vst.msk [vmem:[#allocation8 + $0x8] sm:$0xff] %vm2376_vm10, %v5577_v63 }
 0x405   : > { %2380 = vst.msk [vmem:[#allocation8 + $0x18] sm:$0x1] %vm2379_vm11, %v5577_v63 }
 0x406   : > { %2149 = vmatpush1.bf16.msra.mxu1 %v4501_v62  ;;  %v4555_v62 = vld [vmem:[%s6058_s13 + $0xd0] ss:$8 sps:$4 sm:$0xff]   ;;  %2786 = vst.msk [vmem:[#allocation11 + $0x28] sm:$0xf] %vm2785_vm12, %v5577_v63 }
 0x407   : > { %2150 = vmatprep.subr.bf16.mxu1 %v4506_v1  ;;  %v4560_v1 = vld [vmem:[%s6058_s13 + $0xe4] ss:$8 sps:$4 sm:$0xff]   ;;  %v4605_v63 = vld [vmem:[%s6061_s16 + $0x90] sm:$0xff]   ;;  %s689_s26 = scalar_lea.vmem %s6106_s0, %s4192_s30 }
 0x409   : > { %v1973_v5 = vld [vmem:[#allocation5 + $0x8] sm:$0x1e] }
 0x40a   : > { %2151 = vmatpush1.bf16.msra.mxu1 %v4504_v0  ;;  %v1975_v6 = vpack.c.bf16 %v1973_v5, %v1973_v5  ;;  %v4557_v0 = vld [vmem:[%s6058_s13 + $0xd4] ss:$8 sps:$4 sm:$0xff]   ;;  %v4566_v5 = vld [vmem:[%s6058_s13 + $0x104] ss:$8 sps:$4 sm:$0xff]  }
 0x40b   : > { %2152 = vmatprep.subr.bf16.mxu1 %v4509_v2  ;;  %v4558_v2 = vld [vmem:[%s6058_s13 + $0xe0] ss:$8 sps:$4 sm:$0xff]  }
 0x40e   : > { %2153 = vmatpush1.bf16.msra.mxu1 %v4507_v3  ;;  %v4563_v3 = vld [vmem:[%s6058_s13 + $0xf4] ss:$8 sps:$4 sm:$0xff]  }
 0x40f   : > { %2154 = vmatprep.subr.bf16.mxu1 %v4512_v4  ;;  %v4561_v4 = vld [vmem:[%s6058_s13 + $0xf0] ss:$8 sps:$4 sm:$0xff]  }
 0x412   : > { %2155 = vmatpush1.bf16.msra.mxu1 %v4510_v7  ;;  %v2389_v7 = vld [vmem:[#allocation8 + $0x18] sm:$0x1] }
 0x473   : > { %v1489_v8 = vpop.permute.xlu1 %1488 }
 0x474   : > { %1491 = vst.msk [vmem:[#allocation4] sm:$0x1e] %vm1009_vm5, %v1489_v8  ;;  %vm3278_vm5 = vsmask.f32 6400 }
 0x475   : > { %1492 = vst.msk [vmem:[#allocation4 + $0x8] sm:$0x1e] %vm1011_vm6, %v1489_v8  ;;  %v2025_v8 = vshrl.u32 %v1975_v6, 16  ;;  %vm3453_vm6 = vcmask 1045504  }
 0x47b   : > { %v1521_v10 = vld [vmem:[#allocation4] sm:$0x1e] }
 0x47c   : > { %v1522_v9 = vld [vmem:[#allocation4 + $0x8] sm:$0x1e]  ;;  %v1523_v12 = vpack.c.bf16 %v1521_v10, %v1521_v10  ;;  %v1493_v37 = vld [vmem:[#allocation4] sm:$0xf] }
 0x47d   : > { %v1524_v11 = vpack.c.bf16 %v1522_v9, %v1522_v9  ;;  %v1494_v19 = vld [vmem:[#allocation4 + $0x8] sm:$0xf]  ;;  %v1495_v40 = vpack.c.bf16 %v1493_v37, %v1493_v37  ;;  %v1795_v52 = vld [vmem:[#allocation4] sm:$0x3c]  ;;  %v2027_v9 = vshll.u32 %v1975_v6, 16 }
 0x47e   : > { %v1553_v14 = vshll.u32 %v1523_v12, 16  ;;  %v1551_v17 = vshrl.u32 %v1523_v12, 16  ;;  %v1496_v23 = vpack.c.bf16 %v1494_v19, %v1494_v19  ;;  %v1796_v35 = vld [vmem:[#allocation4 + $0x8] sm:$0x3c]  ;;  %v1797_v54 = vpack.c.bf16 %v1795_v52, %v1795_v52  ;;  %v4524_v37 = vld [vmem:[%s6055_s10 + $0x34] ss:$8 sps:$4 sm:$0xff]  }
 0x47f   : > { %v1560_v13 = vshll.u32 %v1524_v11, 16  ;;  %v1558_v15 = vshrl.u32 %v1524_v11, 16  ;;  %v1798_v38 = vpack.c.bf16 %v1796_v35, %v1796_v35  ;;  %v4515_v10 = vld [vmem:[%s6055_s10 + $0x4] ss:$8 sps:$4 sm:$0xff]   ;;  %v2029_v11 = vrot.slane %v2027_v9, 1 }
 0x480   : > { %v1555_v18 = vrot.slane %v1553_v14, 1  ;;  %v1826_v55 = vrot.slane %v1797_v54, 1  ;;  %2280 = vmatprep.subr.bf16.mxu1 %v4515_v10  ;;  %v4521_v35 = vld [vmem:[%s6055_s10 + $0x24] ss:$8 sps:$4 sm:$0xff]   ;;  %v4543_v54 = vld [vmem:[%s6058_s13 + $0x90] ss:$8 sps:$4 sm:$0xff]  }
 0x481   : > { %v1562_v16 = vrot.slane %v1560_v13, 1  ;;  %v1827_v41 = vrot.slane %v1798_v38, 1  ;;  %v2030_v12 = vor.u32 %v2029_v11, %v2025_v8  ;;  %v3933_v13 = vld [vmem:[#allocation20] ss:$0 sm:$0xff]  ;;  %v2387_v6 = vld [vmem:[#allocation8 + $0x8] sm:$0xfe] }
 0x482   : > { %v1556_v21 = vor.u32 %v1555_v18, %v1551_v17  ;;  %v4522_v38 = vld [vmem:[%s6055_s10 + $0x30] ss:$8 sps:$4 sm:$0xff]   ;;  %v4564_v8 = vld [vmem:[%s6058_s13 + $0x100] ss:$8 sps:$4 sm:$0xff]   ;;  %v2391_v9 = vpack.c.bf16 %v2389_v7, %v2387_v6  ;;  %v4569_v10 = vld [vmem:[%s6058_s13 + $0x114] ss:$8 sps:$4 sm:$0xff]  }
 0x483   : > { %v1563_v20 = vor.u32 %v1562_v16, %v1558_v15  ;;  %3975 = vmatprep.mubr.msk.bf16.mxu1 %vm2132_vm9, %v2030_v12  ;;  %v3934_v15 = vld [vmem:[#allocation22] ss:$0 sm:$0xff]  ;;  %v4590_v7 = vld [vmem:[%s6058_s13 + $0x64] ss:$8 sps:$4 sm:$0xff]  }
 0x484   : > { %v2437_v11 = vshrl.u32 %v2391_v9, 16  ;;  %v2439_v12 = vshll.u32 %v2391_v9, 16  ;;  %v4585_v6 = vld [vmem:[%s6058_s13 + $0x50] ss:$8 sps:$4 sm:$0xff]   ;;  %v4593_v9 = vld [vmem:[%s6058_s13 + $0x74] ss:$8 sps:$4 sm:$0xff]  }
 0x485   : > { %3882 = vmatprep.mubr.msk.bf16.mxu0 %vm1157_vm7, %v1563_v20 }
 0x486   : > { %1673 = vmatmul.mubr.bf16.vlgmr.msra.gmra.mrb[8].mxu0 %v1556_v21 }
 0x487   : > { %1756 = vmatpush1.bf16.msra.mxu0 %v4459_v22  ;;  %3895 = vmatprep.mubr.msk.bf16.mxu0 %vm1157_vm7, %v1496_v23 }
 0x488   : > { %1757 = vmatprep.subr.bf16.mxu0 %v4880_v29 }
 0x48b   : > { %1758 = vmatpush1.bf16.msra.mxu0 %v4460_v24 }
 0x48c   : > { %1759 = vmatprep.subr.bf16.mxu0 %v4880_v29 }
 0x48f   : > { %1760 = vmatpush1.bf16.msra.mxu0 %v4461_v25 }
 0x490   : > { %1761 = vmatprep.subr.bf16.mxu0 %v4880_v29 }
 0x493   : > { %1762 = vmatpush1.bf16.msra.mxu0 %v4462_v26 }
 0x494   : > { %1763 = vmatprep.subr.bf16.mxu0 %v4880_v29 }
 0x497   : > { %1764 = vmatpush1.bf16.msra.mxu0 %v4463_v27  ;;  %v1969_v27 = vld [vmem:[#allocation5 + $0x8] sm:$0xf] }
 0x498   : > { %1765 = vmatprep.subr.bf16.mxu0 %v4880_v29 }
 0x49b   : > { %1766 = vmatpush1.bf16.msra.mxu0 %v4464_v28 }
 0x49c   : > { %1767 = vmatprep.subr.bf16.mxu0 %v4880_v29 }
 0x49f   : > { %1768 = vmatpush1.bf16.msra.mxu0 %v4465_v30 }
 0x4a0   : > { %1769 = vmatprep.subr.bf16.mxu0 %v4880_v29 }
 0x4a3   : > { %1770 = vmatpush1.bf16.msra.mxu0 %v4466_v31  ;;  %v4513_v31 = vld [vmem:[%s6055_s10] ss:$8 sps:$4 sm:$0xff]  }
 0x4a4   : > { %1771 = vmatprep.subr.bf16.mxu0 %v4880_v29 }
 0x4a7   : > { %1772 = vmatpush1.bf16.msra.mxu0 %v4467_v32  ;;  %v1971_v32 = vpack.c.bf16 %v1969_v27, %v1969_v27 }
 0x4a8   : > { %1773 = vmatprep.subr.bf16.mxu0 %v4880_v29 }
 0x4ab   : > { %1774 = vmatpush1.bf16.msra.mxu0 %v4468_v33 }
 0x4ac   : > { %1775 = vmatprep.subr.bf16.mxu0 %v4880_v29 }
 0x4af   : > { %1776 = vmatpush1.bf16.msra.mxu0 %v4469_v34  ;;  %v4518_v34 = vld [vmem:[%s6055_s10 + $0x14] ss:$8 sps:$4 sm:$0xff]  }
 0x4b0   : > { %1777 = vmatprep.subr.bf16.mxu0 %v4880_v29 }
 0x4b3   : > { %1778 = vmatpush1.bf16.msra.mxu0 %v4470_v36  ;;  %v4519_v36 = vld [vmem:[%s6055_s10 + $0x20] ss:$8 sps:$4 sm:$0xff]  }
 0x4b4   : > { %1904 = vmatprep.subr.bf16.mxu0 %v4880_v29 }
 0x4b6   : > { %1788 = vmatmul.mubr.bf16.vlgmr.msra.gmra.mrb[8].mxu0 %v1495_v40  ;;  %v4525_v40 = vld [vmem:[%s6055_s10 + $0x40] ss:$8 sps:$4 sm:$0xff]  }
 0x4b7   : > { %1905 = vmatpush1.bf16.msra.mxu0 %v4471_v39  ;;  %3932 = vmatprep.mubr.msk.bf16.mxu0 %vm1157_vm7, %v1827_v41  ;;  %v4527_v39 = vld [vmem:[%s6055_s10 + $0x44] ss:$8 sps:$4 sm:$0xff]   ;;  %v4530_v41 = vld [vmem:[%s6055_s10 + $0x54] ss:$8 sps:$4 sm:$0xff]   ;;  %vm3585_vm7 = vcmask 392192  }
 0x4b8   : > { %1906 = vmatprep.subr.bf16.mxu0 %v4880_v29 }
 0x4bb   : > { %1907 = vmatpush1.bf16.msra.mxu0 %v4472_v42  ;;  %v4528_v42 = vld [vmem:[%s6055_s10 + $0x50] ss:$8 sps:$4 sm:$0xff]  }
 0x4bc   : > { %1908 = vmatprep.subr.bf16.mxu0 %v4880_v29 }
 0x4bf   : > { %1909 = vmatpush1.bf16.msra.mxu0 %v4473_v43  ;;  %v4533_v43 = vld [vmem:[%s6055_s10 + $0x64] ss:$8 sps:$4 sm:$0xff]  }
 0x4c0   : > { %1910 = vmatprep.subr.bf16.mxu0 %v4880_v29 }
 0x4c3   : > { %1911 = vmatpush1.bf16.msra.mxu0 %v4474_v44  ;;  %v4531_v44 = vld [vmem:[%s6055_s10 + $0x60] ss:$8 sps:$4 sm:$0xff]  }
 0x4c4   : > { %1912 = vmatprep.subr.bf16.mxu0 %v4880_v29 }
 0x4c7   : > { %1913 = vmatpush1.bf16.msra.mxu0 %v4475_v45  ;;  %v4536_v45 = vld [vmem:[%s6055_s10 + $0x74] ss:$8 sps:$4 sm:$0xff]  }
 0x4c8   : > { %1914 = vmatprep.subr.bf16.mxu0 %v4880_v29 }
 0x4cb   : > { %1915 = vmatpush1.bf16.msra.mxu0 %v4476_v46  ;;  %v4534_v46 = vld [vmem:[%s6055_s10 + $0x70] ss:$8 sps:$4 sm:$0xff]  }
 0x4cc   : > { %1916 = vmatprep.subr.bf16.mxu0 %v4880_v29 }
 0x4cf   : > { %1917 = vmatpush1.bf16.msra.mxu0 %v4477_v47  ;;  %v4539_v47 = vld [vmem:[%s6055_s10 + $0x84] ss:$8 sps:$4 sm:$0xff]  }
 0x4d0   : > { %1918 = vmatprep.subr.bf16.mxu0 %v4880_v29 }
 0x4d3   : > { %1919 = vmatpush1.bf16.msra.mxu0 %v4478_v48  ;;  %v4537_v48 = vld [vmem:[%s6055_s10 + $0x80] ss:$8 sps:$4 sm:$0xff]  }
 0x4d4   : > { %1920 = vmatprep.subr.bf16.mxu0 %v4880_v29 }
 0x4d7   : > { %1921 = vmatpush1.bf16.msra.mxu0 %v4479_v49  ;;  %v4542_v49 = vld [vmem:[%s6055_s10 + $0x94] ss:$8 sps:$4 sm:$0xff]  }
 0x4d8   : > { %1922 = vmatprep.subr.bf16.mxu0 %v4880_v29 }
 0x4db   : > { %1923 = vmatpush1.bf16.msra.mxu0 %v4480_v50  ;;  %v4540_v50 = vld [vmem:[%s6055_s10 + $0x90] ss:$8 sps:$4 sm:$0xff]  }
 0x4dc   : > { %1924 = vmatprep.subr.bf16.mxu0 %v4880_v29 }
 0x4df   : > { %1925 = vmatpush1.bf16.msra.mxu0 %v4481_v51 }
 0x4e0   : > { %1926 = vmatprep.subr.bf16.mxu0 %v4880_v29 }
 0x4e3   : > { %1927 = vmatpush1.bf16.msra.mxu0 %v4482_v53  ;;  %v4545_v53 = vld [vmem:[%s6058_s13 + $0x94] ss:$8 sps:$4 sm:$0xff]  }
 0x4e4   : > { %2537 = vmatprep.subr.bf16.mxu0 %v4545_v53  ;;  %v2383_v53 = vld [vmem:[#allocation8 + $0x8] sm:$0xff] }
 0x4e6   : > { %1937 = vmatmul.mubr.bf16.vlgmr.msra.gmra.mrb[8].mxu0 %v1826_v55  ;;  %v4548_v55 = vld [vmem:[%s6058_s13 + $0xa4] ss:$8 sps:$4 sm:$0xff]  }
 0x4e7   : > { %2538 = vmatpush1.bf16.msra.mxu0 %v4543_v54 }
 0x4e8   : > { %2539 = vmatprep.subr.bf16.mxu0 %v4548_v55 }
 0x4eb   : > { %2540 = vmatpush1.bf16.msra.mxu0 %v4546_v56  ;;  %v4570_v56 = vld [vmem:[%s6058_s13] ss:$8 sps:$4 sm:$0xff]  }
 0x4ec   : > { %2541 = vmatprep.subr.bf16.mxu0 %v4551_v57  ;;  %v2385_v57 = vpack.c.bf16 %v2383_v53, %v2383_v53  ;;  %v4602_v53 = vld [vmem:[%s6061_s16 + $0x78] sm:$0xff]  }
 0x4ef   : > { %2542 = vmatpush1.bf16.msra.mxu0 %v4549_v58 }
 0x4f0   : > { %2543 = vmatprep.subr.bf16.mxu0 %v4554_v59  ;;  %v4575_v59 = vld [vmem:[%s6058_s13 + $0x14] ss:$8 sps:$4 sm:$0xff]  }
 0x4f3   : > { %2544 = vmatpush1.bf16.msra.mxu0 %v4552_v61  ;;  %v4573_v61 = vld [vmem:[%s6058_s13 + $0x10] ss:$8 sps:$4 sm:$0xff]  }
 0x4f4   : > { %2545 = vmatprep.subr.bf16.mxu0 %v4557_v0  ;;  %v4576_v0 = vld [vmem:[%s6058_s13 + $0x20] ss:$8 sps:$4 sm:$0xff]  }
 0x4f7   : > { %2546 = vmatpush1.bf16.msra.mxu0 %v4555_v62  ;;  %v4578_v62 = vld [vmem:[%s6058_s13 + $0x24] ss:$8 sps:$4 sm:$0xff]  }
 0x4f8   : > { %2547 = vmatprep.subr.bf16.mxu0 %v4560_v1  ;;  %v4581_v1 = vld [vmem:[%s6058_s13 + $0x34] ss:$8 sps:$4 sm:$0xff]  }
 0x4fb   : > { %2548 = vmatpush1.bf16.msra.mxu0 %v4558_v2  ;;  %v4579_v2 = vld [vmem:[%s6058_s13 + $0x30] ss:$8 sps:$4 sm:$0xff]  }
 0x4fc   : > { %2549 = vmatprep.subr.bf16.mxu0 %v4563_v3  ;;  %v4584_v3 = vld [vmem:[%s6058_s13 + $0x44] ss:$8 sps:$4 sm:$0xff]  }
 0x4ff   : > { %2550 = vmatpush1.bf16.msra.mxu0 %v4561_v4  ;;  %v4582_v4 = vld [vmem:[%s6058_s13 + $0x40] ss:$8 sps:$4 sm:$0xff]  }
 0x500   : > { %2551 = vmatprep.subr.bf16.mxu0 %v4566_v5  ;;  %v4587_v5 = vld [vmem:[%s6058_s13 + $0x54] ss:$8 sps:$4 sm:$0xff]  }
 0x503   : > { %2552 = vmatpush1.bf16.msra.mxu0 %v4564_v8  ;;  %v4588_v8 = vld [vmem:[%s6058_s13 + $0x60] ss:$8 sps:$4 sm:$0xff]  }
 0x504   : > { %2553 = vmatprep.subr.bf16.mxu0 %v4569_v10  ;;  %v4591_v10 = vld [vmem:[%s6058_s13 + $0x70] ss:$8 sps:$4 sm:$0xff]  }
 0x5b9   : > { %v1938_v14 = vpop.f32.mrb[8].mxu0 }
 0x5ba   : > { %v1952_v16 = vmul.f32 %v3933_v13, %v1938_v14  ;;  %v1940_v17 = vpop.f32.mrb[9].mxu0  ;;  %v4567_v13 = vld [vmem:[%s6058_s13 + $0x110] ss:$8 sps:$4 sm:$0xff]   ;;  %v2441_v14 = vrot.slane %v2439_v12, 1  ;;  %v4594_v12 = vld [vmem:[%s6058_s13 + $0x80] ss:$8 sps:$4 sm:$0xff]  }
 0x5bb   : > { %v1941_v18 = vpop.f32.mrb[10].mxu0  ;;  %2554 = vmatpush1.bf16.msra.mxu0 %v4567_v13  ;;  %v2323_v17 = vlaneseq }
 0x5bc   : > { %v1960_v19 = vadd.f32 %v3934_v15, %v1952_v16  ;;  %v1942_v20 = vpop.f32.mrb[11].mxu0  ;;  %v4572_v15 = vld [vmem:[%s6058_s13 + $0x4] ss:$8 sps:$4 sm:$0xff]   ;;  %v2442_v16 = vor.u32 %v2441_v14, %v2437_v11  ;;  %v4597_v14 = vld [vmem:[%s6061_s16 + $0x50] sm:$0xff]  }
 0x5bd   : > { %2671 = vmatprep.subr.bf16.mxu0 %v4572_v15  ;;  %v2324_v18 = vshrl.u32 %v2323_v17, 7  ;;  %v2321_v20 = vld [vmem:[%s6056_s11] sm:$0x3]  ;;  %v4596_v11 = vld [vmem:[%s6058_s13 + $0x84] ss:$8 sps:$4 sm:$0xff]   ;;  %v4598_v15 = vld [vmem:[%s6061_s16 + $0x58] sm:$0xff]  }
 0x5be   : > { %v1961_v21 = vadd.f32 %v1960_v19, %v5325_v60  ;;  %v4516_v60 = vld [vmem:[%s6055_s10 + $0x10] ss:$8 sps:$4 sm:$0xff]   ;;  %4033 = vmatprep.mubr.msk.bf16.mxu0 %vm2376_vm10, %v2442_v16  ;;  %v4599_v16 = vld [vmem:[%s6061_s16 + $0x60] sm:$0xff]   ;;  %v4600_v17 = vld [vmem:[%s6061_s16 + $0x68] sm:$0xff]  }
 0x5bf   : > { %v5727_v19 = vsub.s32 0, %v2324_v18 }
 0x5c0   : > { %v1962_v22 = vmul.f32 0.2, %v1961_v21 }
 0x5c2   : > { %v1963_v23 = vmax.f32 %v1961_v21, %v1962_v22  ;;  %v5732_v21 = vsub.s32 1, %v2324_v18  ;;  %v2335_v22 = vld [vmem:[%s6057_s12] sm:$0x3]  ;;  %v4601_v18 = vld [vmem:[%s6061_s16 + $0x70] sm:$0xff]  }
 0x5c4   : > { %1967 = vst [vmem:[#allocation5] sm:$0xf] %v1963_v23  ;;  %v2326_v23 = vrot.slane %v2321_v20, %v5727_v19  ;;  %v2344_v27 = vrot.slane %v2335_v22, %v5732_v21 }
 0x5cb   : > { %v1972_v24 = vld [vmem:[#allocation5] sm:$0x1e] }
 0x5cc   : > { %v1974_v25 = vpack.c.bf16 %v1972_v24, %v1972_v24  ;;  %v1968_v51 = vld [vmem:[#allocation5] sm:$0xf]  ;;  %v2330_v24 = vrot.slane %v2321_v20, %v5732_v21  ;;  %v2712_v20 = vld [vmem:[%s6102_s27] sm:$0x3] }
 0x5cd   : > { %v1970_v52 = vpack.c.bf16 %v1968_v51, %v1968_v51 }
 0x5ce   : > { %v2020_v26 = vshll.u32 %v1974_v25, 16  ;;  %v2018_v28 = vshrl.u32 %v1974_v25, 16  ;;  %v2340_v25 = vrot.slane %v2335_v22, %v5727_v19  ;;  %v2726_v22 = vld [vmem:[%s6103_s1] sm:$0x3] }
 0x5d0   : > { %v2022_v30 = vrot.slane %v2020_v26, 1 }
 0x5d2   : > { %v2023_v33 = vor.u32 %v2022_v30, %v2018_v28 }
 0x5d4   : > { %2169 = vmatmul.mubr.bf16.vlgmr.msra.gmra.mrb[4].mxu1 %v2023_v33 }
 0x5d5   : > { %2281 = vmatpush1.bf16.msra.mxu1 %v4513_v31  ;;  %3996 = vmatprep.mubr.msk.bf16.mxu1 %vm2132_vm9, %v1971_v32 }
 0x5d6   : > { %2282 = vmatprep.subr.bf16.mxu1 %v4518_v34 }
 0x5d9   : > { %2283 = vmatpush1.bf16.msra.mxu1 %v4516_v60 }
 0x5da   : > { %2284 = vmatprep.subr.bf16.mxu1 %v4521_v35 }
 0x5dd   : > { %2285 = vmatpush1.bf16.msra.mxu1 %v4519_v36 }
 0x5de   : > { %2286 = vmatprep.subr.bf16.mxu1 %v4524_v37 }
 0x5e1   : > { %2287 = vmatpush1.bf16.msra.mxu1 %v4522_v38 }
 0x5e2   : > { %2288 = vmatprep.subr.bf16.mxu1 %v4527_v39 }
 0x5e5   : > { %2289 = vmatpush1.bf16.msra.mxu1 %v4525_v40 }
 0x5e6   : > { %2290 = vmatprep.subr.bf16.mxu1 %v4530_v41 }
 0x5e9   : > { %2291 = vmatpush1.bf16.msra.mxu1 %v4528_v42 }
 0x5ea   : > { %2292 = vmatprep.subr.bf16.mxu1 %v4533_v43 }
 0x5ed   : > { %2293 = vmatpush1.bf16.msra.mxu1 %v4531_v44 }
 0x5ee   : > { %2294 = vmatprep.subr.bf16.mxu1 %v4536_v45 }
 0x5f1   : > { %2295 = vmatpush1.bf16.msra.mxu1 %v4534_v46 }
 0x5f2   : > { %2296 = vmatprep.subr.bf16.mxu1 %v4539_v47 }
 0x5f5   : > { %2297 = vmatpush1.bf16.msra.mxu1 %v4537_v48 }
 0x5f6   : > { %2298 = vmatprep.subr.bf16.mxu1 %v4542_v49  ;;  %v2388_v49 = vld [vmem:[#allocation8 + $0x10] sm:$0x1] }
 0x5f9   : > { %2299 = vmatpush1.bf16.msra.mxu1 %v4540_v50 }
 0x5fa   : > { %2957 = vmatprep.subr.bf16.mxu1 %v4880_v29 }
 0x5fc   : > { %2313 = vmatmul.mubr.bf16.vlgmr.msra.gmra.mrb[4].mxu1 %v1970_v52 }
 0x5fd   : > { %2958 = vmatpush1.bf16.msra.mxu1 %v4597_v14 }
 0x5fe   : > { %2959 = vmatprep.subr.bf16.mxu1 %v4880_v29 }
 0x601   : > { %2960 = vmatpush1.bf16.msra.mxu1 %v4598_v15 }
 0x602   : > { %2961 = vmatprep.subr.bf16.mxu1 %v4880_v29 }
 0x605   : > { %2962 = vmatpush1.bf16.msra.mxu1 %v4599_v16 }
 0x606   : > { %2963 = vmatprep.subr.bf16.mxu1 %v4880_v29 }
 0x609   : > { %2964 = vmatpush1.bf16.msra.mxu1 %v4600_v17 }
 0x60a   : > { %2965 = vmatprep.subr.bf16.mxu1 %v4880_v29 }
 0x60d   : > { %2966 = vmatpush1.bf16.msra.mxu1 %v4601_v18 }
 0x60e   : > { %2967 = vmatprep.subr.bf16.mxu1 %v4880_v29 }
 0x611   : > { %2968 = vmatpush1.bf16.msra.mxu1 %v4602_v53  ;;  %v4622_v53 = vld [vmem:[%s6061_s16 + $0xc8] sm:$0xff]  }
 0x612   : > { %2969 = vmatprep.subr.bf16.mxu1 %v4880_v29 }
 0x6cf   : > { %v2314_v26 = vpop.f32.mrb[4].mxu1 }
 0x6d0   : > { %v2333_v28 = vmul.f32 %v2326_v23, %v2314_v26  ;;  %v2316_v30 = vpop.f32.mrb[5].mxu1  ;;  %v2717_v23 = vrot.slane %v2712_v20, %v5727_v19 }
 0x6d1   : > { %v2334_v31 = vmul.f32 %v2330_v24, %v2316_v30  ;;  %v2318_v32 = vpop.f32.mrb[6].mxu1  ;;  %v2721_v24 = vrot.slane %v2712_v20, %v5732_v21 }
 0x6d2   : > { %v2347_v33 = vadd.f32 %v2340_v25, %v2333_v28  ;;  %v2319_v34 = vpop.f32.mrb[7].mxu1  ;;  %v2731_v25 = vrot.slane %v2726_v22, %v5727_v19 }
 0x6d3   : > { %v2348_v60 = vadd.f32 %v2344_v27, %v2334_v31  ;;  %v2735_v27 = vrot.slane %v2726_v22, %v5732_v21 }
 0x6d4   : > { %v2349_v35 = vmul.f32 0.2, %v2347_v33 }
 0x6d5   : > { %v2350_v36 = vmul.f32 0.2, %v2348_v60 }
 0x6d6   : > { %v2351_v37 = vmax.f32 %v2347_v33, %v2349_v35 }
 0x6d7   : > { %v2352_v38 = vmax.f32 %v2348_v60, %v2350_v36 }
 0x6d9   : > { %v2355_v39 = vcombine.low %v2351_v37, %v2352_v38 }
 0x6db   : > { %2357 = vst [vmem:[#allocation6] sm:$0xff] %v2355_v39 }
 0x6e2   : > { %v2358_v40 = vld [vmem:[#allocation6] sm:$0x1]  ;;  %v2360_v41 = vld [vmem:[#allocation6 + $0x4] sm:$0x1]  ;;  %v2362_v42 = vld [vmem:[#allocation6 + $0x1] sm:$0x1] }
 0x6e3   : > { %2359 = vst [vmem:[#allocation7] sm:$0x1] %v2358_v40  ;;  %2361 = vst [vmem:[#allocation7 + $0x1] sm:$0x1] %v2360_v41  ;;  %v2364_v43 = vld [vmem:[#allocation6 + $0x5] sm:$0x1] }
 0x6e4   : > { %2363 = vst [vmem:[#allocation7 + $0x2] sm:$0x1] %v2362_v42  ;;  %v2366_v44 = vld [vmem:[#allocation6 + $0x2] sm:$0x1]  ;;  %v2368_v45 = vld [vmem:[#allocation6 + $0x6] sm:$0x1] }
 0x6e5   : > { %2365 = vst [vmem:[#allocation7 + $0x3] sm:$0x1] %v2364_v43  ;;  %2367 = vst [vmem:[#allocation7 + $0x4] sm:$0x1] %v2366_v44  ;;  %v2370_v46 = vld [vmem:[#allocation6 + $0x3] sm:$0x1] }
 0x6e6   : > { %2369 = vst [vmem:[#allocation7 + $0x5] sm:$0x1] %v2368_v45  ;;  %v2372_v47 = vld [vmem:[#allocation6 + $0x7] sm:$0x1]  ;;  %2371 = vst [vmem:[#allocation7 + $0x6] sm:$0x1] %v2370_v46 }
 0x6e7   : > { %2373 = vst [vmem:[#allocation7 + $0x7] sm:$0x1] %v2372_v47 }
 0x6ee   : > { %v2374_v48 = vld [vmem:[#allocation7] sm:$0xff] }
 0x6ef   : > { %2381 = vst [vmem:[#allocation8] sm:$0xff] %v2374_v48  ;;  %v2384_v13 = vpack.c.bf16 %v2374_v48, %v2374_v48 }
 0x6f6   : > { %v2386_v50 = vld [vmem:[#allocation8] sm:$0xfe] }
 0x6f7   : > { %v2390_v51 = vpack.c.bf16 %v2388_v49, %v2386_v50 }
 0x6f9   : > { %v2432_v52 = vshll.u32 %v2390_v51, 16  ;;  %v2430_v54 = vshrl.u32 %v2390_v51, 16 }
 0x6fb   : > { %v2434_v55 = vrot.slane %v2432_v52, 1 }
 0x6fd   : > { %v2435_v58 = vor.u32 %v2434_v55, %v2430_v54  ;;  %v4603_v54 = vld [vmem:[%s6061_s16 + $0x80] sm:$0xff]  }
 0x6fe   : > { %2970 = vmatpush1.bf16.msra.mxu1 %v4603_v54  ;;  %v4623_v54 = vld [vmem:[%s6061_s16 + $0xd0] sm:$0xff]  }
 0x6ff   : > { %2570 = vmatmul.mubr.bf16.vlgmr.msra.gmra.mrb[12].mxu0 %v2435_v58  ;;  %2971 = vmatprep.subr.bf16.mxu1 %v4880_v29 }
 0x700   : > { %2672 = vmatpush1.bf16.msra.mxu0 %v4570_v56  ;;  %4052 = vmatprep.mubr.msk.bf16.mxu0 %vm2376_vm10, %v2385_v57  ;;  %v4604_v56 = vld [vmem:[%s6061_s16 + $0x88] sm:$0xff]  }
 0x701   : > { %2673 = vmatprep.subr.bf16.mxu0 %v4575_v59 }
 0x702   : > { %2972 = vmatpush1.bf16.msra.mxu1 %v4604_v56 }
 0x703   : > { %2973 = vmatprep.subr.bf16.mxu1 %v4880_v29 }
 0x704   : > { %2674 = vmatpush1.bf16.msra.mxu0 %v4573_v61 }
 0x705   : > { %2675 = vmatprep.subr.bf16.mxu0 %v4578_v62  ;;  %v4606_v62 = vld [vmem:[%s6061_s16 + $0x98] sm:$0xff]  }
 0x706   : > { %2974 = vmatpush1.bf16.msra.mxu1 %v4605_v63 }
 0x707   : > { %2975 = vmatprep.subr.bf16.mxu1 %v4880_v29 }
 0x708   : > { %2676 = vmatpush1.bf16.msra.mxu0 %v4576_v0 }
 0x709   : > { %2677 = vmatprep.subr.bf16.mxu0 %v4581_v1 }
 0x70a   : > { %2976 = vmatpush1.bf16.msra.mxu1 %v4606_v62 }
 0x70b   : > { %3061 = vmatprep.subr.bf16.mxu1 %v4880_v29 }
 0x70c   : > { %2678 = vmatpush1.bf16.msra.mxu0 %v4579_v2 }
 0x70d   : > { %2679 = vmatprep.subr.bf16.mxu0 %v4584_v3 }
 0x710   : > { %2680 = vmatpush1.bf16.msra.mxu0 %v4582_v4 }
 0x711   : > { %2681 = vmatprep.subr.bf16.mxu0 %v4587_v5 }
 0x714   : > { %2682 = vmatpush1.bf16.msra.mxu0 %v4585_v6 }
 0x715   : > { %2683 = vmatprep.subr.bf16.mxu0 %v4590_v7 }
 0x718   : > { %2684 = vmatpush1.bf16.msra.mxu0 %v4588_v8 }
 0x719   : > { %2685 = vmatprep.subr.bf16.mxu0 %v4593_v9 }
 0x71c   : > { %2686 = vmatpush1.bf16.msra.mxu0 %v4591_v10 }
 0x71d   : > { %2687 = vmatprep.subr.bf16.mxu0 %v4596_v11 }
 0x720   : > { %2688 = vmatpush1.bf16.msra.mxu0 %v4594_v12 }
 0x723   : > { %2704 = vmatmul.mubr.bf16.vlgmr.msra.gmra.mrb[12].mxu0 %v2384_v13 }
 0x7f6   : > { %v2705_v26 = vpop.f32.mrb[12].mxu0 }
 0x7f7   : > { %v2724_v28 = vmul.f32 %v2717_v23, %v2705_v26  ;;  %v2707_v30 = vpop.f32.mrb[13].mxu0 }
 0x7f8   : > { %v2725_v31 = vmul.f32 %v2721_v24, %v2707_v30  ;;  %v2709_v32 = vpop.f32.mrb[14].mxu0 }
 0x7f9   : > { %v2738_v33 = vadd.f32 %v2731_v25, %v2724_v28  ;;  %v2710_v34 = vpop.f32.mrb[15].mxu0  ;;  %v4607_v28 = vld [vmem:[%s6061_s16] sm:$0xff]  }
 0x7fa   : > { %v2739_v60 = vadd.f32 %v2735_v27, %v2725_v31  ;;  %v4609_v34 = vld [vmem:[%s6061_s16 + $0x10] sm:$0xff]  }
 0x7fb   : > { %v2740_v35 = vmul.f32 0.2, %v2738_v33 }
 0x7fc   : > { %v2741_v36 = vmul.f32 0.2, %v2739_v60 }
 0x7fd   : > { %v2742_v37 = vmax.f32 %v2738_v33, %v2740_v35  ;;  %v4608_v33 = vld [vmem:[%s6061_s16 + $0x8] sm:$0xff]   ;;  %v4611_v35 = vld [vmem:[%s6061_s16 + $0x20] sm:$0xff]  }
 0x7fe   : > { %v2743_v38 = vmax.f32 %v2739_v60, %v2741_v36  ;;  %v4610_v60 = vld [vmem:[%s6061_s16 + $0x18] sm:$0xff]   ;;  %v4612_v36 = vld [vmem:[%s6061_s16 + $0x28] sm:$0xff]  }
 0x7ff   : > { %2744 = vst [vmem:[#allocation9] sm:$0xff] %v2742_v37  ;;  %v4613_v37 = vld [vmem:[%s6061_s16 + $0x30] sm:$0xff]  }
 0x800   : > { %2745 = vst [vmem:[#allocation9 + $0x8] sm:$0xff] %v2743_v38  ;;  %v4614_v38 = vld [vmem:[%s6061_s16 + $0x38] sm:$0xff]  }
 0x806   : > { %v2762_v39 = vld [vmem:[#allocation9 + $0x4] ss:$0 sm:$0xff]  ;;  %v2766_v40 = vld [vmem:[#allocation9 + $0x5] ss:$0 sm:$0xff]  ;;  %v2770_v41 = vld [vmem:[#allocation9 + $0x6] ss:$0 sm:$0xff] }
 0x807   : > { %v2774_v19 = vld [vmem:[#allocation9 + $0x7] ss:$0 sm:$0xff]  ;;  %2763 = vst [vmem:[#allocation10 + $0x8] sm:$0x1] %v2762_v39  ;;  %2767 = vst [vmem:[#allocation10 + $0xa] sm:$0x1] %v2766_v40 }
 0x808   : > { %2771 = vst [vmem:[#allocation10 + $0xc] sm:$0x1] %v2770_v41  ;;  %v2764_v21 = vld [vmem:[#allocation9 + $0xc] ss:$0 sm:$0xff]  ;;  %v2768_v42 = vld [vmem:[#allocation9 + $0xd] ss:$0 sm:$0xff] }
 0x809   : > { %2775 = vst [vmem:[#allocation10 + $0xe] sm:$0x1] %v2774_v19  ;;  %v2772_v43 = vld [vmem:[#allocation9 + $0xe] ss:$0 sm:$0xff]  ;;  %v2776_v44 = vld [vmem:[#allocation9 + $0xf] ss:$0 sm:$0xff] }
 0x80a   : > { %2765 = vst [vmem:[#allocation10 + $0x9] sm:$0x1] %v2764_v21  ;;  %2769 = vst [vmem:[#allocation10 + $0xb] sm:$0x1] %v2768_v42  ;;  %v2746_v45 = vld [vmem:[#allocation9] ss:$0 sm:$0xff] }
 0x80b   : > { %2773 = vst [vmem:[#allocation10 + $0xd] sm:$0x1] %v2772_v43  ;;  %2777 = vst [vmem:[#allocation10 + $0xf] sm:$0x1] %v2776_v44  ;;  %v2748_v46 = vld [vmem:[#allocation9 + $0x8] ss:$0 sm:$0xff] }
 0x80c   : > { %2747 = vst [vmem:[#allocation10] sm:$0x1] %v2746_v45  ;;  %v2750_v47 = vld [vmem:[#allocation9 + $0x1] ss:$0 sm:$0xff]  ;;  %v2752_v48 = vld [vmem:[#allocation9 + $0x9] ss:$0 sm:$0xff] }
 0x80d   : > { %2749 = vst [vmem:[#allocation10 + $0x1] sm:$0x1] %v2748_v46  ;;  %2751 = vst [vmem:[#allocation10 + $0x2] sm:$0x1] %v2750_v47  ;;  %v2754_v49 = vld [vmem:[#allocation9 + $0x2] ss:$0 sm:$0xff] }
 0x80e   : > { %2753 = vst [vmem:[#allocation10 + $0x3] sm:$0x1] %v2752_v48  ;;  %v2756_v50 = vld [vmem:[#allocation9 + $0xa] ss:$0 sm:$0xff]  ;;  %v2758_v51 = vld [vmem:[#allocation9 + $0x3] ss:$0 sm:$0xff] }
 0x80f   : > { %2755 = vst [vmem:[#allocation10 + $0x4] sm:$0x1] %v2754_v49  ;;  %2757 = vst [vmem:[#allocation10 + $0x5] sm:$0x1] %v2756_v50  ;;  %v2760_v52 = vld [vmem:[#allocation9 + $0xb] ss:$0 sm:$0xff] }
 0x810   : > { %2759 = vst [vmem:[#allocation10 + $0x6] sm:$0x1] %v2758_v51  ;;  %2761 = vst [vmem:[#allocation10 + $0x7] sm:$0x1] %v2760_v52  ;;  %v4615_v39 = vld [vmem:[%s6061_s16 + $0x40] sm:$0xff]   ;;  %v4616_v21 = vld [vmem:[%s6061_s16 + $0x48] sm:$0xff]  }
 0x811   : > { %v4617_v45 = vld [vmem:[%s6061_s16 + $0xa0] sm:$0xff]   ;;  %v4618_v49 = vld [vmem:[%s6061_s16 + $0xa8] sm:$0xff]   ;;  %v4619_v50 = vld [vmem:[%s6061_s16 + $0xb0] sm:$0xff]  }
 0x812   : > { %v2779_v55 = vld [vmem:[#allocation10 + $0x8] sm:$0xff]  ;;  %v4620_v51 = vld [vmem:[%s6061_s16 + $0xb8] sm:$0xff]  }
 0x813   : > { %v2791_v57 = vrot.slane %v2779_v55, 6  ;;  %v4621_v52 = vld [vmem:[%s6061_s16 + $0xc0] sm:$0xff]  }
 0x817   : > { %v2778_v58 = vld [vmem:[#allocation10] sm:$0xff] }
 0x818   : > { %v2790_v59 = vrot.slane %v2778_v58, 6  ;;  %v4624_v58 = vld [vmem:[%s6061_s16 + $0xd8] sm:$0xff]  }
 0x81a   : > { %2793 = vrot.lane.b32.xlu1 %v2790_v59, %s4879_s2  ;;  %v2792_v61 = vsel %vm2789_vm13, %v2790_v59, %v2791_v57 }
 0x81b   : > { %2795 = vrot.lane.b32.xlu0 %v2792_v61, %s4879_s2 }
 0x81e   : > { %2797 = vrot.lane.b32.xlu1 %v2791_v57, %s4879_s2 }
 0x88c   : > { %v2794_v0 = vpop.permute.xlu1 %2793 }
 0x88d   : > { %2803 = vst.msk [vmem:[#allocation11] sm:$0xfc] %vm2802_vm14, %v2794_v0  ;;  %v2796_v1 = vpop.permute.xlu0 %2795 }
 0x88e   : > { %2805 = vst.msk [vmem:[#allocation11 + $0x8] sm:$0xfc] %vm2804_vm15, %v2794_v0  ;;  %v4625_v0 = vld [vmem:[%s6061_s16 + $0xe0] sm:$0xff]  }
 0x88f   : > { %2807 = vst.msk [vmem:[#allocation11 + $0x10] sm:$0xff] %vm2806_vm0, %v2796_v1 }
 0x890   : > { %2808 = vst.msk [vmem:[#allocation11 + $0x18] sm:$0xff] %vm2376_vm10, %v2796_v1  ;;  %v2798_v2 = vpop.permute.xlu1 %2797 }
 0x891   : > { %2810 = vst.msk [vmem:[#allocation11 + $0x20] sm:$0x3] %vm2809_vm1, %v2798_v2 }
 0x892   : > { %2812 = vst.msk [vmem:[#allocation11 + $0x28] sm:$0x3] %vm2811_vm2, %v2798_v2 }
 0x894   : > { %v2839_v4 = vld [vmem:[#allocation11] sm:$0xfe] }
 0x895   : > { %v2840_v3 = vld [vmem:[#allocation11 + $0x8] sm:$0xfe]  ;;  %v2813_v43 = vld [vmem:[#allocation11] sm:$0xff] }
 0x896   : > { %v5850_v6 = vld [vmem:[#allocation11 + $0x10] sm:$0xff]  ;;  %v2814_v27 = vld [vmem:[#allocation11 + $0x8] sm:$0xff]  ;;  %v3102_v1 = vld [vmem:[#allocation11] sm:$0xfc] }
 0x897   : > { %v5848_v5 = vld [vmem:[#allocation11 + $0x18] sm:$0xff]  ;;  %v2843_v8 = vpack.c.bf16 %v5850_v6, %v2839_v4  ;;  %v3103_v41 = vld [vmem:[#allocation11 + $0x8] sm:$0xfc]  ;;  %v2817_v46 = vpack.c.bf16 %v5850_v6, %v2813_v43 }
 0x898   : > { %v2844_v7 = vpack.c.bf16 %v5848_v5, %v2840_v3  ;;  %v2841_v11 = vld [vmem:[#allocation11 + $0x20] sm:$0x1]  ;;  %v2818_v32 = vpack.c.bf16 %v5848_v5, %v2814_v27  ;;  %v3107_v42 = vpack.c.bf16 %v5848_v5, %v3103_v41  ;;  %v3250_v56 = vld [vmem:[#allocation11 + $0x8] sm:$0xf8] }
 0x899   : > { %v2842_v9 = vld [vmem:[#allocation11 + $0x28] sm:$0x1]  ;;  %v2845_v13 = vpack.c.bf16 %v2841_v11, %v2841_v11  ;;  %v2872_v14 = vshll.u32 %v2843_v8, 16  ;;  %v2870_v18 = vshrl.u32 %v2843_v8, 16  ;;  %v3254_v59 = vpack.c.bf16 %v5848_v5, %v3250_v56  ;;  %v3104_v63 = vld [vmem:[#allocation11 + $0x20] sm:$0x3] }
 0x89a   : > { %v2884_v10 = vshll.u32 %v2844_v7, 16  ;;  %v2846_v12 = vpack.c.bf16 %v2842_v9, %v2842_v9  ;;  %v2882_v15 = vshrl.u32 %v2844_v7, 16  ;;  %v3105_v40 = vld [vmem:[#allocation11 + $0x28] sm:$0x3]  ;;  %v3139_v47 = vrot.slane %v3107_v42, 1  ;;  %v4626_v9 = vld [vmem:[%s6061_s16 + $0xe8] sm:$0xff]  }
 0x89b   : > { %v2874_v20 = vrot.slane %v2872_v14, 1  ;;  %v2877_v22 = vshll.u32 %v2845_v13, 16  ;;  %v3109_v19 = vpack.c.bf16 %v3105_v40, %v3105_v40  ;;  %v3252_v55 = vld [vmem:[#allocation11 + $0x28] sm:$0x7]  ;;  %v3297_v2 = vshrl.u32 %v3254_v59, 16 }
 0x89c   : > { %v2886_v16 = vrot.slane %v2884_v10, 1  ;;  %v2889_v17 = vshll.u32 %v2846_v12, 16  ;;  %v3256_v57 = vpack.c.bf16 %v3252_v55, %v3252_v55  ;;  %v3300_v3 = vshll.u32 %v3254_v59, 16  ;;  %v3251_v27 = vld [vmem:[#allocation11 + $0x20] sm:$0x7]  ;;  %v4643_v56 = vld [vmem:[%s6061_s16 + $0x170] sm:$0xff]  }
 0x89d   : > { %v2875_v25 = vor.u32 %v2874_v20, %v2870_v18  ;;  %v2879_v26 = vrot.slane %v2877_v22, 1  ;;  %v3140_v44 = vrot.slane %v3109_v19, 1  ;;  %v3108_v4 = vpack.c.bf16 %v3104_v63, %v3104_v63  ;;  %v4628_v22 = vld [vmem:[%s6061_s16 + $0xf8] sm:$0xff]   ;;  %v3421_v41 = vld [vmem:[#allocation11 + $0x8] sm:$0xf0]  ;;  %v4642_v55 = vld [vmem:[%s6061_s16 + $0x168] sm:$0xff]  }
 0x89e   : > { %v2887_v23 = vor.u32 %v2886_v16, %v2882_v15  ;;  %v2891_v24 = vrot.slane %v2889_v17, 1  ;;  %v3305_v61 = vshrl.u32 %v3256_v57, 16  ;;  %v3308_v62 = vshll.u32 %v3256_v57, 16  ;;  %v4627_v16 = vld [vmem:[%s6061_s16 + $0xf0] sm:$0xff]   ;;  %v4644_v57 = vld [vmem:[%s6061_s16 + $0x178] sm:$0xff]   ;;  %v4645_v59 = vld [vmem:[%s6061_s16 + $0x180] sm:$0xff]  }
 0x89f   : > { %v2880_v31 = vsel %vm2868_vm3, %v2875_v25, %v2879_v26  ;;  %v3141_v48 = vsel %vm3135_vm4, %v3139_v47, %v3140_v44  ;;  %v3106_v10 = vpack.c.bf16 %v5850_v6, %v3102_v1  ;;  %v3299_v11 = vrot.slane %v3297_v2, 1  ;;  %v4631_v25 = vld [vmem:[%s6061_s16 + $0x110] sm:$0xff]   ;;  %v4632_v26 = vld [vmem:[%s6061_s16 + $0x118] sm:$0xff]   ;;  %v3420_v63 = vld [vmem:[#allocation11] sm:$0xf0] }
 0x8a0   : > { %v2892_v30 = vsel %vm2868_vm3, %v2887_v23, %v2891_v24  ;;  %v3307_v7 = vrot.slane %v3305_v61, 1  ;;  %v3310_v8 = vrot.slane %v3308_v62, 2  ;;  %v3302_v12 = vrot.slane %v3300_v3, 2  ;;  %v4629_v23 = vld [vmem:[%s6061_s16 + $0x100] sm:$0xff]   ;;  %v4630_v24 = vld [vmem:[%s6061_s16 + $0x108] sm:$0xff]  }
 0x8a1   : > { %4083 = vmatprep.mubr.msk.bf16.mxu1 %vm2132_vm9, %v2892_v30  ;;  %v3137_v13 = vrot.slane %v3108_v4, 1  ;;  %v3136_v15 = vrot.slane %v3106_v10, 1  ;;  %v3249_v30 = vld [vmem:[#allocation11] sm:$0xf8]  ;;  %v3425_v44 = vpack.c.bf16 %v5848_v5, %v3421_v41  ;;  %v4188_v4 = vld [vmem:[%s6104_s28] ss:$0 sm:$0xff] }
 0x8a2   : > { %2990 = vmatmul.mubr.bf16.vlgmr.msra.gmra.mrb[8].mxu1 %v2880_v31  ;;  %v3311_v14 = vor.u32 %v3310_v8, %v3307_v7  ;;  %v3303_v17 = vor.u32 %v3302_v12, %v3299_v11  ;;  %v3255_v31 = vpack.c.bf16 %v3251_v27, %v3251_v27  ;;  %v4638_v5 = vld [vmem:[%s6061_s16 + $0x148] sm:$0xff]   ;;  %v4189_v8 = vld [vmem:[%s6105_s23] ss:$0 sm:$0xff] }
 0x8a3   : > { %3062 = vmatpush1.bf16.msra.mxu1 %v4607_v28  ;;  %4094 = vmatprep.mubr.msk.bf16.mxu1 %vm2132_vm9, %v2818_v32  ;;  %v3138_v18 = vsel %vm3135_vm4, %v3136_v15, %v3137_v13  ;;  %v4633_v28 = vld [vmem:[%s6061_s16 + $0x120] sm:$0xff]   ;;  %v4634_v32 = vld [vmem:[%s6061_s16 + $0x128] sm:$0xff]  }
 0x8a4   : > { %3063 = vmatprep.subr.bf16.mxu1 %v4880_v29  ;;  %v3312_v20 = vsel %vm3278_vm5, %v3303_v17, %v3311_v14  ;;  %v4646_v62 = vld [vmem:[%s6061_s16 + $0x188] sm:$0xff]  }
 0x8a7   : > { %3064 = vmatpush1.bf16.msra.mxu1 %v4608_v33  ;;  %v3253_v33 = vpack.c.bf16 %v5850_v6, %v3249_v30 }
 0x8a8   : > { %3065 = vmatprep.subr.bf16.mxu1 %v4880_v29 }
 0x8ab   : > { %3066 = vmatpush1.bf16.msra.mxu1 %v4609_v34  ;;  %v3288_v34 = vshrl.u32 %v3255_v31, 16 }
 0x8ac   : > { %3067 = vmatprep.subr.bf16.mxu1 %v4880_v29 }
 0x8af   : > { %3068 = vmatpush1.bf16.msra.mxu1 %v4610_v60  ;;  %v3291_v60 = vshll.u32 %v3255_v31, 16 }
 0x8b0   : > { %3069 = vmatprep.subr.bf16.mxu1 %v4880_v29 }
 0x8b1   : > { %v3293_v40 = vrot.slane %v3291_v60, 2 }
 0x8b3   : > { %3070 = vmatpush1.bf16.msra.mxu1 %v4611_v35  ;;  %v4635_v35 = vld [vmem:[%s6061_s16 + $0x130] sm:$0xff]  }
 0x8b4   : > { %3071 = vmatprep.subr.bf16.mxu1 %v4880_v29 }
 0x8b7   : > { %3072 = vmatpush1.bf16.msra.mxu1 %v4612_v36  ;;  %v3280_v36 = vshrl.u32 %v3253_v33, 16 }
 0x8b8   : > { %3073 = vmatprep.subr.bf16.mxu1 %v4880_v29 }
 0x8b9   : > { %v3282_v42 = vrot.slane %v3280_v36, 1 }
 0x8bb   : > { %3074 = vmatpush1.bf16.msra.mxu1 %v4613_v37  ;;  %v3283_v37 = vshll.u32 %v3253_v33, 16 }
 0x8bc   : > { %3075 = vmatprep.subr.bf16.mxu1 %v4880_v29 }
 0x8bd   : > { %v3285_v43 = vrot.slane %v3283_v37, 2 }
 0x8bf   : > { %3076 = vmatpush1.bf16.msra.mxu1 %v4614_v38  ;;  %v3423_v38 = vld [vmem:[#allocation11 + $0x28] sm:$0xf]  ;;  %v3286_v47 = vor.u32 %v3285_v43, %v3282_v42 }
 0x8c0   : > { %3077 = vmatprep.subr.bf16.mxu1 %v4880_v29  ;;  %v3427_v19 = vpack.c.bf16 %v3423_v38, %v3423_v38 }
 0x8c3   : > { %3078 = vmatpush1.bf16.msra.mxu1 %v4615_v39  ;;  %v3290_v39 = vrot.slane %v3288_v34, 1 }
 0x8c4   : > { %3079 = vmatprep.subr.bf16.mxu1 %v4880_v29 }
 0x8c7   : > { %3080 = vmatpush1.bf16.msra.mxu1 %v4616_v21  ;;  %v4636_v21 = vld [vmem:[%s6061_s16 + $0x138] sm:$0xff]  }
 0x8c8   : > { %3206 = vmatprep.subr.bf16.mxu1 %v4880_v29 }
 0x8ca   : > { %3094 = vmatmul.mubr.bf16.vlgmr.msra.gmra.mrb[8].mxu1 %v2817_v46  ;;  %v3458_v46 = vrot.slane %v3427_v19, 2 }
 0x8cb   : > { %3207 = vmatpush1.bf16.msra.mxu1 %v4617_v45  ;;  %4125 = vmatprep.mubr.msk.bf16.mxu1 %vm2132_vm9, %v3141_v48  ;;  %v3294_v45 = vor.u32 %v3293_v40, %v3290_v39  ;;  %v4637_v48 = vld [vmem:[%s6061_s16 + $0x140] sm:$0xff]  }
 0x8cc   : > { %3208 = vmatprep.subr.bf16.mxu1 %v4880_v29 }
 0x8cf   : > { %3209 = vmatpush1.bf16.msra.mxu1 %v4618_v49  ;;  %v3457_v49 = vrot.slane %v3425_v44, 2 }
 0x8d0   : > { %3210 = vmatprep.subr.bf16.mxu1 %v4880_v29 }
 0x8d3   : > { %3211 = vmatpush1.bf16.msra.mxu1 %v4619_v50  ;;  %v3295_v50 = vsel %vm3278_vm5, %v3286_v47, %v3294_v45 }
 0x8d4   : > { %3212 = vmatprep.subr.bf16.mxu1 %v4880_v29 }
 0x8d7   : > { %3213 = vmatpush1.bf16.msra.mxu1 %v4620_v51  ;;  %v3459_v51 = vsel %vm3453_vm6, %v3457_v49, %v3458_v46 }
 0x8d8   : > { %3214 = vmatprep.subr.bf16.mxu1 %v4880_v29 }
 0x8db   : > { %3215 = vmatpush1.bf16.msra.mxu1 %v4621_v52  ;;  %v4639_v52 = vld [vmem:[%s6061_s16 + $0x150] sm:$0xff]  }
 0x8dc   : > { %3216 = vmatprep.subr.bf16.mxu1 %v4880_v29 }
 0x8df   : > { %3217 = vmatpush1.bf16.msra.mxu1 %v4622_v53  ;;  %v4640_v53 = vld [vmem:[%s6061_s16 + $0x158] sm:$0xff]  }
 0x8e0   : > { %3218 = vmatprep.subr.bf16.mxu1 %v4880_v29 }
 0x8e3   : > { %3219 = vmatpush1.bf16.msra.mxu1 %v4623_v54  ;;  %v4641_v54 = vld [vmem:[%s6061_s16 + $0x160] sm:$0xff]  }
 0x8e4   : > { %3220 = vmatprep.subr.bf16.mxu1 %v4880_v29 }
 0x8e7   : > { %3221 = vmatpush1.bf16.msra.mxu1 %v4624_v58  ;;  %v3422_v58 = vld [vmem:[#allocation11 + $0x20] sm:$0xf] }
 0x8e8   : > { %3222 = vmatprep.subr.bf16.mxu1 %v4880_v29  ;;  %v3426_v61 = vpack.c.bf16 %v3422_v58, %v3422_v58 }
 0x8ea   : > { %v3455_v1 = vrot.slane %v3426_v61, 2 }
 0x8eb   : > { %3223 = vmatpush1.bf16.msra.mxu1 %v4625_v0  ;;  %v3424_v0 = vpack.c.bf16 %v5850_v6, %v3420_v63 }
 0x8ec   : > { %3224 = vmatprep.subr.bf16.mxu1 %v4880_v29 }
 0x8ed   : > { %v3454_v2 = vrot.slane %v3424_v0, 2 }
 0x8ef   : > { %3225 = vmatpush1.bf16.msra.mxu1 %v4626_v9  ;;  %v3456_v3 = vsel %vm3453_vm6, %v3454_v2, %v3455_v1 }
 0x8f0   : > { %3377 = vmatprep.subr.bf16.mxu1 %v4880_v29 }
 0x8f2   : > { %3239 = vmatmul.mubr.bf16.vlgmr.msra.gmra.mrb[8].mxu1 %v3138_v18 }
 0x8f3   : > { %3378 = vmatpush1.bf16.msra.mxu1 %v4627_v16  ;;  %4156 = vmatprep.mubr.msk.bf16.mxu1 %vm2132_vm9, %v3312_v20 }
 0x8f4   : > { %3379 = vmatprep.subr.bf16.mxu1 %v4880_v29 }
 0x8f7   : > { %3380 = vmatpush1.bf16.msra.mxu1 %v4628_v22 }
 0x8f8   : > { %3381 = vmatprep.subr.bf16.mxu1 %v4880_v29 }
 0x8fb   : > { %3382 = vmatpush1.bf16.msra.mxu1 %v4629_v23 }
 0x8fc   : > { %3383 = vmatprep.subr.bf16.mxu1 %v4880_v29 }
 0x8ff   : > { %3384 = vmatpush1.bf16.msra.mxu1 %v4630_v24 }
 0x900   : > { %3385 = vmatprep.subr.bf16.mxu1 %v4880_v29 }
 0x903   : > { %3386 = vmatpush1.bf16.msra.mxu1 %v4631_v25 }
 0x904   : > { %3387 = vmatprep.subr.bf16.mxu1 %v4880_v29 }
 0x907   : > { %3388 = vmatpush1.bf16.msra.mxu1 %v4632_v26 }
 0x908   : > { %3389 = vmatprep.subr.bf16.mxu1 %v4880_v29 }
 0x90b   : > { %3390 = vmatpush1.bf16.msra.mxu1 %v4633_v28 }
 0x90c   : > { %3391 = vmatprep.subr.bf16.mxu1 %v4880_v29 }
 0x90f   : > { %3392 = vmatpush1.bf16.msra.mxu1 %v4634_v32 }
 0x910   : > { %3393 = vmatprep.subr.bf16.mxu1 %v4880_v29 }
 0x913   : > { %3394 = vmatpush1.bf16.msra.mxu1 %v4635_v35 }
 0x914   : > { %3395 = vmatprep.subr.bf16.mxu1 %v4880_v29 }
 0x917   : > { %3396 = vmatpush1.bf16.msra.mxu1 %v4636_v21 }
 0x918   : > { %3524 = vmatprep.subr.bf16.mxu1 %v4880_v29 }
 0x91a   : > { %3410 = vmatmul.mubr.bf16.vlgmr.msra.gmra.mrb[8].mxu1 %v3295_v50 }
 0x91b   : > { %3525 = vmatpush1.bf16.msra.mxu1 %v4637_v48  ;;  %4187 = vmatprep.mubr.msk.bf16.mxu1 %vm2132_vm9, %v3459_v51 }
 0x91c   : > { %3526 = vmatprep.subr.bf16.mxu1 %v4880_v29 }
 0x91f   : > { %3527 = vmatpush1.bf16.msra.mxu1 %v4638_v5 }
 0x920   : > { %3528 = vmatprep.subr.bf16.mxu1 %v4880_v29 }
 0x923   : > { %3529 = vmatpush1.bf16.msra.mxu1 %v4639_v52 }
 0x924   : > { %3530 = vmatprep.subr.bf16.mxu1 %v4880_v29 }
 0x927   : > { %3531 = vmatpush1.bf16.msra.mxu1 %v4640_v53 }
 0x928   : > { %3532 = vmatprep.subr.bf16.mxu1 %v4880_v29 }
 0x92b   : > { %3533 = vmatpush1.bf16.msra.mxu1 %v4641_v54 }
 0x92c   : > { %3534 = vmatprep.subr.bf16.mxu1 %v4880_v29 }
 0x92f   : > { %3535 = vmatpush1.bf16.msra.mxu1 %v4642_v55 }
 0x930   : > { %3536 = vmatprep.subr.bf16.mxu1 %v4880_v29 }
 0x933   : > { %3537 = vmatpush1.bf16.msra.mxu1 %v4643_v56 }
 0x934   : > { %3538 = vmatprep.subr.bf16.mxu1 %v4880_v29 }
 0x937   : > { %3539 = vmatpush1.bf16.msra.mxu1 %v4644_v57 }
 0x938   : > { %3540 = vmatprep.subr.bf16.mxu1 %v4880_v29 }
 0x93b   : > { %3541 = vmatpush1.bf16.msra.mxu1 %v4645_v59 }
 0x93c   : > { %3542 = vmatprep.subr.bf16.mxu1 %v4880_v29 }
 0x93f   : > { %3543 = vmatpush1.bf16.msra.mxu1 %v4646_v62 }
 0x942   : > { %3557 = vmatmul.mubr.bf16.vlgmr.msra.gmra.mrb[8].mxu1 %v3456_v3 }
 0xa15   : > { %v3558_v7 = vpop.f32.mrb[8].mxu1 }
 0xa16   : > { %v3574_v9 = vmul.f32 %v4188_v4, %v3558_v7  ;;  %v3560_v6 = vpop.f32.mrb[9].mxu1 }
 0xa17   : > { %v3561_v29 = vpop.f32.mrb[10].mxu1 }
 0xa18   : > { %v3583_v10 = vadd.f32 %v4189_v8, %v3574_v9  ;;  %v3575_v11 = vmul.f32 %v4188_v4, %v3561_v29  ;;  %v3563_v12 = vpop.f32.mrb[11].mxu1 }
 0xa1a   : > { %3586 = vst.msk [vmem:[%s689_s26] sm:$0xff] %vm3585_vm7, %v3583_v10  ;;  %v3584_v13 = vadd.f32 %v4189_v8, %v3575_v11 }
 0xa1c   : > { %3587 = vst.msk [vmem:[%s689_s26 + $0x8] sm:$0xff] %vm3585_vm7, %v3584_v13 }
 0xa1d PF: > { %s6107_s21 = sld [smem:[#allocation27_spill]] }
 0xa23   : > { %s33_s0 = sadd.s32 1, %s6107_s21  }
 0xa24   : > { %p30_p11 = scmp.ge.s32.totalorder %s33_s0, 4  }
 0xa26   :  { %32 = sbr.rel (!%p30_p11) target bundleno = 16 (0x10), region = 167 }
 0xa2d   :  { %3609 = vsyncpa [#allocation13], 1 }
 0xa2e   :  { %3611 = vsyncpa [#allocation13 + $0x1], 1 }
 0xa2f   :  { %3612 = vsyncpa [#allocation15], 1 }
 0xa30   :  { %3613 = vsyncpa [#allocation18], 1 }
 0xa31   :  { %3614 = vsyncpa [#allocation21], 1 }

</bundles_post_ra>
